<compile_context>
chip_gen: v7x
topology: tpu7x:2x2x1
jax: 0.10.0
libtpu: 0.0.40
codegen_flags: <defaults>
</compile_context>

<pallas_src>
import functools

import jax
import jax.numpy as jnp
from jax import lax
from jax.experimental import pallas as pl
from jax.experimental.pallas import tpu as pltpu


def _sigmoid(x):
    # tanh form of sigmoid: mathematically identical, single-EUP-op path.
    return 0.5 * (jnp.tanh(0.5 * x) + 1.0)


# -----------------------------------------------------------------------------
# Fused kernel: conv(+ReLU,+concat) -> LSTM -> Linear -> LogSoftmax
# -----------------------------------------------------------------------------
def _clstm_kernel(xpad_ref, wconv_ref, bconv_ref, wih_ref, whh_ref, blstm_ref,
                  h0_ref, c0_ref, wout_ref, bout_ref, o_ref, gx_sc,
                  *, T, Kmax, H):
    # xpad_ref : (Tp, Bb, D) bf16  time-major, zero-padded input block
    # wconv_ref: (Kmax, D, F) bf16 tap-aligned fused conv weights (all branches)
    # bconv_ref: (1, F) f32        fused conv bias
    # wih_ref  : (F, 4H) bf16      input projection (gate order i,f,g,o)
    # whh_ref  : (H, 4H) bf16      recurrent projection
    # blstm_ref: (1, 4H) f32       b_ih + b_hh
    # h0/c0    : (Bb, H) f32       initial state
    # wout_ref : (H, C) f32, bout_ref: (1, C) f32
    # o_ref    : (Bb, C) f32
    # gx_sc    : (T*Bb, 4H) f32    VMEM scratch: hoisted input gates
    Bb = h0_ref.shape[0]
    D = xpad_ref.shape[-1]

    # ---- conv: all branches + taps fused; M = T*Bb rows, lane-dense F out ----
    acc = jnp.dot(xpad_ref[0:T].reshape(T * Bb, D), wconv_ref[0],
                  preferred_element_type=jnp.float32)
    for j in range(1, Kmax):                     # static unroll -> Kmax MXU matmuls
        acc = acc + jnp.dot(xpad_ref[j:j + T].reshape(T * Bb, D), wconv_ref[j],
                            preferred_element_type=jnp.float32)
    cnn = jnp.maximum(acc + bconv_ref[...], 0.0)                       # (T*Bb, F)

    # ---- hoisted input projection: ONE (T*Bb, F) x (F, 4H) matmul, stored 2-D ----
    gx_sc[...] = (jnp.dot(cnn.astype(jnp.bfloat16), wih_ref[...],
                          preferred_element_type=jnp.float32) + blstm_ref[...])

    # ---- recurrence: only h @ W_hh + gate math per step (PyTorch order i,f,g,o) ----
    # NOTE: W_hh could be held resident in the MXU across steps via the explicit
    # pltpu.matmul_push_rhs / matmul_acc_lhs API; kept on jnp.dot for portability.
    def step(t, carry):
        h, c = carry
        start = pl.multiple_of(t * Bb, Bb)
        gates = gx_sc[pl.ds(start, Bb), :] + jnp.dot(
            h.astype(jnp.bfloat16), whh_ref[...],
            preferred_element_type=jnp.float32)                        # (Bb, 4H)
        i_f = _sigmoid(gates[:, 0:2 * H])        # one EUP op on aligned [i|f] block
        i = i_f[:, :H]
        f = i_f[:, H:]
        g = jnp.tanh(gates[:, 2 * H:3 * H])
        o = _sigmoid(gates[:, 3 * H:4 * H])
        c = f * c + i * g
        h = o * jnp.tanh(c)
        return h, c

    h_T, _ = lax.fori_loop(0, T, step, (h0_ref[...], c0_ref[...]), unroll=True)

    # TODO(synk): dropout_layer on ht[-1] implemented as identity (eval-mode semantics).

    # ---- head: Linear + LogSoftmax (f32) ----
    logits = (jnp.dot(h_T, wout_ref[...], preferred_element_type=jnp.float32)
              + bout_ref[...])
    m = jnp.max(logits, axis=-1, keepdims=True)
    s = logits - m
    o_ref[...] = s - jnp.log(jnp.sum(jnp.exp(s), axis=-1, keepdims=True))


# -----------------------------------------------------------------------------
# Host-side parameter packing (one-time weight layout conversion)
# -----------------------------------------------------------------------------
def pack_params(raw, *, KK):
    Kmax = max(KK)
    pmax = Kmax // 2
    D = raw["convs"][0][0].shape[1]
    Co = raw["convs"][0][0].shape[2]
    F = len(KK) * Co

    # Fused, tap-aligned conv weights: branch with kernel K / pad K//2 sits at
    # global taps [pmax - K//2, pmax + K//2] of the widest kernel's window.
    # (A PyTorch Conv2d weight (Co,1,K,D) corresponds to w[k,d,co] = W[co,0,k,d].)
    w_all = jnp.zeros((Kmax, D, F), jnp.float32)
    b_all = jnp.zeros((F,), jnp.float32)
    for idx, ((w, b), K) in enumerate(zip(raw["convs"], KK)):
        start = pmax - K // 2
        lo, hi = idx * Co, (idx + 1) * Co
        w_all = w_all.at[start:start + K, :, lo:hi].set(w)
        b_all = b_all.at[lo:hi].set(b)

    return {
        "wconv": w_all.astype(jnp.bfloat16),                 # (Kmax, D, F)
        "bconv": b_all[None, :],                             # (1, F)
        "w_ih": raw["w_ih"].astype(jnp.bfloat16),            # (F, 4H)  (torch W_ih^T)
        "w_hh": raw["w_hh"].astype(jnp.bfloat16),            # (H, 4H)  (torch W_hh^T)
        "b_lstm": raw["b_lstm"][None, :],                    # (1, 4H) = b_ih + b_hh
        "h0": raw["h0"],                                     # (B, H)
        "c0": raw["c0"],                                     # (B, H)
        "w_out": raw["w_out"],                               # (H, C)
        "b_out": raw["b_out"][None, :],                      # (1, C)
    }


def _pick_block_b(B):
    # 2 TensorCores per chip (v7x / megacore v4/v5p): split the batch so each core
    # runs one independent recurrence chain.  Single-TC chips (v5e/v6e): one block
    # -> ONE serial LSTM chain instead of two back-to-back, and full-M one-shot
    # conv / input-projection matmuls.  Misdetection falls back to the safe nb=1.
    try:
        kind = jax.devices()[0].device_kind.lower()
    except Exception:
        kind = ""
    two_tc = any(t in kind for t in ("v7", "7x", "v4", "v5p"))
    half = B // 2
    if two_tc and B % 2 == 0 and (half % 8 == 0 or half == B):
        return half
    return B


# -----------------------------------------------------------------------------
# Forward wrapper (single pallas_call)
# -----------------------------------------------------------------------------
def clstm_forward(x, p, *, KK, block_b=None):
    B, T, D = x.shape
    Kmax = max(KK)
    pmax = Kmax // 2
    Tp = T + 2 * pmax
    F = p["wconv"].shape[-1]
    H = p["h0"].shape[-1]
    C = p["w_out"].shape[-1]
    if block_b is None:
        block_b = _pick_block_b(B)
    assert B % block_b == 0 and (block_b % 8 == 0 or block_b == B)
    nb = B // block_b

    # Only host-side layout work: time-major transpose + zero-pad + bf16 cast of
    # the raw input (single fused XLA copy feeding the one kernel launch).
    xpad = jnp.pad(jnp.transpose(x, (1, 0, 2)),
                   ((pmax, pmax), (0, 0), (0, 0))).astype(jnp.bfloat16)

    kernel = functools.partial(_clstm_kernel, T=T, Kmax=Kmax, H=H)
    return pl.pallas_call(
        kernel,
        out_shape=jax.ShapeDtypeStruct((B, C), jnp.float32),
        grid=(nb,),
        in_specs=[
            pl.BlockSpec((Tp, block_b, D), lambda i: (0, i, 0)),
            pl.BlockSpec((Kmax, D, F), lambda i: (0, 0, 0)),
            pl.BlockSpec((1, F), lambda i: (0, 0)),
            pl.BlockSpec((F, 4 * H), lambda i: (0, 0)),
            pl.BlockSpec((H, 4 * H), lambda i: (0, 0)),
            pl.BlockSpec((1, 4 * H), lambda i: (0, 0)),
            pl.BlockSpec((block_b, H), lambda i: (i, 0)),
            pl.BlockSpec((block_b, H), lambda i: (i, 0)),
            pl.BlockSpec((H, C), lambda i: (0, 0)),
            pl.BlockSpec((1, C), lambda i: (0, 0)),
        ],
        out_specs=pl.BlockSpec((block_b, C), lambda i: (i, 0)),
        scratch_shapes=[pltpu.VMEM((T * block_b, 4 * H), jnp.float32)],
        compiler_params=pltpu.CompilerParams(dimension_semantics=("parallel",)),
    )(xpad, p["wconv"], p["bconv"], p["w_ih"], p["w_hh"], p["b_lstm"],
      p["h0"], p["c0"], p["w_out"], p["b_out"])


# -----------------------------------------------------------------------------
# Pure-JAX reference (float32) for correctness checking
# -----------------------------------------------------------------------------
def clstm_reference(x, raw, KK):
    B, T, D = x.shape
    outs = []
    for (w, b), K in zip(raw["convs"], KK):
        pad = K // 2
        xp = jnp.pad(x, ((0, 0), (pad, pad), (0, 0)))
        y = sum(jnp.einsum("btd,dc->btc", xp[:, k:k + T, :], w[k])
                for k in range(K)) + b
        outs.append(jax.nn.relu(y))
    cnn = jnp.concatenate(outs, axis=-1)                               # (B, T, F)

    H = raw["h0"].shape[-1]
    wih, whh, bl = raw["w_ih"], raw["w_hh"], raw["b_lstm"]

    def step(carry, xt):
        h, c = carry
        gates = xt @ wih + h @ whh + bl
        i = jax.nn.sigmoid(gates[:, 0 * H:1 * H])
        f = jax.nn.sigmoid(gates[:, 1 * H:2 * H])
        g = jnp.tanh(gates[:, 2 * H:3 * H])
        o = jax.nn.sigmoid(gates[:, 3 * H:4 * H])
        c = f * c + i * g
        h = o * jnp.tanh(c)
        return (h, c), None

    (h_T, _), _ = lax.scan(step, (raw["h0"], raw["c0"]),
                           jnp.transpose(cnn, (1, 0, 2)))
    logits = h_T @ raw["w_out"] + raw["b_out"]
    return jax.nn.log_softmax(logits, axis=-1)


if __name__ == "__main__":
    # Small, module-consistent shapes.
    B, T, D = 16, 16, 128         # batch, seq len, embedding_dim
    kernel_sizes = [3, 4]         # Ks -> KK = [3, 5] (module bumps even K to odd)
    KK = [k + 1 if k % 2 == 0 else k for k in kernel_sizes]
    Co = 64                       # kernel_num
    H = 64                        # lstm_hidden_dim
    C = 2                         # output_size
    F = len(KK) * Co              # LSTM input feature size (what the forward implies)

    key = jax.random.PRNGKey(0)
    ks = list(jax.random.split(key, 2 * len(KK) + 7))

    convs = []
    for idx, K in enumerate(KK):
        scale = 1.0 / jnp.sqrt(K * D)
        w = jax.random.uniform(ks[2 * idx], (K, D, Co), jnp.float32, -scale, scale)
        b = jax.random.uniform(ks[2 * idx + 1], (Co,), jnp.float32, -scale, scale)
        convs.append((w, b))

    kw = ks[2 * len(KK):]
    s = 1.0 / jnp.sqrt(H)
    raw = {
        "convs": convs,
        "w_ih": jax.random.uniform(kw[0], (F, 4 * H), jnp.float32, -s, s),
        "w_hh": jax.random.uniform(kw[1], (H, 4 * H), jnp.float32, -s, s),
        "b_lstm": jax.random.uniform(kw[2], (4 * H,), jnp.float32, -s, s),  # b_ih + b_hh
        "w_out": jax.random.uniform(kw[3], (H, C), jnp.float32, -s, s),
        "b_out": jnp.zeros((C,), jnp.float32),
        # init_hidden: torch.randn -> deterministic normal here
        "h0": jax.random.normal(kw[4], (B, H), jnp.float32),
        "c0": jax.random.normal(kw[5], (B, H), jnp.float32),
    }
    x = jax.random.normal(kw[6], (B, T, D), jnp.float32)

    params = pack_params(raw, KK=KK)
    block_b = _pick_block_b(B)
    fwd = jax.jit(functools.partial(clstm_forward, KK=tuple(KK), block_b=block_b))

    out = fwd(x, params)
    jax.block_until_ready(out)

    assert out.shape == (B, C)
    assert bool(jnp.all(jnp.isfinite(out)))
    # log-softmax rows exponentiate to probabilities summing to 1
    assert bool(jnp.allclose(jnp.sum(jnp.exp(out), axis=-1), 1.0, atol=1e-3))
    # match the f32 reference within bf16-operand tolerance
    ref = clstm_reference(x, raw, KK)
    assert bool(jnp.allclose(out, ref, atol=5e-2)), float(jnp.max(jnp.abs(out - ref)))
    print("KERNEL_OK")
</pallas_src>

<mosaic_0001>
module attributes {stable_mosaic.version = 11 : i64} {
  func.func @_clstm_kernel(%arg0: i32, %arg1: memref<20x16x128xbf16, #tpu.memory_space<vmem>>, %arg2: memref<5x128x128xbf16, #tpu.memory_space<vmem>>, %arg3: memref<1x128xf32, #tpu.memory_space<vmem>>, %arg4: memref<128x256xbf16, #tpu.memory_space<vmem>>, %arg5: memref<64x256xbf16, #tpu.memory_space<vmem>>, %arg6: memref<1x256xf32, #tpu.memory_space<vmem>>, %arg7: memref<16x64xf32, #tpu.memory_space<vmem>>, %arg8: memref<16x64xf32, #tpu.memory_space<vmem>>, %arg9: memref<64x2xf32, #tpu.memory_space<vmem>>, %arg10: memref<1x2xf32, #tpu.memory_space<vmem>>, %arg11: memref<16x2xf32, #tpu.memory_space<vmem>>, %arg12: memref<256x256xf32, #tpu.memory_space<vmem>>) attributes {dimension_semantics = [#tpu.dimension_semantics<parallel>], iteration_bounds = array<i64: 1>, scalar_prefetch = 0 : i64, scratch_operands = 1 : i64, tpu.core_type = #tpu.core_type<tc>, window_params = [{transform_indices = @transform_0, window_bounds = array<i64: 20, 16, 128>}, {pipeline_mode = #tpu.pipeline_mode<synchronous>, transform_indices = @transform_1, window_bounds = array<i64: 5, 128, 128>}, {pipeline_mode = #tpu.pipeline_mode<synchronous>, transform_indices = @transform_2, window_bounds = array<i64: 1, 128>}, {pipeline_mode = #tpu.pipeline_mode<synchronous>, transform_indices = @transform_3, window_bounds = array<i64: 128, 256>}, {pipeline_mode = #tpu.pipeline_mode<synchronous>, transform_indices = @transform_4, window_bounds = array<i64: 64, 256>}, {pipeline_mode = #tpu.pipeline_mode<synchronous>, transform_indices = @transform_5, window_bounds = array<i64: 1, 256>}, {transform_indices = @transform_6, window_bounds = array<i64: 16, 64>}, {transform_indices = @transform_7, window_bounds = array<i64: 16, 64>}, {pipeline_mode = #tpu.pipeline_mode<synchronous>, transform_indices = @transform_8, window_bounds = array<i64: 64, 2>}, {pipeline_mode = #tpu.pipeline_mode<synchronous>, transform_indices = @transform_9, window_bounds = array<i64: 1, 2>}, {transform_indices = @transform_10, window_bounds = array<i64: 16, 2>}]} {
    %c0 = arith.constant 0 : index
    %c0_0 = arith.constant 0 : index
    %c0_1 = arith.constant 0 : index
    %0 = vector.load %arg1[%c0, %c0_0, %c0_1] : memref<20x16x128xbf16, #tpu.memory_space<vmem>>, vector<16x16x128xbf16>
    %1 = vector.shape_cast %0 : vector<16x16x128xbf16> to vector<256x128xbf16>
    %c0_2 = arith.constant 0 : index
    %c0_3 = arith.constant 0 : index
    %c0_4 = arith.constant 0 : index
    %2 = vector.load %arg2[%c0_2, %c0_3, %c0_4] : memref<5x128x128xbf16, #tpu.memory_space<vmem>>, vector<1x128x128xbf16>
    %3 = vector.shape_cast %2 : vector<1x128x128xbf16> to vector<128x128xbf16>
    %cst = arith.constant dense<0.000000e+00> : vector<256x128xf32>
    %4 = tpu.matmul %1, %3, %cst {dimension_numbers = #tpu.dot_dimension_numbers<[1], [0], [0], [1], [0, 0, 1, 1], [], []>} : vector<256x128xbf16>, vector<128x128xbf16>, vector<256x128xf32> -> vector<256x128xf32>
    %c1 = arith.constant 1 : index
    %c0_5 = arith.constant 0 : index
    %c0_6 = arith.constant 0 : index
    %5 = vector.load %arg1[%c1, %c0_5, %c0_6] : memref<20x16x128xbf16, #tpu.memory_space<vmem>>, vector<16x16x128xbf16>
    %6 = vector.shape_cast %5 : vector<16x16x128xbf16> to vector<256x128xbf16>
    %c1_7 = arith.constant 1 : index
    %c0_8 = arith.constant 0 : index
    %c0_9 = arith.constant 0 : index
    %7 = vector.load %arg2[%c1_7, %c0_8, %c0_9] : memref<5x128x128xbf16, #tpu.memory_space<vmem>>, vector<1x128x128xbf16>
    %8 = vector.shape_cast %7 : vector<1x128x128xbf16> to vector<128x128xbf16>
    %cst_10 = arith.constant dense<0.000000e+00> : vector<256x128xf32>
    %9 = tpu.matmul %6, %8, %cst_10 {dimension_numbers = #tpu.dot_dimension_numbers<[1], [0], [0], [1], [0, 0, 1, 1], [], []>} : vector<256x128xbf16>, vector<128x128xbf16>, vector<256x128xf32> -> vector<256x128xf32>
    %10 = arith.addf %4, %9 : vector<256x128xf32>
    %c2 = arith.constant 2 : index
    %c0_11 = arith.constant 0 : index
    %c0_12 = arith.constant 0 : index
    %11 = vector.load %arg1[%c2, %c0_11, %c0_12] : memref<20x16x128xbf16, #tpu.memory_space<vmem>>, vector<16x16x128xbf16>
    %12 = vector.shape_cast %11 : vector<16x16x128xbf16> to vector<256x128xbf16>
    %c2_13 = arith.constant 2 : index
    %c0_14 = arith.constant 0 : index
    %c0_15 = arith.constant 0 : index
    %13 = vector.load %arg2[%c2_13, %c0_14, %c0_15] : memref<5x128x128xbf16, #tpu.memory_space<vmem>>, vector<1x128x128xbf16>
    %14 = vector.shape_cast %13 : vector<1x128x128xbf16> to vector<128x128xbf16>
    %cst_16 = arith.constant dense<0.000000e+00> : vector<256x128xf32>
    %15 = tpu.matmul %12, %14, %cst_16 {dimension_numbers = #tpu.dot_dimension_numbers<[1], [0], [0], [1], [0, 0, 1, 1], [], []>} : vector<256x128xbf16>, vector<128x128xbf16>, vector<256x128xf32> -> vector<256x128xf32>
    %16 = arith.addf %10, %15 : vector<256x128xf32>
    %c3 = arith.constant 3 : index
    %c0_17 = arith.constant 0 : index
    %c0_18 = arith.constant 0 : index
    %17 = vector.load %arg1[%c3, %c0_17, %c0_18] : memref<20x16x128xbf16, #tpu.memory_space<vmem>>, vector<16x16x128xbf16>
    %18 = vector.shape_cast %17 : vector<16x16x128xbf16> to vector<256x128xbf16>
    %c3_19 = arith.constant 3 : index
    %c0_20 = arith.constant 0 : index
    %c0_21 = arith.constant 0 : index
    %19 = vector.load %arg2[%c3_19, %c0_20, %c0_21] : memref<5x128x128xbf16, #tpu.memory_space<vmem>>, vector<1x128x128xbf16>
    %20 = vector.shape_cast %19 : vector<1x128x128xbf16> to vector<128x128xbf16>
    %cst_22 = arith.constant dense<0.000000e+00> : vector<256x128xf32>
    %21 = tpu.matmul %18, %20, %cst_22 {dimension_numbers = #tpu.dot_dimension_numbers<[1], [0], [0], [1], [0, 0, 1, 1], [], []>} : vector<256x128xbf16>, vector<128x128xbf16>, vector<256x128xf32> -> vector<256x128xf32>
    %22 = arith.addf %16, %21 : vector<256x128xf32>
    %c4 = arith.constant 4 : index
    %c0_23 = arith.constant 0 : index
    %c0_24 = arith.constant 0 : index
    %23 = vector.load %arg1[%c4, %c0_23, %c0_24] : memref<20x16x128xbf16, #tpu.memory_space<vmem>>, vector<16x16x128xbf16>
    %24 = vector.shape_cast %23 : vector<16x16x128xbf16> to vector<256x128xbf16>
    %c4_25 = arith.constant 4 : index
    %c0_26 = arith.constant 0 : index
    %c0_27 = arith.constant 0 : index
    %25 = vector.load %arg2[%c4_25, %c0_26, %c0_27] : memref<5x128x128xbf16, #tpu.memory_space<vmem>>, vector<1x128x128xbf16>
    %26 = vector.shape_cast %25 : vector<1x128x128xbf16> to vector<128x128xbf16>
    %cst_28 = arith.constant dense<0.000000e+00> : vector<256x128xf32>
    %27 = tpu.matmul %24, %26, %cst_28 {dimension_numbers = #tpu.dot_dimension_numbers<[1], [0], [0], [1], [0, 0, 1, 1], [], []>} : vector<256x128xbf16>, vector<128x128xbf16>, vector<256x128xf32> -> vector<256x128xf32>
    %28 = arith.addf %22, %27 : vector<256x128xf32>
    %c0_29 = arith.constant 0 : index
    %c0_30 = arith.constant 0 : index
    %29 = vector.load %arg3[%c0_29, %c0_30] : memref<1x128xf32, #tpu.memory_space<vmem>>, vector<1x128xf32>
    %30 = vector.broadcast %29 : vector<1x128xf32> to vector<256x128xf32>
    %31 = arith.addf %28, %30 : vector<256x128xf32>
    %cst_31 = arith.constant 0.000000e+00 : f32
    %32 = vector.broadcast %cst_31 : f32 to vector<256x128xf32>
    %33 = arith.maximumf %31, %32 : vector<256x128xf32>
    %34 = arith.truncf %33 : vector<256x128xf32> to vector<256x128xbf16>
    %c0_32 = arith.constant 0 : index
    %c0_33 = arith.constant 0 : index
    %35 = vector.load %arg4[%c0_32, %c0_33] : memref<128x256xbf16, #tpu.memory_space<vmem>>, vector<128x256xbf16>
    %cst_34 = arith.constant dense<0.000000e+00> : vector<256x256xf32>
    %36 = tpu.matmul %34, %35, %cst_34 {dimension_numbers = #tpu.dot_dimension_numbers<[1], [0], [0], [1], [0, 0, 1, 1], [], []>} : vector<256x128xbf16>, vector<128x256xbf16>, vector<256x256xf32> -> vector<256x256xf32>
    %c0_35 = arith.constant 0 : index
    %c0_36 = arith.constant 0 : index
    %37 = vector.load %arg6[%c0_35, %c0_36] : memref<1x256xf32, #tpu.memory_space<vmem>>, vector<1x256xf32>
    %38 = vector.broadcast %37 : vector<1x256xf32> to vector<256x256xf32>
    %39 = arith.addf %36, %38 : vector<256x256xf32>
    %c0_37 = arith.constant 0 : index
    %c0_38 = arith.constant 0 : index
    %40 = vector.load %arg12[%c0_37, %c0_38] : memref<256x256xf32, #tpu.memory_space<vmem>>, vector<256x256xf32>
    tpu.vector_store %arg12[%c0_37, %c0_38], %39 {strides = array<i32>} : memref<256x256xf32, #tpu.memory_space<vmem>>, vector<256x256xf32>,
    %c0_39 = arith.constant 0 : index
    %c0_40 = arith.constant 0 : index
    %41 = vector.load %arg7[%c0_39, %c0_40] : memref<16x64xf32, #tpu.memory_space<vmem>>, vector<16x64xf32>
    %c0_41 = arith.constant 0 : index
    %c0_42 = arith.constant 0 : index
    %42 = vector.load %arg8[%c0_41, %c0_42] : memref<16x64xf32, #tpu.memory_space<vmem>>, vector<16x64xf32>
    %c0_i32 = arith.constant 0 : i32
    %c16_i32 = arith.constant 16 : i32
    %43 = arith.muli %c0_i32, %c16_i32 : i32
    %44 = tpu.assume_multiple %43, 16 : i32
    %45 = arith.index_cast %44 : i32 to index
    %c0_43 = arith.constant 0 : index
    %46 = vector.load %arg12[%45, %c0_43] : memref<256x256xf32, #tpu.memory_space<vmem>>, vector<16x256xf32>
    %47 = arith.truncf %41 : vector<16x64xf32> to vector<16x64xbf16>
    %c0_44 = arith.constant 0 : index
    %c0_45 = arith.constant 0 : index
    %48 = vector.load %arg5[%c0_44, %c0_45] : memref<64x256xbf16, #tpu.memory_space<vmem>>, vector<64x256xbf16>
    %cst_46 = arith.constant dense<0.000000e+00> : vector<16x256xf32>
    %49 = tpu.matmul %47, %48, %cst_46 {dimension_numbers = #tpu.dot_dimension_numbers<[1], [0], [0], [1], [0, 0, 1, 1], [], []>} : vector<16x64xbf16>, vector<64x256xbf16>, vector<16x256xf32> -> vector<16x256xf32>
    %50 = arith.addf %46, %49 : vector<16x256xf32>
    %51 = vector.extract_strided_slice %50 {offsets = [0, 0], sizes = [16, 128], strides = [1, 1]} : vector<16x256xf32> to vector<16x128xf32>
    %cst_47 = arith.constant 5.000000e-01 : f32
    %52 = vector.broadcast %cst_47 : f32 to vector<16x128xf32>
    %53 = arith.mulf %52, %51 : vector<16x128xf32>
    %54 = math.tanh %53 : vector<16x128xf32>
    %cst_48 = arith.constant 1.000000e+00 : f32
    %55 = vector.broadcast %cst_48 : f32 to vector<16x128xf32>
    %56 = arith.addf %54, %55 : vector<16x128xf32>
    %cst_49 = arith.constant 5.000000e-01 : f32
    %57 = vector.broadcast %cst_49 : f32 to vector<16x128xf32>
    %58 = arith.mulf %57, %56 : vector<16x128xf32>
    %59 = vector.extract_strided_slice %58 {offsets = [0, 0], sizes = [16, 64], strides = [1, 1]} : vector<16x128xf32> to vector<16x64xf32>
    %60 = vector.extract_strided_slice %58 {offsets = [0, 64], sizes = [16, 64], strides = [1, 1]} : vector<16x128xf32> to vector<16x64xf32>
    %61 = vector.extract_strided_slice %50 {offsets = [0, 128], sizes = [16, 64], strides = [1, 1]} : vector<16x256xf32> to vector<16x64xf32>
    %62 = math.tanh %61 : vector<16x64xf32>
    %63 = vector.extract_strided_slice %50 {offsets = [0, 192], sizes = [16, 64], strides = [1, 1]} : vector<16x256xf32> to vector<16x64xf32>
    %cst_50 = arith.constant 5.000000e-01 : f32
    %64 = vector.broadcast %cst_50 : f32 to vector<16x64xf32>
    %65 = arith.mulf %64, %63 : vector<16x64xf32>
    %66 = math.tanh %65 : vector<16x64xf32>
    %cst_51 = arith.constant 1.000000e+00 : f32
    %67 = vector.broadcast %cst_51 : f32 to vector<16x64xf32>
    %68 = arith.addf %66, %67 : vector<16x64xf32>
    %cst_52 = arith.constant 5.000000e-01 : f32
    %69 = vector.broadcast %cst_52 : f32 to vector<16x64xf32>
    %70 = arith.mulf %69, %68 : vector<16x64xf32>
    %71 = arith.mulf %60, %42 : vector<16x64xf32>
    %72 = arith.mulf %59, %62 : vector<16x64xf32>
    %73 = arith.addf %71, %72 : vector<16x64xf32>
    %74 = math.tanh %73 : vector<16x64xf32>
    %75 = arith.mulf %70, %74 : vector<16x64xf32>
    %c1_i32 = arith.constant 1 : i32
    %c16_i32_53 = arith.constant 16 : i32
    %76 = arith.muli %c1_i32, %c16_i32_53 : i32
    %77 = tpu.assume_multiple %76, 16 : i32
    %78 = arith.index_cast %77 : i32 to index
    %c0_54 = arith.constant 0 : index
    %79 = vector.load %arg12[%78, %c0_54] : memref<256x256xf32, #tpu.memory_space<vmem>>, vector<16x256xf32>
    %80 = arith.truncf %75 : vector<16x64xf32> to vector<16x64xbf16>
    %c0_55 = arith.constant 0 : index
    %c0_56 = arith.constant 0 : index
    %81 = vector.load %arg5[%c0_55, %c0_56] : memref<64x256xbf16, #tpu.memory_space<vmem>>, vector<64x256xbf16>
    %cst_57 = arith.constant dense<0.000000e+00> : vector<16x256xf32>
    %82 = tpu.matmul %80, %81, %cst_57 {dimension_numbers = #tpu.dot_dimension_numbers<[1], [0], [0], [1], [0, 0, 1, 1], [], []>} : vector<16x64xbf16>, vector<64x256xbf16>, vector<16x256xf32> -> vector<16x256xf32>
    %83 = arith.addf %79, %82 : vector<16x256xf32>
    %84 = vector.extract_strided_slice %83 {offsets = [0, 0], sizes = [16, 128], strides = [1, 1]} : vector<16x256xf32> to vector<16x128xf32>
    %cst_58 = arith.constant 5.000000e-01 : f32
    %85 = vector.broadcast %cst_58 : f32 to vector<16x128xf32>
    %86 = arith.mulf %85, %84 : vector<16x128xf32>
    %87 = math.tanh %86 : vector<16x128xf32>
    %cst_59 = arith.constant 1.000000e+00 : f32
    %88 = vector.broadcast %cst_59 : f32 to vector<16x128xf32>
    %89 = arith.addf %87, %88 : vector<16x128xf32>
    %cst_60 = arith.constant 5.000000e-01 : f32
    %90 = vector.broadcast %cst_60 : f32 to vector<16x128xf32>
    %91 = arith.mulf %90, %89 : vector<16x128xf32>
    %92 = vector.extract_strided_slice %91 {offsets = [0, 0], sizes = [16, 64], strides = [1, 1]} : vector<16x128xf32> to vector<16x64xf32>
    %93 = vector.extract_strided_slice %91 {offsets = [0, 64], sizes = [16, 64], strides = [1, 1]} : vector<16x128xf32> to vector<16x64xf32>
    %94 = vector.extract_strided_slice %83 {offsets = [0, 128], sizes = [16, 64], strides = [1, 1]} : vector<16x256xf32> to vector<16x64xf32>
    %95 = math.tanh %94 : vector<16x64xf32>
    %96 = vector.extract_strided_slice %83 {offsets = [0, 192], sizes = [16, 64], strides = [1, 1]} : vector<16x256xf32> to vector<16x64xf32>
    %cst_61 = arith.constant 5.000000e-01 : f32
    %97 = vector.broadcast %cst_61 : f32 to vector<16x64xf32>
    %98 = arith.mulf %97, %96 : vector<16x64xf32>
    %99 = math.tanh %98 : vector<16x64xf32>
    %cst_62 = arith.constant 1.000000e+00 : f32
    %100 = vector.broadcast %cst_62 : f32 to vector<16x64xf32>
    %101 = arith.addf %99, %100 : vector<16x64xf32>
    %cst_63 = arith.constant 5.000000e-01 : f32
    %102 = vector.broadcast %cst_63 : f32 to vector<16x64xf32>
    %103 = arith.mulf %102, %101 : vector<16x64xf32>
    %104 = arith.mulf %93, %73 : vector<16x64xf32>
    %105 = arith.mulf %92, %95 : vector<16x64xf32>
    %106 = arith.addf %104, %105 : vector<16x64xf32>
    %107 = math.tanh %106 : vector<16x64xf32>
    %108 = arith.mulf %103, %107 : vector<16x64xf32>
    %c2_i32 = arith.constant 2 : i32
    %c16_i32_64 = arith.constant 16 : i32
    %109 = arith.muli %c2_i32, %c16_i32_64 : i32
    %110 = tpu.assume_multiple %109, 16 : i32
    %111 = arith.index_cast %110 : i32 to index
    %c0_65 = arith.constant 0 : index
    %112 = vector.load %arg12[%111, %c0_65] : memref<256x256xf32, #tpu.memory_space<vmem>>, vector<16x256xf32>
    %113 = arith.truncf %108 : vector<16x64xf32> to vector<16x64xbf16>
    %c0_66 = arith.constant 0 : index
    %c0_67 = arith.constant 0 : index
    %114 = vector.load %arg5[%c0_66, %c0_67] : memref<64x256xbf16, #tpu.memory_space<vmem>>, vector<64x256xbf16>
    %cst_68 = arith.constant dense<0.000000e+00> : vector<16x256xf32>
    %115 = tpu.matmul %113, %114, %cst_68 {dimension_numbers = #tpu.dot_dimension_numbers<[1], [0], [0], [1], [0, 0, 1, 1], [], []>} : vector<16x64xbf16>, vector<64x256xbf16>, vector<16x256xf32> -> vector<16x256xf32>
    %116 = arith.addf %112, %115 : vector<16x256xf32>
    %117 = vector.extract_strided_slice %116 {offsets = [0, 0], sizes = [16, 128], strides = [1, 1]} : vector<16x256xf32> to vector<16x128xf32>
    %cst_69 = arith.constant 5.000000e-01 : f32
    %118 = vector.broadcast %cst_69 : f32 to vector<16x128xf32>
    %119 = arith.mulf %118, %117 : vector<16x128xf32>
    %120 = math.tanh %119 : vector<16x128xf32>
    %cst_70 = arith.constant 1.000000e+00 : f32
    %121 = vector.broadcast %cst_70 : f32 to vector<16x128xf32>
    %122 = arith.addf %120, %121 : vector<16x128xf32>
    %cst_71 = arith.constant 5.000000e-01 : f32
    %123 = vector.broadcast %cst_71 : f32 to vector<16x128xf32>
    %124 = arith.mulf %123, %122 : vector<16x128xf32>
    %125 = vector.extract_strided_slice %124 {offsets = [0, 0], sizes = [16, 64], strides = [1, 1]} : vector<16x128xf32> to vector<16x64xf32>
    %126 = vector.extract_strided_slice %124 {offsets = [0, 64], sizes = [16, 64], strides = [1, 1]} : vector<16x128xf32> to vector<16x64xf32>
    %127 = vector.extract_strided_slice %116 {offsets = [0, 128], sizes = [16, 64], strides = [1, 1]} : vector<16x256xf32> to vector<16x64xf32>
    %128 = math.tanh %127 : vector<16x64xf32>
    %129 = vector.extract_strided_slice %116 {offsets = [0, 192], sizes = [16, 64], strides = [1, 1]} : vector<16x256xf32> to vector<16x64xf32>
    %cst_72 = arith.constant 5.000000e-01 : f32
    %130 = vector.broadcast %cst_72 : f32 to vector<16x64xf32>
    %131 = arith.mulf %130, %129 : vector<16x64xf32>
    %132 = math.tanh %131 : vector<16x64xf32>
    %cst_73 = arith.constant 1.000000e+00 : f32
    %133 = vector.broadcast %cst_73 : f32 to vector<16x64xf32>
    %134 = arith.addf %132, %133 : vector<16x64xf32>
    %cst_74 = arith.constant 5.000000e-01 : f32
    %135 = vector.broadcast %cst_74 : f32 to vector<16x64xf32>
    %136 = arith.mulf %135, %134 : vector<16x64xf32>
    %137 = arith.mulf %126, %106 : vector<16x64xf32>
    %138 = arith.mulf %125, %128 : vector<16x64xf32>
    %139 = arith.addf %137, %138 : vector<16x64xf32>
    %140 = math.tanh %139 : vector<16x64xf32>
    %141 = arith.mulf %136, %140 : vector<16x64xf32>
    %c3_i32 = arith.constant 3 : i32
    %c16_i32_75 = arith.constant 16 : i32
    %142 = arith.muli %c3_i32, %c16_i32_75 : i32
    %143 = tpu.assume_multiple %142, 16 : i32
    %144 = arith.index_cast %143 : i32 to index
    %c0_76 = arith.constant 0 : index
    %145 = vector.load %arg12[%144, %c0_76] : memref<256x256xf32, #tpu.memory_space<vmem>>, vector<16x256xf32>
    %146 = arith.truncf %141 : vector<16x64xf32> to vector<16x64xbf16>
    %c0_77 = arith.constant 0 : index
    %c0_78 = arith.constant 0 : index
    %147 = vector.load %arg5[%c0_77, %c0_78] : memref<64x256xbf16, #tpu.memory_space<vmem>>, vector<64x256xbf16>
    %cst_79 = arith.constant dense<0.000000e+00> : vector<16x256xf32>
    %148 = tpu.matmul %146, %147, %cst_79 {dimension_numbers = #tpu.dot_dimension_numbers<[1], [0], [0], [1], [0, 0, 1, 1], [], []>} : vector<16x64xbf16>, vector<64x256xbf16>, vector<16x256xf32> -> vector<16x256xf32>
    %149 = arith.addf %145, %148 : vector<16x256xf32>
    %150 = vector.extract_strided_slice %149 {offsets = [0, 0], sizes = [16, 128], strides = [1, 1]} : vector<16x256xf32> to vector<16x128xf32>
    %cst_80 = arith.constant 5.000000e-01 : f32
    %151 = vector.broadcast %cst_80 : f32 to vector<16x128xf32>
    %152 = arith.mulf %151, %150 : vector<16x128xf32>
    %153 = math.tanh %152 : vector<16x128xf32>
    %cst_81 = arith.constant 1.000000e+00 : f32
    %154 = vector.broadcast %cst_81 : f32 to vector<16x128xf32>
    %155 = arith.addf %153, %154 : vector<16x128xf32>
    %cst_82 = arith.constant 5.000000e-01 : f32
    %156 = vector.broadcast %cst_82 : f32 to vector<16x128xf32>
    %157 = arith.mulf %156, %155 : vector<16x128xf32>
    %158 = vector.extract_strided_slice %157 {offsets = [0, 0], sizes = [16, 64], strides = [1, 1]} : vector<16x128xf32> to vector<16x64xf32>
    %159 = vector.extract_strided_slice %157 {offsets = [0, 64], sizes = [16, 64], strides = [1, 1]} : vector<16x128xf32> to vector<16x64xf32>
    %160 = vector.extract_strided_slice %149 {offsets = [0, 128], sizes = [16, 64], strides = [1, 1]} : vector<16x256xf32> to vector<16x64xf32>
    %161 = math.tanh %160 : vector<16x64xf32>
    %162 = vector.extract_strided_slice %149 {offsets = [0, 192], sizes = [16, 64], strides = [1, 1]} : vector<16x256xf32> to vector<16x64xf32>
    %cst_83 = arith.constant 5.000000e-01 : f32
    %163 = vector.broadcast %cst_83 : f32 to vector<16x64xf32>
    %164 = arith.mulf %163, %162 : vector<16x64xf32>
    %165 = math.tanh %164 : vector<16x64xf32>
    %cst_84 = arith.constant 1.000000e+00 : f32
    %166 = vector.broadcast %cst_84 : f32 to vector<16x64xf32>
    %167 = arith.addf %165, %166 : vector<16x64xf32>
    %cst_85 = arith.constant 5.000000e-01 : f32
    %168 = vector.broadcast %cst_85 : f32 to vector<16x64xf32>
    %169 = arith.mulf %168, %167 : vector<16x64xf32>
    %170 = arith.mulf %159, %139 : vector<16x64xf32>
    %171 = arith.mulf %158, %161 : vector<16x64xf32>
    %172 = arith.addf %170, %171 : vector<16x64xf32>
    %173 = math.tanh %172 : vector<16x64xf32>
    %174 = arith.mulf %169, %173 : vector<16x64xf32>
    %c4_i32 = arith.constant 4 : i32
    %c16_i32_86 = arith.constant 16 : i32
    %175 = arith.muli %c4_i32, %c16_i32_86 : i32
    %176 = tpu.assume_multiple %175, 16 : i32
    %177 = arith.index_cast %176 : i32 to index
    %c0_87 = arith.constant 0 : index
    %178 = vector.load %arg12[%177, %c0_87] : memref<256x256xf32, #tpu.memory_space<vmem>>, vector<16x256xf32>
    %179 = arith.truncf %174 : vector<16x64xf32> to vector<16x64xbf16>
    %c0_88 = arith.constant 0 : index
    %c0_89 = arith.constant 0 : index
    %180 = vector.load %arg5[%c0_88, %c0_89] : memref<64x256xbf16, #tpu.memory_space<vmem>>, vector<64x256xbf16>
    %cst_90 = arith.constant dense<0.000000e+00> : vector<16x256xf32>
    %181 = tpu.matmul %179, %180, %cst_90 {dimension_numbers = #tpu.dot_dimension_numbers<[1], [0], [0], [1], [0, 0, 1, 1], [], []>} : vector<16x64xbf16>, vector<64x256xbf16>, vector<16x256xf32> -> vector<16x256xf32>
    %182 = arith.addf %178, %181 : vector<16x256xf32>
    %183 = vector.extract_strided_slice %182 {offsets = [0, 0], sizes = [16, 128], strides = [1, 1]} : vector<16x256xf32> to vector<16x128xf32>
    %cst_91 = arith.constant 5.000000e-01 : f32
    %184 = vector.broadcast %cst_91 : f32 to vector<16x128xf32>
    %185 = arith.mulf %184, %183 : vector<16x128xf32>
    %186 = math.tanh %185 : vector<16x128xf32>
    %cst_92 = arith.constant 1.000000e+00 : f32
    %187 = vector.broadcast %cst_92 : f32 to vector<16x128xf32>
    %188 = arith.addf %186, %187 : vector<16x128xf32>
    %cst_93 = arith.constant 5.000000e-01 : f32
    %189 = vector.broadcast %cst_93 : f32 to vector<16x128xf32>
    %190 = arith.mulf %189, %188 : vector<16x128xf32>
    %191 = vector.extract_strided_slice %190 {offsets = [0, 0], sizes = [16, 64], strides = [1, 1]} : vector<16x128xf32> to vector<16x64xf32>
    %192 = vector.extract_strided_slice %190 {offsets = [0, 64], sizes = [16, 64], strides = [1, 1]} : vector<16x128xf32> to vector<16x64xf32>
    %193 = vector.extract_strided_slice %182 {offsets = [0, 128], sizes = [16, 64], strides = [1, 1]} : vector<16x256xf32> to vector<16x64xf32>
    %194 = math.tanh %193 : vector<16x64xf32>
    %195 = vector.extract_strided_slice %182 {offsets = [0, 192], sizes = [16, 64], strides = [1, 1]} : vector<16x256xf32> to vector<16x64xf32>
    %cst_94 = arith.constant 5.000000e-01 : f32
    %196 = vector.broadcast %cst_94 : f32 to vector<16x64xf32>
    %197 = arith.mulf %196, %195 : vector<16x64xf32>
    %198 = math.tanh %197 : vector<16x64xf32>
    %cst_95 = arith.constant 1.000000e+00 : f32
    %199 = vector.broadcast %cst_95 : f32 to vector<16x64xf32>
    %200 = arith.addf %198, %199 : vector<16x64xf32>
    %cst_96 = arith.constant 5.000000e-01 : f32
    %201 = vector.broadcast %cst_96 : f32 to vector<16x64xf32>
    %202 = arith.mulf %201, %200 : vector<16x64xf32>
    %203 = arith.mulf %192, %172 : vector<16x64xf32>
    %204 = arith.mulf %191, %194 : vector<16x64xf32>
    %205 = arith.addf %203, %204 : vector<16x64xf32>
    %206 = math.tanh %205 : vector<16x64xf32>
    %207 = arith.mulf %202, %206 : vector<16x64xf32>
    %c5_i32 = arith.constant 5 : i32
    %c16_i32_97 = arith.constant 16 : i32
    %208 = arith.muli %c5_i32, %c16_i32_97 : i32
    %209 = tpu.assume_multiple %208, 16 : i32
    %210 = arith.index_cast %209 : i32 to index
    %c0_98 = arith.constant 0 : index
    %211 = vector.load %arg12[%210, %c0_98] : memref<256x256xf32, #tpu.memory_space<vmem>>, vector<16x256xf32>
    %212 = arith.truncf %207 : vector<16x64xf32> to vector<16x64xbf16>
    %c0_99 = arith.constant 0 : index
    %c0_100 = arith.constant 0 : index
    %213 = vector.load %arg5[%c0_99, %c0_100] : memref<64x256xbf16, #tpu.memory_space<vmem>>, vector<64x256xbf16>
    %cst_101 = arith.constant dense<0.000000e+00> : vector<16x256xf32>
    %214 = tpu.matmul %212, %213, %cst_101 {dimension_numbers = #tpu.dot_dimension_numbers<[1], [0], [0], [1], [0, 0, 1, 1], [], []>} : vector<16x64xbf16>, vector<64x256xbf16>, vector<16x256xf32> -> vector<16x256xf32>
    %215 = arith.addf %211, %214 : vector<16x256xf32>
    %216 = vector.extract_strided_slice %215 {offsets = [0, 0], sizes = [16, 128], strides = [1, 1]} : vector<16x256xf32> to vector<16x128xf32>
    %cst_102 = arith.constant 5.000000e-01 : f32
    %217 = vector.broadcast %cst_102 : f32 to vector<16x128xf32>
    %218 = arith.mulf %217, %216 : vector<16x128xf32>
    %219 = math.tanh %218 : vector<16x128xf32>
    %cst_103 = arith.constant 1.000000e+00 : f32
    %220 = vector.broadcast %cst_103 : f32 to vector<16x128xf32>
    %221 = arith.addf %219, %220 : vector<16x128xf32>
    %cst_104 = arith.constant 5.000000e-01 : f32
    %222 = vector.broadcast %cst_104 : f32 to vector<16x128xf32>
    %223 = arith.mulf %222, %221 : vector<16x128xf32>
    %224 = vector.extract_strided_slice %223 {offsets = [0, 0], sizes = [16, 64], strides = [1, 1]} : vector<16x128xf32> to vector<16x64xf32>
    %225 = vector.extract_strided_slice %223 {offsets = [0, 64], sizes = [16, 64], strides = [1, 1]} : vector<16x128xf32> to vector<16x64xf32>
    %226 = vector.extract_strided_slice %215 {offsets = [0, 128], sizes = [16, 64], strides = [1, 1]} : vector<16x256xf32> to vector<16x64xf32>
    %227 = math.tanh %226 : vector<16x64xf32>
    %228 = vector.extract_strided_slice %215 {offsets = [0, 192], sizes = [16, 64], strides = [1, 1]} : vector<16x256xf32> to vector<16x64xf32>
    %cst_105 = arith.constant 5.000000e-01 : f32
    %229 = vector.broadcast %cst_105 : f32 to vector<16x64xf32>
    %230 = arith.mulf %229, %228 : vector<16x64xf32>
    %231 = math.tanh %230 : vector<16x64xf32>
    %cst_106 = arith.constant 1.000000e+00 : f32
    %232 = vector.broadcast %cst_106 : f32 to vector<16x64xf32>
    %233 = arith.addf %231, %232 : vector<16x64xf32>
    %cst_107 = arith.constant 5.000000e-01 : f32
    %234 = vector.broadcast %cst_107 : f32 to vector<16x64xf32>
    %235 = arith.mulf %234, %233 : vector<16x64xf32>
    %236 = arith.mulf %225, %205 : vector<16x64xf32>
    %237 = arith.mulf %224, %227 : vector<16x64xf32>
    %238 = arith.addf %236, %237 : vector<16x64xf32>
    %239 = math.tanh %238 : vector<16x64xf32>
    %240 = arith.mulf %235, %239 : vector<16x64xf32>
    %c6_i32 = arith.constant 6 : i32
    %c16_i32_108 = arith.constant 16 : i32
    %241 = arith.muli %c6_i32, %c16_i32_108 : i32
    %242 = tpu.assume_multiple %241, 16 : i32
    %243 = arith.index_cast %242 : i32 to index
    %c0_109 = arith.constant 0 : index
    %244 = vector.load %arg12[%243, %c0_109] : memref<256x256xf32, #tpu.memory_space<vmem>>, vector<16x256xf32>
    %245 = arith.truncf %240 : vector<16x64xf32> to vector<16x64xbf16>
    %c0_110 = arith.constant 0 : index
    %c0_111 = arith.constant 0 : index
    %246 = vector.load %arg5[%c0_110, %c0_111] : memref<64x256xbf16, #tpu.memory_space<vmem>>, vector<64x256xbf16>
    %cst_112 = arith.constant dense<0.000000e+00> : vector<16x256xf32>
    %247 = tpu.matmul %245, %246, %cst_112 {dimension_numbers = #tpu.dot_dimension_numbers<[1], [0], [0], [1], [0, 0, 1, 1], [], []>} : vector<16x64xbf16>, vector<64x256xbf16>, vector<16x256xf32> -> vector<16x256xf32>
    %248 = arith.addf %244, %247 : vector<16x256xf32>
    %249 = vector.extract_strided_slice %248 {offsets = [0, 0], sizes = [16, 128], strides = [1, 1]} : vector<16x256xf32> to vector<16x128xf32>
    %cst_113 = arith.constant 5.000000e-01 : f32
    %250 = vector.broadcast %cst_113 : f32 to vector<16x128xf32>
    %251 = arith.mulf %250, %249 : vector<16x128xf32>
    %252 = math.tanh %251 : vector<16x128xf32>
    %cst_114 = arith.constant 1.000000e+00 : f32
    %253 = vector.broadcast %cst_114 : f32 to vector<16x128xf32>
    %254 = arith.addf %252, %253 : vector<16x128xf32>
    %cst_115 = arith.constant 5.000000e-01 : f32
    %255 = vector.broadcast %cst_115 : f32 to vector<16x128xf32>
    %256 = arith.mulf %255, %254 : vector<16x128xf32>
    %257 = vector.extract_strided_slice %256 {offsets = [0, 0], sizes = [16, 64], strides = [1, 1]} : vector<16x128xf32> to vector<16x64xf32>
    %258 = vector.extract_strided_slice %256 {offsets = [0, 64], sizes = [16, 64], strides = [1, 1]} : vector<16x128xf32> to vector<16x64xf32>
    %259 = vector.extract_strided_slice %248 {offsets = [0, 128], sizes = [16, 64], strides = [1, 1]} : vector<16x256xf32> to vector<16x64xf32>
    %260 = math.tanh %259 : vector<16x64xf32>
    %261 = vector.extract_strided_slice %248 {offsets = [0, 192], sizes = [16, 64], strides = [1, 1]} : vector<16x256xf32> to vector<16x64xf32>
    %cst_116 = arith.constant 5.000000e-01 : f32
    %262 = vector.broadcast %cst_116 : f32 to vector<16x64xf32>
    %263 = arith.mulf %262, %261 : vector<16x64xf32>
    %264 = math.tanh %263 : vector<16x64xf32>
    %cst_117 = arith.constant 1.000000e+00 : f32
    %265 = vector.broadcast %cst_117 : f32 to vector<16x64xf32>
    %266 = arith.addf %264, %265 : vector<16x64xf32>
    %cst_118 = arith.constant 5.000000e-01 : f32
    %267 = vector.broadcast %cst_118 : f32 to vector<16x64xf32>
    %268 = arith.mulf %267, %266 : vector<16x64xf32>
    %269 = arith.mulf %258, %238 : vector<16x64xf32>
    %270 = arith.mulf %257, %260 : vector<16x64xf32>
    %271 = arith.addf %269, %270 : vector<16x64xf32>
    %272 = math.tanh %271 : vector<16x64xf32>
    %273 = arith.mulf %268, %272 : vector<16x64xf32>
    %c7_i32 = arith.constant 7 : i32
    %c16_i32_119 = arith.constant 16 : i32
    %274 = arith.muli %c7_i32, %c16_i32_119 : i32
    %275 = tpu.assume_multiple %274, 16 : i32
    %276 = arith.index_cast %275 : i32 to index
    %c0_120 = arith.constant 0 : index
    %277 = vector.load %arg12[%276, %c0_120] : memref<256x256xf32, #tpu.memory_space<vmem>>, vector<16x256xf32>
    %278 = arith.truncf %273 : vector<16x64xf32> to vector<16x64xbf16>
    %c0_121 = arith.constant 0 : index
    %c0_122 = arith.constant 0 : index
    %279 = vector.load %arg5[%c0_121, %c0_122] : memref<64x256xbf16, #tpu.memory_space<vmem>>, vector<64x256xbf16>
    %cst_123 = arith.constant dense<0.000000e+00> : vector<16x256xf32>
    %280 = tpu.matmul %278, %279, %cst_123 {dimension_numbers = #tpu.dot_dimension_numbers<[1], [0], [0], [1], [0, 0, 1, 1], [], []>} : vector<16x64xbf16>, vector<64x256xbf16>, vector<16x256xf32> -> vector<16x256xf32>
    %281 = arith.addf %277, %280 : vector<16x256xf32>
    %282 = vector.extract_strided_slice %281 {offsets = [0, 0], sizes = [16, 128], strides = [1, 1]} : vector<16x256xf32> to vector<16x128xf32>
    %cst_124 = arith.constant 5.000000e-01 : f32
    %283 = vector.broadcast %cst_124 : f32 to vector<16x128xf32>
    %284 = arith.mulf %283, %282 : vector<16x128xf32>
    %285 = math.tanh %284 : vector<16x128xf32>
    %cst_125 = arith.constant 1.000000e+00 : f32
    %286 = vector.broadcast %cst_125 : f32 to vector<16x128xf32>
    %287 = arith.addf %285, %286 : vector<16x128xf32>
    %cst_126 = arith.constant 5.000000e-01 : f32
    %288 = vector.broadcast %cst_126 : f32 to vector<16x128xf32>
    %289 = arith.mulf %288, %287 : vector<16x128xf32>
    %290 = vector.extract_strided_slice %289 {offsets = [0, 0], sizes = [16, 64], strides = [1, 1]} : vector<16x128xf32> to vector<16x64xf32>
    %291 = vector.extract_strided_slice %289 {offsets = [0, 64], sizes = [16, 64], strides = [1, 1]} : vector<16x128xf32> to vector<16x64xf32>
    %292 = vector.extract_strided_slice %281 {offsets = [0, 128], sizes = [16, 64], strides = [1, 1]} : vector<16x256xf32> to vector<16x64xf32>
    %293 = math.tanh %292 : vector<16x64xf32>
    %294 = vector.extract_strided_slice %281 {offsets = [0, 192], sizes = [16, 64], strides = [1, 1]} : vector<16x256xf32> to vector<16x64xf32>
    %cst_127 = arith.constant 5.000000e-01 : f32
    %295 = vector.broadcast %cst_127 : f32 to vector<16x64xf32>
    %296 = arith.mulf %295, %294 : vector<16x64xf32>
    %297 = math.tanh %296 : vector<16x64xf32>
    %cst_128 = arith.constant 1.000000e+00 : f32
    %298 = vector.broadcast %cst_128 : f32 to vector<16x64xf32>
    %299 = arith.addf %297, %298 : vector<16x64xf32>
    %cst_129 = arith.constant 5.000000e-01 : f32
    %300 = vector.broadcast %cst_129 : f32 to vector<16x64xf32>
    %301 = arith.mulf %300, %299 : vector<16x64xf32>
    %302 = arith.mulf %291, %271 : vector<16x64xf32>
    %303 = arith.mulf %290, %293 : vector<16x64xf32>
    %304 = arith.addf %302, %303 : vector<16x64xf32>
    %305 = math.tanh %304 : vector<16x64xf32>
    %306 = arith.mulf %301, %305 : vector<16x64xf32>
    %c8_i32 = arith.constant 8 : i32
    %c16_i32_130 = arith.constant 16 : i32
    %307 = arith.muli %c8_i32, %c16_i32_130 : i32
    %308 = tpu.assume_multiple %307, 16 : i32
    %309 = arith.index_cast %308 : i32 to index
    %c0_131 = arith.constant 0 : index
    %310 = vector.load %arg12[%309, %c0_131] : memref<256x256xf32, #tpu.memory_space<vmem>>, vector<16x256xf32>
    %311 = arith.truncf %306 : vector<16x64xf32> to vector<16x64xbf16>
    %c0_132 = arith.constant 0 : index
    %c0_133 = arith.constant 0 : index
    %312 = vector.load %arg5[%c0_132, %c0_133] : memref<64x256xbf16, #tpu.memory_space<vmem>>, vector<64x256xbf16>
    %cst_134 = arith.constant dense<0.000000e+00> : vector<16x256xf32>
    %313 = tpu.matmul %311, %312, %cst_134 {dimension_numbers = #tpu.dot_dimension_numbers<[1], [0], [0], [1], [0, 0, 1, 1], [], []>} : vector<16x64xbf16>, vector<64x256xbf16>, vector<16x256xf32> -> vector<16x256xf32>
    %314 = arith.addf %310, %313 : vector<16x256xf32>
    %315 = vector.extract_strided_slice %314 {offsets = [0, 0], sizes = [16, 128], strides = [1, 1]} : vector<16x256xf32> to vector<16x128xf32>
    %cst_135 = arith.constant 5.000000e-01 : f32
    %316 = vector.broadcast %cst_135 : f32 to vector<16x128xf32>
    %317 = arith.mulf %316, %315 : vector<16x128xf32>
    %318 = math.tanh %317 : vector<16x128xf32>
    %cst_136 = arith.constant 1.000000e+00 : f32
    %319 = vector.broadcast %cst_136 : f32 to vector<16x128xf32>
    %320 = arith.addf %318, %319 : vector<16x128xf32>
    %cst_137 = arith.constant 5.000000e-01 : f32
    %321 = vector.broadcast %cst_137 : f32 to vector<16x128xf32>
    %322 = arith.mulf %321, %320 : vector<16x128xf32>
    %323 = vector.extract_strided_slice %322 {offsets = [0, 0], sizes = [16, 64], strides = [1, 1]} : vector<16x128xf32> to vector<16x64xf32>
    %324 = vector.extract_strided_slice %322 {offsets = [0, 64], sizes = [16, 64], strides = [1, 1]} : vector<16x128xf32> to vector<16x64xf32>
    %325 = vector.extract_strided_slice %314 {offsets = [0, 128], sizes = [16, 64], strides = [1, 1]} : vector<16x256xf32> to vector<16x64xf32>
    %326 = math.tanh %325 : vector<16x64xf32>
    %327 = vector.extract_strided_slice %314 {offsets = [0, 192], sizes = [16, 64], strides = [1, 1]} : vector<16x256xf32> to vector<16x64xf32>
    %cst_138 = arith.constant 5.000000e-01 : f32
    %328 = vector.broadcast %cst_138 : f32 to vector<16x64xf32>
    %329 = arith.mulf %328, %327 : vector<16x64xf32>
    %330 = math.tanh %329 : vector<16x64xf32>
    %cst_139 = arith.constant 1.000000e+00 : f32
    %331 = vector.broadcast %cst_139 : f32 to vector<16x64xf32>
    %332 = arith.addf %330, %331 : vector<16x64xf32>
    %cst_140 = arith.constant 5.000000e-01 : f32
    %333 = vector.broadcast %cst_140 : f32 to vector<16x64xf32>
    %334 = arith.mulf %333, %332 : vector<16x64xf32>
    %335 = arith.mulf %324, %304 : vector<16x64xf32>
    %336 = arith.mulf %323, %326 : vector<16x64xf32>
    %337 = arith.addf %335, %336 : vector<16x64xf32>
    %338 = math.tanh %337 : vector<16x64xf32>
    %339 = arith.mulf %334, %338 : vector<16x64xf32>
    %c9_i32 = arith.constant 9 : i32
    %c16_i32_141 = arith.constant 16 : i32
    %340 = arith.muli %c9_i32, %c16_i32_141 : i32
    %341 = tpu.assume_multiple %340, 16 : i32
    %342 = arith.index_cast %341 : i32 to index
    %c0_142 = arith.constant 0 : index
    %343 = vector.load %arg12[%342, %c0_142] : memref<256x256xf32, #tpu.memory_space<vmem>>, vector<16x256xf32>
    %344 = arith.truncf %339 : vector<16x64xf32> to vector<16x64xbf16>
    %c0_143 = arith.constant 0 : index
    %c0_144 = arith.constant 0 : index
    %345 = vector.load %arg5[%c0_143, %c0_144] : memref<64x256xbf16, #tpu.memory_space<vmem>>, vector<64x256xbf16>
    %cst_145 = arith.constant dense<0.000000e+00> : vector<16x256xf32>
    %346 = tpu.matmul %344, %345, %cst_145 {dimension_numbers = #tpu.dot_dimension_numbers<[1], [0], [0], [1], [0, 0, 1, 1], [], []>} : vector<16x64xbf16>, vector<64x256xbf16>, vector<16x256xf32> -> vector<16x256xf32>
    %347 = arith.addf %343, %346 : vector<16x256xf32>
    %348 = vector.extract_strided_slice %347 {offsets = [0, 0], sizes = [16, 128], strides = [1, 1]} : vector<16x256xf32> to vector<16x128xf32>
    %cst_146 = arith.constant 5.000000e-01 : f32
    %349 = vector.broadcast %cst_146 : f32 to vector<16x128xf32>
    %350 = arith.mulf %349, %348 : vector<16x128xf32>
    %351 = math.tanh %350 : vector<16x128xf32>
    %cst_147 = arith.constant 1.000000e+00 : f32
    %352 = vector.broadcast %cst_147 : f32 to vector<16x128xf32>
    %353 = arith.addf %351, %352 : vector<16x128xf32>
    %cst_148 = arith.constant 5.000000e-01 : f32
    %354 = vector.broadcast %cst_148 : f32 to vector<16x128xf32>
    %355 = arith.mulf %354, %353 : vector<16x128xf32>
    %356 = vector.extract_strided_slice %355 {offsets = [0, 0], sizes = [16, 64], strides = [1, 1]} : vector<16x128xf32> to vector<16x64xf32>
    %357 = vector.extract_strided_slice %355 {offsets = [0, 64], sizes = [16, 64], strides = [1, 1]} : vector<16x128xf32> to vector<16x64xf32>
    %358 = vector.extract_strided_slice %347 {offsets = [0, 128], sizes = [16, 64], strides = [1, 1]} : vector<16x256xf32> to vector<16x64xf32>
    %359 = math.tanh %358 : vector<16x64xf32>
    %360 = vector.extract_strided_slice %347 {offsets = [0, 192], sizes = [16, 64], strides = [1, 1]} : vector<16x256xf32> to vector<16x64xf32>
    %cst_149 = arith.constant 5.000000e-01 : f32
    %361 = vector.broadcast %cst_149 : f32 to vector<16x64xf32>
    %362 = arith.mulf %361, %360 : vector<16x64xf32>
    %363 = math.tanh %362 : vector<16x64xf32>
    %cst_150 = arith.constant 1.000000e+00 : f32
    %364 = vector.broadcast %cst_150 : f32 to vector<16x64xf32>
    %365 = arith.addf %363, %364 : vector<16x64xf32>
    %cst_151 = arith.constant 5.000000e-01 : f32
    %366 = vector.broadcast %cst_151 : f32 to vector<16x64xf32>
    %367 = arith.mulf %366, %365 : vector<16x64xf32>
    %368 = arith.mulf %357, %337 : vector<16x64xf32>
    %369 = arith.mulf %356, %359 : vector<16x64xf32>
    %370 = arith.addf %368, %369 : vector<16x64xf32>
    %371 = math.tanh %370 : vector<16x64xf32>
    %372 = arith.mulf %367, %371 : vector<16x64xf32>
    %c10_i32 = arith.constant 10 : i32
    %c16_i32_152 = arith.constant 16 : i32
    %373 = arith.muli %c10_i32, %c16_i32_152 : i32
    %374 = tpu.assume_multiple %373, 16 : i32
    %375 = arith.index_cast %374 : i32 to index
    %c0_153 = arith.constant 0 : index
    %376 = vector.load %arg12[%375, %c0_153] : memref<256x256xf32, #tpu.memory_space<vmem>>, vector<16x256xf32>
    %377 = arith.truncf %372 : vector<16x64xf32> to vector<16x64xbf16>
    %c0_154 = arith.constant 0 : index
    %c0_155 = arith.constant 0 : index
    %378 = vector.load %arg5[%c0_154, %c0_155] : memref<64x256xbf16, #tpu.memory_space<vmem>>, vector<64x256xbf16>
    %cst_156 = arith.constant dense<0.000000e+00> : vector<16x256xf32>
    %379 = tpu.matmul %377, %378, %cst_156 {dimension_numbers = #tpu.dot_dimension_numbers<[1], [0], [0], [1], [0, 0, 1, 1], [], []>} : vector<16x64xbf16>, vector<64x256xbf16>, vector<16x256xf32> -> vector<16x256xf32>
    %380 = arith.addf %376, %379 : vector<16x256xf32>
    %381 = vector.extract_strided_slice %380 {offsets = [0, 0], sizes = [16, 128], strides = [1, 1]} : vector<16x256xf32> to vector<16x128xf32>
    %cst_157 = arith.constant 5.000000e-01 : f32
    %382 = vector.broadcast %cst_157 : f32 to vector<16x128xf32>
    %383 = arith.mulf %382, %381 : vector<16x128xf32>
    %384 = math.tanh %383 : vector<16x128xf32>
    %cst_158 = arith.constant 1.000000e+00 : f32
    %385 = vector.broadcast %cst_158 : f32 to vector<16x128xf32>
    %386 = arith.addf %384, %385 : vector<16x128xf32>
    %cst_159 = arith.constant 5.000000e-01 : f32
    %387 = vector.broadcast %cst_159 : f32 to vector<16x128xf32>
    %388 = arith.mulf %387, %386 : vector<16x128xf32>
    %389 = vector.extract_strided_slice %388 {offsets = [0, 0], sizes = [16, 64], strides = [1, 1]} : vector<16x128xf32> to vector<16x64xf32>
    %390 = vector.extract_strided_slice %388 {offsets = [0, 64], sizes = [16, 64], strides = [1, 1]} : vector<16x128xf32> to vector<16x64xf32>
    %391 = vector.extract_strided_slice %380 {offsets = [0, 128], sizes = [16, 64], strides = [1, 1]} : vector<16x256xf32> to vector<16x64xf32>
    %392 = math.tanh %391 : vector<16x64xf32>
    %393 = vector.extract_strided_slice %380 {offsets = [0, 192], sizes = [16, 64], strides = [1, 1]} : vector<16x256xf32> to vector<16x64xf32>
    %cst_160 = arith.constant 5.000000e-01 : f32
    %394 = vector.broadcast %cst_160 : f32 to vector<16x64xf32>
    %395 = arith.mulf %394, %393 : vector<16x64xf32>
    %396 = math.tanh %395 : vector<16x64xf32>
    %cst_161 = arith.constant 1.000000e+00 : f32
    %397 = vector.broadcast %cst_161 : f32 to vector<16x64xf32>
    %398 = arith.addf %396, %397 : vector<16x64xf32>
    %cst_162 = arith.constant 5.000000e-01 : f32
    %399 = vector.broadcast %cst_162 : f32 to vector<16x64xf32>
    %400 = arith.mulf %399, %398 : vector<16x64xf32>
    %401 = arith.mulf %390, %370 : vector<16x64xf32>
    %402 = arith.mulf %389, %392 : vector<16x64xf32>
    %403 = arith.addf %401, %402 : vector<16x64xf32>
    %404 = math.tanh %403 : vector<16x64xf32>
    %405 = arith.mulf %400, %404 : vector<16x64xf32>
    %c11_i32 = arith.constant 11 : i32
    %c16_i32_163 = arith.constant 16 : i32
    %406 = arith.muli %c11_i32, %c16_i32_163 : i32
    %407 = tpu.assume_multiple %406, 16 : i32
    %408 = arith.index_cast %407 : i32 to index
    %c0_164 = arith.constant 0 : index
    %409 = vector.load %arg12[%408, %c0_164] : memref<256x256xf32, #tpu.memory_space<vmem>>, vector<16x256xf32>
    %410 = arith.truncf %405 : vector<16x64xf32> to vector<16x64xbf16>
    %c0_165 = arith.constant 0 : index
    %c0_166 = arith.constant 0 : index
    %411 = vector.load %arg5[%c0_165, %c0_166] : memref<64x256xbf16, #tpu.memory_space<vmem>>, vector<64x256xbf16>
    %cst_167 = arith.constant dense<0.000000e+00> : vector<16x256xf32>
    %412 = tpu.matmul %410, %411, %cst_167 {dimension_numbers = #tpu.dot_dimension_numbers<[1], [0], [0], [1], [0, 0, 1, 1], [], []>} : vector<16x64xbf16>, vector<64x256xbf16>, vector<16x256xf32> -> vector<16x256xf32>
    %413 = arith.addf %409, %412 : vector<16x256xf32>
    %414 = vector.extract_strided_slice %413 {offsets = [0, 0], sizes = [16, 128], strides = [1, 1]} : vector<16x256xf32> to vector<16x128xf32>
    %cst_168 = arith.constant 5.000000e-01 : f32
    %415 = vector.broadcast %cst_168 : f32 to vector<16x128xf32>
    %416 = arith.mulf %415, %414 : vector<16x128xf32>
    %417 = math.tanh %416 : vector<16x128xf32>
    %cst_169 = arith.constant 1.000000e+00 : f32
    %418 = vector.broadcast %cst_169 : f32 to vector<16x128xf32>
    %419 = arith.addf %417, %418 : vector<16x128xf32>
    %cst_170 = arith.constant 5.000000e-01 : f32
    %420 = vector.broadcast %cst_170 : f32 to vector<16x128xf32>
    %421 = arith.mulf %420, %419 : vector<16x128xf32>
    %422 = vector.extract_strided_slice %421 {offsets = [0, 0], sizes = [16, 64], strides = [1, 1]} : vector<16x128xf32> to vector<16x64xf32>
    %423 = vector.extract_strided_slice %421 {offsets = [0, 64], sizes = [16, 64], strides = [1, 1]} : vector<16x128xf32> to vector<16x64xf32>
    %424 = vector.extract_strided_slice %413 {offsets = [0, 128], sizes = [16, 64], strides = [1, 1]} : vector<16x256xf32> to vector<16x64xf32>
    %425 = math.tanh %424 : vector<16x64xf32>
    %426 = vector.extract_strided_slice %413 {offsets = [0, 192], sizes = [16, 64], strides = [1, 1]} : vector<16x256xf32> to vector<16x64xf32>
    %cst_171 = arith.constant 5.000000e-01 : f32
    %427 = vector.broadcast %cst_171 : f32 to vector<16x64xf32>
    %428 = arith.mulf %427, %426 : vector<16x64xf32>
    %429 = math.tanh %428 : vector<16x64xf32>
    %cst_172 = arith.constant 1.000000e+00 : f32
    %430 = vector.broadcast %cst_172 : f32 to vector<16x64xf32>
    %431 = arith.addf %429, %430 : vector<16x64xf32>
    %cst_173 = arith.constant 5.000000e-01 : f32
    %432 = vector.broadcast %cst_173 : f32 to vector<16x64xf32>
    %433 = arith.mulf %432, %431 : vector<16x64xf32>
    %434 = arith.mulf %423, %403 : vector<16x64xf32>
    %435 = arith.mulf %422, %425 : vector<16x64xf32>
    %436 = arith.addf %434, %435 : vector<16x64xf32>
    %437 = math.tanh %436 : vector<16x64xf32>
    %438 = arith.mulf %433, %437 : vector<16x64xf32>
    %c12_i32 = arith.constant 12 : i32
    %c16_i32_174 = arith.constant 16 : i32
    %439 = arith.muli %c12_i32, %c16_i32_174 : i32
    %440 = tpu.assume_multiple %439, 16 : i32
    %441 = arith.index_cast %440 : i32 to index
    %c0_175 = arith.constant 0 : index
    %442 = vector.load %arg12[%441, %c0_175] : memref<256x256xf32, #tpu.memory_space<vmem>>, vector<16x256xf32>
    %443 = arith.truncf %438 : vector<16x64xf32> to vector<16x64xbf16>
    %c0_176 = arith.constant 0 : index
    %c0_177 = arith.constant 0 : index
    %444 = vector.load %arg5[%c0_176, %c0_177] : memref<64x256xbf16, #tpu.memory_space<vmem>>, vector<64x256xbf16>
    %cst_178 = arith.constant dense<0.000000e+00> : vector<16x256xf32>
    %445 = tpu.matmul %443, %444, %cst_178 {dimension_numbers = #tpu.dot_dimension_numbers<[1], [0], [0], [1], [0, 0, 1, 1], [], []>} : vector<16x64xbf16>, vector<64x256xbf16>, vector<16x256xf32> -> vector<16x256xf32>
    %446 = arith.addf %442, %445 : vector<16x256xf32>
    %447 = vector.extract_strided_slice %446 {offsets = [0, 0], sizes = [16, 128], strides = [1, 1]} : vector<16x256xf32> to vector<16x128xf32>
    %cst_179 = arith.constant 5.000000e-01 : f32
    %448 = vector.broadcast %cst_179 : f32 to vector<16x128xf32>
    %449 = arith.mulf %448, %447 : vector<16x128xf32>
    %450 = math.tanh %449 : vector<16x128xf32>
    %cst_180 = arith.constant 1.000000e+00 : f32
    %451 = vector.broadcast %cst_180 : f32 to vector<16x128xf32>
    %452 = arith.addf %450, %451 : vector<16x128xf32>
    %cst_181 = arith.constant 5.000000e-01 : f32
    %453 = vector.broadcast %cst_181 : f32 to vector<16x128xf32>
    %454 = arith.mulf %453, %452 : vector<16x128xf32>
    %455 = vector.extract_strided_slice %454 {offsets = [0, 0], sizes = [16, 64], strides = [1, 1]} : vector<16x128xf32> to vector<16x64xf32>
    %456 = vector.extract_strided_slice %454 {offsets = [0, 64], sizes = [16, 64], strides = [1, 1]} : vector<16x128xf32> to vector<16x64xf32>
    %457 = vector.extract_strided_slice %446 {offsets = [0, 128], sizes = [16, 64], strides = [1, 1]} : vector<16x256xf32> to vector<16x64xf32>
    %458 = math.tanh %457 : vector<16x64xf32>
    %459 = vector.extract_strided_slice %446 {offsets = [0, 192], sizes = [16, 64], strides = [1, 1]} : vector<16x256xf32> to vector<16x64xf32>
    %cst_182 = arith.constant 5.000000e-01 : f32
    %460 = vector.broadcast %cst_182 : f32 to vector<16x64xf32>
    %461 = arith.mulf %460, %459 : vector<16x64xf32>
    %462 = math.tanh %461 : vector<16x64xf32>
    %cst_183 = arith.constant 1.000000e+00 : f32
    %463 = vector.broadcast %cst_183 : f32 to vector<16x64xf32>
    %464 = arith.addf %462, %463 : vector<16x64xf32>
    %cst_184 = arith.constant 5.000000e-01 : f32
    %465 = vector.broadcast %cst_184 : f32 to vector<16x64xf32>
    %466 = arith.mulf %465, %464 : vector<16x64xf32>
    %467 = arith.mulf %456, %436 : vector<16x64xf32>
    %468 = arith.mulf %455, %458 : vector<16x64xf32>
    %469 = arith.addf %467, %468 : vector<16x64xf32>
    %470 = math.tanh %469 : vector<16x64xf32>
    %471 = arith.mulf %466, %470 : vector<16x64xf32>
    %c13_i32 = arith.constant 13 : i32
    %c16_i32_185 = arith.constant 16 : i32
    %472 = arith.muli %c13_i32, %c16_i32_185 : i32
    %473 = tpu.assume_multiple %472, 16 : i32
    %474 = arith.index_cast %473 : i32 to index
    %c0_186 = arith.constant 0 : index
    %475 = vector.load %arg12[%474, %c0_186] : memref<256x256xf32, #tpu.memory_space<vmem>>, vector<16x256xf32>
    %476 = arith.truncf %471 : vector<16x64xf32> to vector<16x64xbf16>
    %c0_187 = arith.constant 0 : index
    %c0_188 = arith.constant 0 : index
    %477 = vector.load %arg5[%c0_187, %c0_188] : memref<64x256xbf16, #tpu.memory_space<vmem>>, vector<64x256xbf16>
    %cst_189 = arith.constant dense<0.000000e+00> : vector<16x256xf32>
    %478 = tpu.matmul %476, %477, %cst_189 {dimension_numbers = #tpu.dot_dimension_numbers<[1], [0], [0], [1], [0, 0, 1, 1], [], []>} : vector<16x64xbf16>, vector<64x256xbf16>, vector<16x256xf32> -> vector<16x256xf32>
    %479 = arith.addf %475, %478 : vector<16x256xf32>
    %480 = vector.extract_strided_slice %479 {offsets = [0, 0], sizes = [16, 128], strides = [1, 1]} : vector<16x256xf32> to vector<16x128xf32>
    %cst_190 = arith.constant 5.000000e-01 : f32
    %481 = vector.broadcast %cst_190 : f32 to vector<16x128xf32>
    %482 = arith.mulf %481, %480 : vector<16x128xf32>
    %483 = math.tanh %482 : vector<16x128xf32>
    %cst_191 = arith.constant 1.000000e+00 : f32
    %484 = vector.broadcast %cst_191 : f32 to vector<16x128xf32>
    %485 = arith.addf %483, %484 : vector<16x128xf32>
    %cst_192 = arith.constant 5.000000e-01 : f32
    %486 = vector.broadcast %cst_192 : f32 to vector<16x128xf32>
    %487 = arith.mulf %486, %485 : vector<16x128xf32>
    %488 = vector.extract_strided_slice %487 {offsets = [0, 0], sizes = [16, 64], strides = [1, 1]} : vector<16x128xf32> to vector<16x64xf32>
    %489 = vector.extract_strided_slice %487 {offsets = [0, 64], sizes = [16, 64], strides = [1, 1]} : vector<16x128xf32> to vector<16x64xf32>
    %490 = vector.extract_strided_slice %479 {offsets = [0, 128], sizes = [16, 64], strides = [1, 1]} : vector<16x256xf32> to vector<16x64xf32>
    %491 = math.tanh %490 : vector<16x64xf32>
    %492 = vector.extract_strided_slice %479 {offsets = [0, 192], sizes = [16, 64], strides = [1, 1]} : vector<16x256xf32> to vector<16x64xf32>
    %cst_193 = arith.constant 5.000000e-01 : f32
    %493 = vector.broadcast %cst_193 : f32 to vector<16x64xf32>
    %494 = arith.mulf %493, %492 : vector<16x64xf32>
    %495 = math.tanh %494 : vector<16x64xf32>
    %cst_194 = arith.constant 1.000000e+00 : f32
    %496 = vector.broadcast %cst_194 : f32 to vector<16x64xf32>
    %497 = arith.addf %495, %496 : vector<16x64xf32>
    %cst_195 = arith.constant 5.000000e-01 : f32
    %498 = vector.broadcast %cst_195 : f32 to vector<16x64xf32>
    %499 = arith.mulf %498, %497 : vector<16x64xf32>
    %500 = arith.mulf %489, %469 : vector<16x64xf32>
    %501 = arith.mulf %488, %491 : vector<16x64xf32>
    %502 = arith.addf %500, %501 : vector<16x64xf32>
    %503 = math.tanh %502 : vector<16x64xf32>
    %504 = arith.mulf %499, %503 : vector<16x64xf32>
    %c14_i32 = arith.constant 14 : i32
    %c16_i32_196 = arith.constant 16 : i32
    %505 = arith.muli %c14_i32, %c16_i32_196 : i32
    %506 = tpu.assume_multiple %505, 16 : i32
    %507 = arith.index_cast %506 : i32 to index
    %c0_197 = arith.constant 0 : index
    %508 = vector.load %arg12[%507, %c0_197] : memref<256x256xf32, #tpu.memory_space<vmem>>, vector<16x256xf32>
    %509 = arith.truncf %504 : vector<16x64xf32> to vector<16x64xbf16>
    %c0_198 = arith.constant 0 : index
    %c0_199 = arith.constant 0 : index
    %510 = vector.load %arg5[%c0_198, %c0_199] : memref<64x256xbf16, #tpu.memory_space<vmem>>, vector<64x256xbf16>
    %cst_200 = arith.constant dense<0.000000e+00> : vector<16x256xf32>
    %511 = tpu.matmul %509, %510, %cst_200 {dimension_numbers = #tpu.dot_dimension_numbers<[1], [0], [0], [1], [0, 0, 1, 1], [], []>} : vector<16x64xbf16>, vector<64x256xbf16>, vector<16x256xf32> -> vector<16x256xf32>
    %512 = arith.addf %508, %511 : vector<16x256xf32>
    %513 = vector.extract_strided_slice %512 {offsets = [0, 0], sizes = [16, 128], strides = [1, 1]} : vector<16x256xf32> to vector<16x128xf32>
    %cst_201 = arith.constant 5.000000e-01 : f32
    %514 = vector.broadcast %cst_201 : f32 to vector<16x128xf32>
    %515 = arith.mulf %514, %513 : vector<16x128xf32>
    %516 = math.tanh %515 : vector<16x128xf32>
    %cst_202 = arith.constant 1.000000e+00 : f32
    %517 = vector.broadcast %cst_202 : f32 to vector<16x128xf32>
    %518 = arith.addf %516, %517 : vector<16x128xf32>
    %cst_203 = arith.constant 5.000000e-01 : f32
    %519 = vector.broadcast %cst_203 : f32 to vector<16x128xf32>
    %520 = arith.mulf %519, %518 : vector<16x128xf32>
    %521 = vector.extract_strided_slice %520 {offsets = [0, 0], sizes = [16, 64], strides = [1, 1]} : vector<16x128xf32> to vector<16x64xf32>
    %522 = vector.extract_strided_slice %520 {offsets = [0, 64], sizes = [16, 64], strides = [1, 1]} : vector<16x128xf32> to vector<16x64xf32>
    %523 = vector.extract_strided_slice %512 {offsets = [0, 128], sizes = [16, 64], strides = [1, 1]} : vector<16x256xf32> to vector<16x64xf32>
    %524 = math.tanh %523 : vector<16x64xf32>
    %525 = vector.extract_strided_slice %512 {offsets = [0, 192], sizes = [16, 64], strides = [1, 1]} : vector<16x256xf32> to vector<16x64xf32>
    %cst_204 = arith.constant 5.000000e-01 : f32
    %526 = vector.broadcast %cst_204 : f32 to vector<16x64xf32>
    %527 = arith.mulf %526, %525 : vector<16x64xf32>
    %528 = math.tanh %527 : vector<16x64xf32>
    %cst_205 = arith.constant 1.000000e+00 : f32
    %529 = vector.broadcast %cst_205 : f32 to vector<16x64xf32>
    %530 = arith.addf %528, %529 : vector<16x64xf32>
    %cst_206 = arith.constant 5.000000e-01 : f32
    %531 = vector.broadcast %cst_206 : f32 to vector<16x64xf32>
    %532 = arith.mulf %531, %530 : vector<16x64xf32>
    %533 = arith.mulf %522, %502 : vector<16x64xf32>
    %534 = arith.mulf %521, %524 : vector<16x64xf32>
    %535 = arith.addf %533, %534 : vector<16x64xf32>
    %536 = math.tanh %535 : vector<16x64xf32>
    %537 = arith.mulf %532, %536 : vector<16x64xf32>
    %c15_i32 = arith.constant 15 : i32
    %c16_i32_207 = arith.constant 16 : i32
    %538 = arith.muli %c15_i32, %c16_i32_207 : i32
    %539 = tpu.assume_multiple %538, 16 : i32
    %540 = arith.index_cast %539 : i32 to index
    %c0_208 = arith.constant 0 : index
    %541 = vector.load %arg12[%540, %c0_208] : memref<256x256xf32, #tpu.memory_space<vmem>>, vector<16x256xf32>
    %542 = arith.truncf %537 : vector<16x64xf32> to vector<16x64xbf16>
    %c0_209 = arith.constant 0 : index
    %c0_210 = arith.constant 0 : index
    %543 = vector.load %arg5[%c0_209, %c0_210] : memref<64x256xbf16, #tpu.memory_space<vmem>>, vector<64x256xbf16>
    %cst_211 = arith.constant dense<0.000000e+00> : vector<16x256xf32>
    %544 = tpu.matmul %542, %543, %cst_211 {dimension_numbers = #tpu.dot_dimension_numbers<[1], [0], [0], [1], [0, 0, 1, 1], [], []>} : vector<16x64xbf16>, vector<64x256xbf16>, vector<16x256xf32> -> vector<16x256xf32>
    %545 = arith.addf %541, %544 : vector<16x256xf32>
    %546 = vector.extract_strided_slice %545 {offsets = [0, 0], sizes = [16, 128], strides = [1, 1]} : vector<16x256xf32> to vector<16x128xf32>
    %cst_212 = arith.constant 5.000000e-01 : f32
    %547 = vector.broadcast %cst_212 : f32 to vector<16x128xf32>
    %548 = arith.mulf %547, %546 : vector<16x128xf32>
    %549 = math.tanh %548 : vector<16x128xf32>
    %cst_213 = arith.constant 1.000000e+00 : f32
    %550 = vector.broadcast %cst_213 : f32 to vector<16x128xf32>
    %551 = arith.addf %549, %550 : vector<16x128xf32>
    %cst_214 = arith.constant 5.000000e-01 : f32
    %552 = vector.broadcast %cst_214 : f32 to vector<16x128xf32>
    %553 = arith.mulf %552, %551 : vector<16x128xf32>
    %554 = vector.extract_strided_slice %553 {offsets = [0, 0], sizes = [16, 64], strides = [1, 1]} : vector<16x128xf32> to vector<16x64xf32>
    %555 = vector.extract_strided_slice %553 {offsets = [0, 64], sizes = [16, 64], strides = [1, 1]} : vector<16x128xf32> to vector<16x64xf32>
    %556 = vector.extract_strided_slice %545 {offsets = [0, 128], sizes = [16, 64], strides = [1, 1]} : vector<16x256xf32> to vector<16x64xf32>
    %557 = math.tanh %556 : vector<16x64xf32>
    %558 = vector.extract_strided_slice %545 {offsets = [0, 192], sizes = [16, 64], strides = [1, 1]} : vector<16x256xf32> to vector<16x64xf32>
    %cst_215 = arith.constant 5.000000e-01 : f32
    %559 = vector.broadcast %cst_215 : f32 to vector<16x64xf32>
    %560 = arith.mulf %559, %558 : vector<16x64xf32>
    %561 = math.tanh %560 : vector<16x64xf32>
    %cst_216 = arith.constant 1.000000e+00 : f32
    %562 = vector.broadcast %cst_216 : f32 to vector<16x64xf32>
    %563 = arith.addf %561, %562 : vector<16x64xf32>
    %cst_217 = arith.constant 5.000000e-01 : f32
    %564 = vector.broadcast %cst_217 : f32 to vector<16x64xf32>
    %565 = arith.mulf %564, %563 : vector<16x64xf32>
    %566 = arith.mulf %555, %535 : vector<16x64xf32>
    %567 = arith.mulf %554, %557 : vector<16x64xf32>
    %568 = arith.addf %566, %567 : vector<16x64xf32>
    %569 = math.tanh %568 : vector<16x64xf32>
    %570 = arith.mulf %565, %569 : vector<16x64xf32>
    %c16_i32_218 = arith.constant 16 : i32
    %c0_219 = arith.constant 0 : index
    %c0_220 = arith.constant 0 : index
    %571 = vector.load %arg9[%c0_219, %c0_220] : memref<64x2xf32, #tpu.memory_space<vmem>>, vector<64x2xf32>
    %cst_221 = arith.constant dense<0.000000e+00> : vector<16x2xf32>
    %572 = tpu.matmul %570, %571, %cst_221 {dimension_numbers = #tpu.dot_dimension_numbers<[1], [0], [0], [1], [0, 0, 1, 1], [], []>} : vector<16x64xf32>, vector<64x2xf32>, vector<16x2xf32> -> vector<16x2xf32>
    %c0_222 = arith.constant 0 : index
    %c0_223 = arith.constant 0 : index
    %573 = vector.load %arg10[%c0_222, %c0_223] : memref<1x2xf32, #tpu.memory_space<vmem>>, vector<1x2xf32>
    %574 = vector.broadcast %573 : vector<1x2xf32> to vector<16x2xf32>
    %575 = arith.addf %572, %574 : vector<16x2xf32>
    %cst_224 = arith.constant dense<0xFF800000> : vector<16xf32>
    %576 = vector.multi_reduction <maximumf>, %575, %cst_224 [1] : vector<16x2xf32> to vector<16xf32>
    %577 = vector.shape_cast %576 : vector<16xf32> to vector<16x1xf32>
    %578 = vector.broadcast %577 : vector<16x1xf32> to vector<16x2xf32>
    %579 = arith.subf %575, %578 : vector<16x2xf32>
    %580 = math.exp %579 : vector<16x2xf32>
    %cst_225 = arith.constant dense<0.000000e+00> : vector<16xf32>
    %581 = vector.multi_reduction <add>, %580, %cst_225 [1] : vector<16x2xf32> to vector<16xf32>
    %582 = vector.shape_cast %581 : vector<16xf32> to vector<16x1xf32>
    %583 = math.log %582 : vector<16x1xf32>
    %584 = vector.broadcast %583 : vector<16x1xf32> to vector<16x2xf32>
    %585 = arith.subf %579, %584 : vector<16x2xf32>
    %c0_226 = arith.constant 0 : index
    %c0_227 = arith.constant 0 : index
    %586 = vector.load %arg11[%c0_226, %c0_227] : memref<16x2xf32, #tpu.memory_space<vmem>>, vector<16x2xf32>
    tpu.vector_store %arg11[%c0_226, %c0_227], %585 {strides = array<i32>} : memref<16x2xf32, #tpu.memory_space<vmem>>, vector<16x2xf32>,
    return
  }
  func.func @transform_0(%arg0: i32) -> (i32, i32, i32) {
    %c0_i32 = arith.constant 0 : i32
    %c0_i32_0 = arith.constant 0 : i32
    %c0_i32_1 = arith.constant 0 : i32
    return %c0_i32, %arg0, %c0_i32_0 : i32, i32, i32
  }
  func.func @transform_1(%arg0: i32) -> (i32, i32, i32) {
    %c0_i32 = arith.constant 0 : i32
    %c0_i32_0 = arith.constant 0 : i32
    %c0_i32_1 = arith.constant 0 : i32
    %c0_i32_2 = arith.constant 0 : i32
    return %c0_i32, %c0_i32_0, %c0_i32_1 : i32, i32, i32
  }
  func.func @transform_2(%arg0: i32) -> (i32, i32) {
    %c0_i32 = arith.constant 0 : i32
    %c0_i32_0 = arith.constant 0 : i32
    %c0_i32_1 = arith.constant 0 : i32
    return %c0_i32, %c0_i32_0 : i32, i32
  }
  func.func @transform_3(%arg0: i32) -> (i32, i32) {
    %c0_i32 = arith.constant 0 : i32
    %c0_i32_0 = arith.constant 0 : i32
    %c0_i32_1 = arith.constant 0 : i32
    return %c0_i32, %c0_i32_0 : i32, i32
  }
  func.func @transform_4(%arg0: i32) -> (i32, i32) {
    %c0_i32 = arith.constant 0 : i32
    %c0_i32_0 = arith.constant 0 : i32
    %c0_i32_1 = arith.constant 0 : i32
    return %c0_i32, %c0_i32_0 : i32, i32
  }
  func.func @transform_5(%arg0: i32) -> (i32, i32) {
    %c0_i32 = arith.constant 0 : i32
    %c0_i32_0 = arith.constant 0 : i32
    %c0_i32_1 = arith.constant 0 : i32
    return %c0_i32, %c0_i32_0 : i32, i32
  }
  func.func @transform_6(%arg0: i32) -> (i32, i32) {
    %c0_i32 = arith.constant 0 : i32
    %c0_i32_0 = arith.constant 0 : i32
    return %arg0, %c0_i32 : i32, i32
  }
  func.func @transform_7(%arg0: i32) -> (i32, i32) {
    %c0_i32 = arith.constant 0 : i32
    %c0_i32_0 = arith.constant 0 : i32
    return %arg0, %c0_i32 : i32, i32
  }
  func.func @transform_8(%arg0: i32) -> (i32, i32) {
    %c0_i32 = arith.constant 0 : i32
    %c0_i32_0 = arith.constant 0 : i32
    %c0_i32_1 = arith.constant 0 : i32
    return %c0_i32, %c0_i32_0 : i32, i32
  }
  func.func @transform_9(%arg0: i32) -> (i32, i32) {
    %c0_i32 = arith.constant 0 : i32
    %c0_i32_0 = arith.constant 0 : i32
    %c0_i32_1 = arith.constant 0 : i32
    return %c0_i32, %c0_i32_0 : i32, i32
  }
  func.func @transform_10(%arg0: i32) -> (i32, i32) {
    %c0_i32 = arith.constant 0 : i32
    %c0_i32_0 = arith.constant 0 : i32
    return %arg0, %c0_i32 : i32, i32
  }
}

</mosaic_0001>

<bundles_post_ra>
// kernel: clstm_forward.1
= control target key start
LH: loop header
LB: loop body
LE: loop exit
PB: predicated region body
PF: predicated region fallthrough
CT: control target
= control target key end

     0   :  { %s5577_s18 = smov 64   ;;  %vm2417_vm0 = vcmask 523264   ;;  %vm4067_vm1 = vcmask 15360   ;;  %s6593_s1 = inlined_call_operand.vmem [shape: bf16[5,128,128], index: 1, kind: input, shape index: {}]   ;;  %s6594_s0 = inlined_call_operand.vmem [shape: bf16[20,16,128], index: 0, kind: input, shape index: {}]   ;;  %s6595_s3 = inlined_call_operand.vmem [shape: bf16[128,256], index: 3, kind: input, shape index: {}]   ;;  %s6596_s4 = inlined_call_operand.vmem [shape: bf16[64,256], index: 4, kind: input, shape index: {}]   ;;  %s6597_s2 = inlined_call_operand.vmem [shape: f32[1,128], index: 2, kind: input, shape index: {}]   ;;  %s6598_s7 = inlined_call_operand.vmem [shape: f32[16,64], index: 7, kind: input, shape index: {}]   ;;  %s6599_s6 = inlined_call_operand.vmem [shape: f32[16,64], index: 6, kind: input, shape index: {}]   ;;  %s6600_s5 = inlined_call_operand.vmem [shape: f32[1,256], index: 5, kind: input, shape index: {}]   ;;  %s6601_s8 = inlined_call_operand.vmem [shape: f32[64,2], index: 8, kind: input, shape index: {}]   ;;  %s6602_s9 = inlined_call_operand.vmem [shape: f32[1,2], index: 9, kind: input, shape index: {}]   ;;  %s6603_s10 = inlined_call_operand.vmem [shape: f32[16,2], index: 10, kind: output, shape index: {}]  }
   0x1   :  { %v5148_v0 = vld [vmem:[%s6593_s1 + $0x40] sm:$0xff]   ;;  %v5149_v1 = vld [vmem:[%s6593_s1 + $0x48] sm:$0xff]   ;;  %v5150_v2 = vld [vmem:[%s6593_s1 + $0x50] sm:$0xff]  }
   0x2   :  { %4599 = vmatprep.subr.bf16.mxu0 %v5148_v0  ;;  %v5151_v3 = vld [vmem:[%s6593_s1 + $0x58] sm:$0xff]   ;;  %v5156_v4 = vld [vmem:[%s6594_s0 + $0x8] sm:$0xff]   ;;  %v5152_v5 = vld [vmem:[%s6593_s1 + $0x60] sm:$0xff]  }
   0x3   :  { %4600 = vmatpush3.bf16.msra.mxu0 %v5148_v0  ;;  %4615 = vmatprep.mubr.bf16.mxu0 %v5156_v4  ;;  %v5153_v6 = vld [vmem:[%s6593_s1 + $0x68] sm:$0xff]   ;;  %v5154_v7 = vld [vmem:[%s6593_s1 + $0x70] sm:$0xff]   ;;  %v5155_v8 = vld [vmem:[%s6593_s1 + $0x78] sm:$0xff]  }
   0x4   :  { %4601 = vmatprep.subr.bf16.mxu0 %v5149_v1  ;;  %v5158_v9 = vld [vmem:[%s6593_s1] sm:$0xff]   ;;  %v5157_v10 = vld [vmem:[%s6594_s0 + $0x10] sm:$0xff]   ;;  %v5159_v11 = vld [vmem:[%s6594_s0 + $0x18] sm:$0xff]  }
   0x5   :  { %v5161_v12 = vld [vmem:[%s6593_s1 + $0x8] sm:$0xff]   ;;  %v5164_v13 = vld [vmem:[%s6593_s1 + $0x10] sm:$0xff]   ;;  %v5160_v14 = vld [vmem:[%s6594_s0 + $0x20] sm:$0xff]  }
   0x6   :  { %v5162_v15 = vld [vmem:[%s6594_s0 + $0x28] sm:$0xff]   ;;  %v5167_v16 = vld [vmem:[%s6593_s1 + $0x18] sm:$0xff]   ;;  %v5170_v17 = vld [vmem:[%s6593_s1 + $0x20] sm:$0xff]  }
   0x7   :  { %4602 = vmatpush3.bf16.msra.mxu0 %v5149_v1  ;;  %v5163_v18 = vld [vmem:[%s6594_s0 + $0x30] sm:$0xff]   ;;  %v5165_v19 = vld [vmem:[%s6594_s0 + $0x38] sm:$0xff]   ;;  %v5173_v20 = vld [vmem:[%s6593_s1 + $0x28] sm:$0xff]  }
   0x8   :  { %4603 = vmatprep.subr.bf16.mxu0 %v5150_v2  ;;  %v5176_v21 = vld [vmem:[%s6593_s1 + $0x30] sm:$0xff]   ;;  %v5166_v22 = vld [vmem:[%s6594_s0 + $0x40] sm:$0xff]   ;;  %v5168_v23 = vld [vmem:[%s6594_s0 + $0x48] sm:$0xff]  }
   0x9   :  { %v5179_v24 = vld [vmem:[%s6593_s1 + $0x38] sm:$0xff]   ;;  %v5182_v25 = vld [vmem:[%s6593_s1 + $0x80] sm:$0xff]   ;;  %v5169_v26 = vld [vmem:[%s6594_s0 + $0x50] sm:$0xff]  }
   0xa   :  { %v5171_v27 = vld [vmem:[%s6594_s0 + $0x58] sm:$0xff]   ;;  %v5172_v28 = vld [vmem:[%s6594_s0 + $0x60] sm:$0xff]   ;;  %v5174_v29 = vld [vmem:[%s6594_s0 + $0x68] sm:$0xff]  }
   0xb   :  { %4604 = vmatpush3.bf16.msra.mxu0 %v5150_v2  ;;  %v5175_v30 = vld [vmem:[%s6594_s0 + $0x70] sm:$0xff]   ;;  %v5177_v31 = vld [vmem:[%s6594_s0 + $0x78] sm:$0xff]   ;;  %v5178_v32 = vld [vmem:[%s6594_s0 + $0x80] sm:$0xff]  }
   0xc   :  { %4605 = vmatprep.subr.bf16.mxu0 %v5151_v3  ;;  %v5180_v33 = vld [vmem:[%s6594_s0] sm:$0xff]   ;;  %v5181_v34 = vld [vmem:[%s6594_s0 + $0x8] sm:$0xff]   ;;  %v5183_v35 = vld [vmem:[%s6594_s0 + $0x10] sm:$0xff]  }
   0xd   :  { %v5185_v36 = vld [vmem:[%s6593_s1 + $0x88] sm:$0xff]   ;;  %v5188_v37 = vld [vmem:[%s6593_s1 + $0x90] sm:$0xff]   ;;  %v5184_v38 = vld [vmem:[%s6594_s0 + $0x18] sm:$0xff]  }
   0xe   :  { %v5186_v39 = vld [vmem:[%s6594_s0 + $0x20] sm:$0xff]   ;;  %v5191_v40 = vld [vmem:[%s6593_s1 + $0x98] sm:$0xff]   ;;  %v5187_v42 = vld [vmem:[%s6594_s0 + $0x28] sm:$0xff]  }
   0xf   :  { %4606 = vmatpush3.bf16.msra.mxu0 %v5151_v3  ;;  %v5194_v41 = vld [vmem:[%s6593_s1 + $0xa0] sm:$0xff]   ;;  %v5189_v43 = vld [vmem:[%s6594_s0 + $0x30] sm:$0xff]   ;;  %v5197_v44 = vld [vmem:[%s6593_s1 + $0xa8] sm:$0xff]  }
  0x10   :  { %4607 = vmatprep.subr.bf16.mxu0 %v5152_v5  ;;  %v5200_v45 = vld [vmem:[%s6593_s1 + $0xb0] sm:$0xff]   ;;  %v5190_v46 = vld [vmem:[%s6594_s0 + $0x38] sm:$0xff]   ;;  %v5192_v47 = vld [vmem:[%s6594_s0 + $0x40] sm:$0xff]  }
  0x11   :  { %v5203_v48 = vld [vmem:[%s6593_s1 + $0xb8] sm:$0xff]   ;;  %v5206_v49 = vld [vmem:[%s6593_s1 + $0xc0] sm:$0xff]   ;;  %v5193_v50 = vld [vmem:[%s6594_s0 + $0x48] sm:$0xff]  }
  0x12   :  { %v5195_v51 = vld [vmem:[%s6594_s0 + $0x50] sm:$0xff]   ;;  %v5196_v52 = vld [vmem:[%s6594_s0 + $0x58] sm:$0xff]   ;;  %v5198_v53 = vld [vmem:[%s6594_s0 + $0x60] sm:$0xff]  }
  0x13   :  { %4608 = vmatpush3.bf16.msra.mxu0 %v5152_v5  ;;  %v5199_v54 = vld [vmem:[%s6594_s0 + $0x68] sm:$0xff]   ;;  %v5201_v55 = vld [vmem:[%s6594_s0 + $0x70] sm:$0xff]   ;;  %v5202_v56 = vld [vmem:[%s6594_s0 + $0x78] sm:$0xff]  }
  0x14   :  { %4609 = vmatprep.subr.bf16.mxu0 %v5153_v6  ;;  %v5204_v57 = vld [vmem:[%s6594_s0 + $0x10] sm:$0xff]   ;;  %v5205_v58 = vld [vmem:[%s6594_s0 + $0x18] sm:$0xff]   ;;  %v5207_v59 = vld [vmem:[%s6594_s0 + $0x20] sm:$0xff]  }
  0x15   :  { %v5209_v60 = vld [vmem:[%s6593_s1 + $0xc8] sm:$0xff]   ;;  %v5212_v61 = vld [vmem:[%s6593_s1 + $0xd0] sm:$0xff]   ;;  %v5215_v0 = vld [vmem:[%s6593_s1 + $0xd8] sm:$0xff]  }
  0x16   :  { %v5208_v62 = vld [vmem:[%s6594_s0 + $0x28] sm:$0xff]   ;;  %v5210_v63 = vld [vmem:[%s6594_s0 + $0x30] sm:$0xff]   ;;  %v5218_v1 = vld [vmem:[%s6593_s1 + $0xe0] sm:$0xff]  }
  0x17   :  { %4610 = vmatpush3.bf16.msra.mxu0 %v5153_v6  ;;  %v5211_v2 = vld [vmem:[%s6594_s0 + $0x38] sm:$0xff]   ;;  %v5213_v3 = vld [vmem:[%s6594_s0 + $0x40] sm:$0xff]   ;;  %v5221_v4 = vld [vmem:[%s6593_s1 + $0xe8] sm:$0xff]  }
  0x18   :  { %4611 = vmatprep.subr.bf16.mxu0 %v5154_v7  ;;  %v5224_v5 = vld [vmem:[%s6593_s1 + $0xf0] sm:$0xff]   ;;  %v5214_v6 = vld [vmem:[%s6594_s0 + $0x48] sm:$0xff]  }
  0x1b   :  { %4612 = vmatpush3.bf16.msra.mxu0 %v5154_v7  ;;  %v5216_v7 = vld [vmem:[%s6594_s0 + $0x50] sm:$0xff]  }
  0x1c   :  { %4613 = vmatprep.subr.bf16.mxu0 %v5155_v8 }
  0x1f   :  { %4614 = vmatpush3.bf16.msra.mxu0 %v5155_v8  ;;  %v5227_v8 = vld [vmem:[%s6593_s1 + $0xf8] sm:$0xff]  }
  0x20   :  { %4647 = vmatprep.subr.bf16.mxu0 %v5158_v9 }
  0x22   :  { %4616 = vmatmul.mubr.bf16.vlgmr.msra.gmra.mrb[0].mxu0 %v5157_v10  ;;  %v5217_v10 = vld [vmem:[%s6594_s0 + $0x58] sm:$0xff]  }
  0x23   :  { %4648 = vmatpush3.bf16.msra.mxu0 %v5158_v9  ;;  %4619 = vmatprep.mubr.bf16.mxu0 %v5159_v11  ;;  %v5230_v9 = vld [vmem:[%s6593_s1 + $0x100] sm:$0xff]  }
  0x24   :  { %4649 = vmatprep.subr.bf16.mxu0 %v5161_v12  ;;  %v5219_v11 = vld [vmem:[%s6594_s0 + $0x60] sm:$0xff]  }
  0x27   :  { %4650 = vmatpush3.bf16.msra.mxu0 %v5161_v12  ;;  %v5220_v12 = vld [vmem:[%s6594_s0 + $0x68] sm:$0xff]  }
  0x28   :  { %4651 = vmatprep.subr.bf16.mxu0 %v5164_v13 }
  0x2a   :  { %4620 = vmatmul.mubr.bf16.gmra.mrb[4].mxu0 %v5160_v14  ;;  %v5223_v14 = vld [vmem:[%s6594_s0 + $0x78] sm:$0xff]  }
  0x2b   :  { %4623 = vmatprep.mubr.bf16.mxu0 %v5162_v15  ;;  %4652 = vmatpush3.bf16.msra.mxu0 %v5164_v13  ;;  %v5222_v13 = vld [vmem:[%s6594_s0 + $0x70] sm:$0xff]   ;;  %v5225_v15 = vld [vmem:[%s6594_s0 + $0x80] sm:$0xff]  }
  0x2c   :  { %4653 = vmatprep.subr.bf16.mxu0 %v5167_v16 }
  0x2f   :  { %4654 = vmatpush3.bf16.msra.mxu0 %v5167_v16  ;;  %v5226_v16 = vld [vmem:[%s6594_s0 + $0x88] sm:$0xff]  }
  0x30   :  { %4655 = vmatprep.subr.bf16.mxu0 %v5170_v17 }
  0x32   :  { %4624 = vmatmul.mubr.bf16.gmra.mrb[8].mxu0 %v5163_v18  ;;  %v5882_v18 = vld [vmem:[%s6595_s3 + $0x4] ss:$8 sps:$4 sm:$0xff]  }
  0x33   :  { %4627 = vmatprep.mubr.bf16.mxu0 %v5165_v19  ;;  %4656 = vmatpush3.bf16.msra.mxu0 %v5170_v17  ;;  %v5228_v17 = vld [vmem:[%s6594_s0 + $0x18] sm:$0xff]   ;;  %v5887_v19 = vld [vmem:[%s6595_s3] ss:$8 sps:$4 sm:$0xff]  }
  0x34   :  { %4657 = vmatprep.subr.bf16.mxu0 %v5173_v20  ;;  %4874 = vmatprep.subr.bf16.mxu1 %v5882_v18 }
  0x35   :  { %4882 = vmatpush1.bf16.msra.mxu1 %v5887_v19 }
  0x37   :  { %4658 = vmatpush3.bf16.msra.mxu0 %v5173_v20  ;;  %v5229_v20 = vld [vmem:[%s6594_s0 + $0x20] sm:$0xff]  }
  0x38   :  { %4659 = vmatprep.subr.bf16.mxu0 %v5176_v21 }
  0x3a   :  { %4628 = vmatmul.mubr.bf16.gmra.mrb[12].mxu0 %v5166_v22  ;;  %v5231_v22 = vld [vmem:[%s6594_s0 + $0x28] sm:$0xff]  }
  0x3b   :  { %4631 = vmatprep.mubr.bf16.mxu0 %v5168_v23  ;;  %4660 = vmatpush3.bf16.msra.mxu0 %v5176_v21  ;;  %v5895_v21 = vld [vmem:[%s6595_s3 + $0x14] ss:$8 sps:$4 sm:$0xff]   ;;  %v5233_v23 = vld [vmem:[%s6593_s1 + $0x108] sm:$0xff]  }
  0x3c   :  { %4661 = vmatprep.subr.bf16.mxu0 %v5179_v24  ;;  %4875 = vmatprep.subr.bf16.mxu1 %v5895_v21 }
  0x3f   :  { %4662 = vmatpush3.bf16.msra.mxu0 %v5179_v24  ;;  %v5909_v24 = vld [vmem:[%s6595_s3 + $0x10] ss:$8 sps:$4 sm:$0xff]  }
  0x40   :  { %4695 = vmatprep.subr.bf16.mxu0 %v5182_v25  ;;  %4883 = vmatpush1.bf16.msra.mxu1 %v5909_v24 }
  0x42   :  { %4632 = vmatmul.mubr.bf16.gmra.mrb[16].mxu0 %v5169_v26  ;;  %v5236_v26 = vld [vmem:[%s6593_s1 + $0x110] sm:$0xff]  }
  0x43   :  { %4635 = vmatprep.mubr.bf16.mxu0 %v5171_v27  ;;  %v5232_v27 = vld [vmem:[%s6594_s0 + $0x30] sm:$0xff]  }
  0x4a   :  { %4636 = vmatmul.mubr.bf16.gmra.mrb[20].mxu0 %v5172_v28  ;;  %v5927_v28 = vld [vmem:[%s6595_s3 + $0x20] ss:$8 sps:$4 sm:$0xff]  }
  0x4b   :  { %4639 = vmatprep.mubr.bf16.mxu0 %v5174_v29  ;;  %v5234_v29 = vld [vmem:[%s6594_s0 + $0x38] sm:$0xff]  }
  0x52   :  { %4640 = vmatmul.mubr.bf16.gmra.mrb[24].mxu0 %v5175_v30  ;;  %v5935_v30 = vld [vmem:[%s6595_s3 + $0x34] ss:$8 sps:$4 sm:$0xff]  }
  0x53   :  { %4643 = vmatprep.mubr.bf16.mxu0 %v5177_v31  ;;  %v5239_v31 = vld [vmem:[%s6593_s1 + $0x118] sm:$0xff]  }
  0x5a   :  { %4644 = vmatmul.mubr.bf16.gmra.mrb[28].mxu0 %v5178_v32  ;;  %v5945_v32 = vld [vmem:[%s6595_s3 + $0x30] ss:$8 sps:$4 sm:$0xff]  }
  0x5b   :  { %4663 = vmatprep.mubr.bf16.mxu0 %v5180_v33  ;;  %v5950_v33 = vld [vmem:[%s6595_s3 + $0x44] ss:$8 sps:$4 sm:$0xff]  }
  0x62   :  { %4664 = vmatmul.mubr.bf16.vlgmr.msra.gmra.mrb[0].mxu0 %v5181_v34  ;;  %v5242_v34 = vld [vmem:[%s6593_s1 + $0x120] sm:$0xff]  }
  0x63   :  { %4696 = vmatpush3.bf16.msra.mxu0 %v5182_v25  ;;  %4667 = vmatprep.mubr.bf16.mxu0 %v5183_v35  ;;  %v5914_v25 = vld [vmem:[%s6595_s3 + $0x24] ss:$8 sps:$4 sm:$0xff]  }
  0x64   :  { %4697 = vmatprep.subr.bf16.mxu0 %v5185_v36  ;;  %4876 = vmatprep.subr.bf16.mxu1 %v5914_v25  ;;  %v5235_v35 = vld [vmem:[%s6594_s0 + $0x40] sm:$0xff]  }
  0x65   :  { %4884 = vmatpush1.bf16.msra.mxu1 %v5927_v28 }
  0x66   :  { %4877 = vmatprep.subr.bf16.mxu1 %v5935_v30 }
  0x67   :  { %4698 = vmatpush3.bf16.msra.mxu0 %v5185_v36  ;;  %v5280_v36 = vld [vmem:[%s6595_s3 + $0x40] ss:$8 sps:$4 sm:$0xff]  }
  0x68   :  { %4699 = vmatprep.subr.bf16.mxu0 %v5188_v37 }
  0x69   :  { %4885 = vmatpush1.bf16.msra.mxu1 %v5945_v32 }
  0x6a   :  { %4668 = vmatmul.mubr.bf16.gmra.mrb[4].mxu0 %v5184_v38  ;;  %4878 = vmatprep.subr.bf16.mxu1 %v5950_v33  ;;  %v5285_v38 = vld [vmem:[%s6595_s3 + $0x54] ss:$8 sps:$4 sm:$0xff]  }
  0x6b   :  { %4671 = vmatprep.mubr.bf16.mxu0 %v5186_v39  ;;  %4700 = vmatpush3.bf16.msra.mxu0 %v5188_v37  ;;  %v5237_v37 = vld [vmem:[%s6594_s0 + $0x48] sm:$0xff]  }
  0x6c   :  { %4701 = vmatprep.subr.bf16.mxu0 %v5191_v40  ;;  %v5245_v39 = vld [vmem:[%s6593_s1 + $0x128] sm:$0xff]  }
  0x6d   :  { %4886 = vmatpush1.bf16.msra.mxu1 %v5280_v36 }
  0x6e   :  { %4879 = vmatprep.subr.bf16.mxu1 %v5285_v38 }
  0x6f   :  { %4702 = vmatpush3.bf16.msra.mxu0 %v5191_v40  ;;  %v5283_v40 = vld [vmem:[%s6595_s3 + $0x50] ss:$8 sps:$4 sm:$0xff]  }
  0x70   :  { %4703 = vmatprep.subr.bf16.mxu0 %v5194_v41 }
  0x71   :  { %4887 = vmatpush1.bf16.msra.mxu1 %v5283_v40 }
  0x72   :  { %4672 = vmatmul.mubr.bf16.gmra.mrb[8].mxu0 %v5187_v42  ;;  %v5238_v42 = vld [vmem:[%s6594_s0 + $0x50] sm:$0xff]  }
  0x73   :  { %4675 = vmatprep.mubr.bf16.mxu0 %v5189_v43  ;;  %4704 = vmatpush3.bf16.msra.mxu0 %v5194_v41  ;;  %v5248_v41 = vld [vmem:[%s6593_s1 + $0x130] sm:$0xff]   ;;  %v5240_v43 = vld [vmem:[%s6594_s0 + $0x58] sm:$0xff]  }
  0x74   :  { %4705 = vmatprep.subr.bf16.mxu0 %v5197_v44 }
  0x77   :  { %4706 = vmatpush3.bf16.msra.mxu0 %v5197_v44  ;;  %v5251_v44 = vld [vmem:[%s6593_s1 + $0x138] sm:$0xff]  }
  0x78   :  { %4707 = vmatprep.subr.bf16.mxu0 %v5200_v45 }
  0x7a   :  { %4676 = vmatmul.mubr.bf16.gmra.mrb[12].mxu0 %v5190_v46  ;;  %v5243_v46 = vld [vmem:[%s6594_s0 + $0x68] sm:$0xff]  }
  0x7b   :  { %4679 = vmatprep.mubr.bf16.mxu0 %v5192_v47  ;;  %4708 = vmatpush3.bf16.msra.mxu0 %v5200_v45  ;;  %v5241_v45 = vld [vmem:[%s6594_s0 + $0x60] sm:$0xff]   ;;  %v5244_v47 = vld [vmem:[%s6594_s0 + $0x70] sm:$0xff]  }
  0x7c   :  { %4709 = vmatprep.subr.bf16.mxu0 %v5203_v48 }
  0x7f   :  { %4710 = vmatpush3.bf16.msra.mxu0 %v5203_v48  ;;  %v5246_v48 = vld [vmem:[%s6594_s0 + $0x78] sm:$0xff]  }
  0x80   :  { %4743 = vmatprep.subr.bf16.mxu0 %v5206_v49 }
  0x82   :  { %4680 = vmatmul.mubr.bf16.gmra.mrb[16].mxu0 %v5193_v50  ;;  %v5249_v50 = vld [vmem:[%s6594_s0 + $0x88] sm:$0xff]  }
  0x83   :  { %4683 = vmatprep.mubr.bf16.mxu0 %v5195_v51  ;;  %v5250_v51 = vld [vmem:[%s6594_s0 + $0x90] sm:$0xff]  }
  0x8a   :  { %4684 = vmatmul.mubr.bf16.gmra.mrb[20].mxu0 %v5196_v52  ;;  %v5252_v52 = vld [vmem:[%s6594_s0 + $0x20] sm:$0xff]  }
  0x8b   :  { %4687 = vmatprep.mubr.bf16.mxu0 %v5198_v53  ;;  %v5253_v53 = vld [vmem:[%s6594_s0 + $0x28] sm:$0xff]  }
  0x92   :  { %4688 = vmatmul.mubr.bf16.gmra.mrb[24].mxu0 %v5199_v54  ;;  %v5254_v54 = vld [vmem:[%s6594_s0 + $0x30] sm:$0xff]  }
  0x93   :  { %4691 = vmatprep.mubr.bf16.mxu0 %v5201_v55  ;;  %v5255_v55 = vld [vmem:[%s6594_s0 + $0x38] sm:$0xff]  }
  0x9a   :  { %4692 = vmatmul.mubr.bf16.gmra.mrb[28].mxu0 %v5202_v56  ;;  %v5256_v56 = vld [vmem:[%s6594_s0 + $0x40] sm:$0xff]  }
  0x9b   :  { %4711 = vmatprep.mubr.bf16.mxu0 %v5204_v57  ;;  %v5257_v57 = vld [vmem:[%s6594_s0 + $0x48] sm:$0xff]  }
  0xa2   :  { %4712 = vmatmul.mubr.bf16.vlgmr.msra.gmra.mrb[0].mxu0 %v5205_v58  ;;  %v5258_v58 = vld [vmem:[%s6594_s0 + $0x50] sm:$0xff]  }
  0xa3   :  { %4744 = vmatpush3.bf16.msra.mxu0 %v5206_v49  ;;  %4715 = vmatprep.mubr.bf16.mxu0 %v5207_v59  ;;  %v5247_v49 = vld [vmem:[%s6594_s0 + $0x80] sm:$0xff]   ;;  %v5259_v59 = vld [vmem:[%s6594_s0 + $0x58] sm:$0xff]  }
  0xa4   :  { %4745 = vmatprep.subr.bf16.mxu0 %v5209_v60 }
  0xa7   :  { %4746 = vmatpush3.bf16.msra.mxu0 %v5209_v60  ;;  %v5260_v60 = vld [vmem:[%s6594_s0 + $0x60] sm:$0xff]  }
  0xa8   :  { %4747 = vmatprep.subr.bf16.mxu0 %v5212_v61 }
  0xaa   :  { %4716 = vmatmul.mubr.bf16.gmra.mrb[4].mxu0 %v5208_v62  ;;  %v5262_v62 = vld [vmem:[%s6594_s0 + $0x70] sm:$0xff]  }
  0xab   :  { %4719 = vmatprep.mubr.bf16.mxu0 %v5210_v63  ;;  %4748 = vmatpush3.bf16.msra.mxu0 %v5212_v61  ;;  %v5261_v61 = vld [vmem:[%s6594_s0 + $0x68] sm:$0xff]   ;;  %v5263_v63 = vld [vmem:[%s6594_s0 + $0x78] sm:$0xff]  }
  0xac   :  { %4749 = vmatprep.subr.bf16.mxu0 %v5215_v0 }
  0xaf   :  { %4750 = vmatpush3.bf16.msra.mxu0 %v5215_v0  ;;  %v5264_v0 = vld [vmem:[%s6594_s0 + $0x80] sm:$0xff]  }
  0xb0   :  { %4751 = vmatprep.subr.bf16.mxu0 %v5218_v1 }
  0xb2   :  { %4720 = vmatmul.mubr.bf16.gmra.mrb[8].mxu0 %v5211_v2  ;;  %v5266_v2 = vld [vmem:[%s6594_s0 + $0x90] sm:$0xff]  }
  0xb3   :  { %4723 = vmatprep.mubr.bf16.mxu0 %v5213_v3  ;;  %4752 = vmatpush3.bf16.msra.mxu0 %v5218_v1  ;;  %v5265_v1 = vld [vmem:[%s6594_s0 + $0x88] sm:$0xff]   ;;  %v5267_v3 = vld [vmem:[%s6594_s0 + $0x98] sm:$0xff]  }
  0xb4   :  { %4753 = vmatprep.subr.bf16.mxu0 %v5221_v4 }
  0xb7   :  { %4754 = vmatpush3.bf16.msra.mxu0 %v5221_v4  ;;  %v5288_v4 = vld [vmem:[%s6595_s3 + $0x64] ss:$8 sps:$4 sm:$0xff]  }
  0xb8   :  { %4755 = vmatprep.subr.bf16.mxu0 %v5224_v5  ;;  %4880 = vmatprep.subr.bf16.mxu1 %v5288_v4 }
  0xba   :  { %4724 = vmatmul.mubr.bf16.gmra.mrb[12].mxu0 %v5214_v6  ;;  %v5291_v6 = vld [vmem:[%s6595_s3 + $0x74] ss:$8 sps:$4 sm:$0xff]  }
  0xbb   :  { %4727 = vmatprep.mubr.bf16.mxu0 %v5216_v7  ;;  %4756 = vmatpush3.bf16.msra.mxu0 %v5224_v5  ;;  %v5286_v5 = vld [vmem:[%s6595_s3 + $0x60] ss:$8 sps:$4 sm:$0xff]   ;;  %v5289_v7 = vld [vmem:[%s6595_s3 + $0x70] ss:$8 sps:$4 sm:$0xff]  }
  0xbc   :  { %4757 = vmatprep.subr.bf16.mxu0 %v5227_v8  ;;  %4888 = vmatpush1.bf16.msra.mxu1 %v5286_v5 }
  0xbd   :  { %4881 = vmatprep.subr.bf16.mxu1 %v5291_v6 }
  0xbf   :  { %4758 = vmatpush3.bf16.msra.mxu0 %v5227_v8  ;;  %v5576_v8 = vmov 0  }
  0xc0   :  { %4791 = vmatprep.subr.bf16.mxu0 %v5230_v9  ;;  %4889 = vmatpush1.bf16.msra.mxu1 %v5289_v7 }
  0xc1   :  { %2162 = vmatprep.mubr.bf16.mxu1 %v5576_v8 }
  0xc2   :  { %4728 = vmatmul.mubr.bf16.gmra.mrb[16].mxu0 %v5217_v10  ;;  %v6088_v10 = vld [vmem:[%s6597_s2] ss:$0 sm:$0xff] }
  0xc3   :  { %4731 = vmatprep.mubr.bf16.mxu0 %v5219_v11 }
  0xca   :  { %4732 = vmatmul.mubr.bf16.gmra.mrb[20].mxu0 %v5220_v12 }
  0xcb   :  { %4735 = vmatprep.mubr.bf16.mxu0 %v5222_v13 }
  0xd2   :  { %4736 = vmatmul.mubr.bf16.gmra.mrb[24].mxu0 %v5223_v14 }
  0xd3   :  { %4739 = vmatprep.mubr.bf16.mxu0 %v5225_v15 }
  0xda   :  { %4740 = vmatmul.mubr.bf16.gmra.mrb[28].mxu0 %v5226_v16 }
  0xdb   :  { %4759 = vmatprep.mubr.bf16.mxu0 %v5228_v17 }
  0xe2   :  { %4760 = vmatmul.mubr.bf16.vlgmr.msra.gmra.mrb[0].mxu0 %v5229_v20 }
  0xe3   :  { %4792 = vmatpush3.bf16.msra.mxu0 %v5230_v9  ;;  %4763 = vmatprep.mubr.bf16.mxu0 %v5231_v22  ;;  %v6082_v9 = vld [vmem:[%s6596_s4 + $0x4] ss:$8 sps:$4 sm:$0xff]  }
  0xe4   :  { %4793 = vmatprep.subr.bf16.mxu0 %v5233_v23  ;;  %2421 = vmatprep.subr.bf16.mxu1 %v6082_v9 }
  0xe7   :  { %4794 = vmatpush3.bf16.msra.mxu0 %v5233_v23 }
  0xe8   :  { %4795 = vmatprep.subr.bf16.mxu0 %v5236_v26 }
  0xea   :  { %4764 = vmatmul.mubr.bf16.gmra.mrb[4].mxu0 %v5232_v27 }
  0xeb   :  { %4767 = vmatprep.mubr.bf16.mxu0 %v5234_v29  ;;  %4796 = vmatpush3.bf16.msra.mxu0 %v5236_v26 }
  0xec   :  { %4797 = vmatprep.subr.bf16.mxu0 %v5239_v31 }
  0xef   :  { %4798 = vmatpush3.bf16.msra.mxu0 %v5239_v31 }
  0xf0   :  { %4799 = vmatprep.subr.bf16.mxu0 %v5242_v34 }
  0xf2   :  { %4768 = vmatmul.mubr.bf16.gmra.mrb[8].mxu0 %v5235_v35 }
  0xf3   :  { %4771 = vmatprep.mubr.bf16.mxu0 %v5237_v37  ;;  %4800 = vmatpush3.bf16.msra.mxu0 %v5242_v34  ;;  %v6102_v37 = vld [vmem:[%s6596_s4] ss:$8 sps:$4 sm:$0xff]  }
  0xf4   :  { %4801 = vmatprep.subr.bf16.mxu0 %v5245_v39 }
  0xf7   :  { %4802 = vmatpush3.bf16.msra.mxu0 %v5245_v39 }
  0xf8   :  { %4803 = vmatprep.subr.bf16.mxu0 %v5248_v41 }
  0xfa   :  { %4772 = vmatmul.mubr.bf16.gmra.mrb[12].mxu0 %v5238_v42 }
  0xfb   :  { %4775 = vmatprep.mubr.bf16.mxu0 %v5240_v43  ;;  %4804 = vmatpush3.bf16.msra.mxu0 %v5248_v41  ;;  %v6107_v41 = vld [vmem:[%s6596_s4 + $0x14] ss:$8 sps:$4 sm:$0xff]  }
  0xfc   :  { %4805 = vmatprep.subr.bf16.mxu0 %v5251_v44 }
  0xff   :  { %4806 = vmatpush3.bf16.msra.mxu0 %v5251_v44 }
 0x100   :  { %2100 = vmatprep.subr.bf16.mxu0 %v5882_v18 }
 0x102   :  { %4776 = vmatmul.mubr.bf16.gmra.mrb[16].mxu0 %v5241_v45 }
 0x103   :  { %4779 = vmatprep.mubr.bf16.mxu0 %v5243_v46  ;;  %v6115_v46 = vld [vmem:[%s6596_s4 + $0x10] ss:$8 sps:$4 sm:$0xff]  }
 0x10a   :  { %4780 = vmatmul.mubr.bf16.gmra.mrb[20].mxu0 %v5244_v47 }
 0x10b   :  { %4783 = vmatprep.mubr.bf16.mxu0 %v5246_v48 }
 0x112   :  { %4784 = vmatmul.mubr.bf16.gmra.mrb[24].mxu0 %v5247_v49  ;;  %v6123_v49 = vld [vmem:[%s6596_s4 + $0x24] ss:$8 sps:$4 sm:$0xff]  }
 0x113   :  { %4787 = vmatprep.mubr.bf16.mxu0 %v5249_v50 }
 0x11a   :  { %4788 = vmatmul.mubr.bf16.gmra.mrb[28].mxu0 %v5250_v51 }
 0x11b   :  { %4807 = vmatprep.mubr.bf16.mxu0 %v5252_v52 }
 0x122   :  { %4808 = vmatmul.mubr.bf16.vlgmr.msra.gmra.mrb[0].mxu0 %v5253_v53 }
 0x123   :  { %4811 = vmatprep.mubr.bf16.mxu0 %v5254_v54  ;;  %2101 = vmatpush1.bf16.msra.mxu0 %v5887_v19 }
 0x124   :  { %2102 = vmatprep.subr.bf16.mxu0 %v5895_v21 }
 0x127   :  { %2103 = vmatpush1.bf16.msra.mxu0 %v5909_v24 }
 0x128   :  { %2104 = vmatprep.subr.bf16.mxu0 %v5914_v25 }
 0x12a   :  { %4812 = vmatmul.mubr.bf16.gmra.mrb[4].mxu0 %v5255_v55 }
 0x12b   :  { %4815 = vmatprep.mubr.bf16.mxu0 %v5256_v56  ;;  %2105 = vmatpush1.bf16.msra.mxu0 %v5927_v28  ;;  %v6132_v56 = vld [vmem:[%s6596_s4 + $0x20] ss:$8 sps:$4 sm:$0xff]  }
 0x12c   :  { %2106 = vmatprep.subr.bf16.mxu0 %v5935_v30 }
 0x12f   :  { %2107 = vmatpush1.bf16.msra.mxu0 %v5945_v32 }
 0x130   :  { %2108 = vmatprep.subr.bf16.mxu0 %v5950_v33 }
 0x132   :  { %4816 = vmatmul.mubr.bf16.gmra.mrb[8].mxu0 %v5257_v57 }
 0x133   :  { %4819 = vmatprep.mubr.bf16.mxu0 %v5258_v58  ;;  %2109 = vmatpush1.bf16.msra.mxu0 %v5280_v36 }
 0x134   :  { %2110 = vmatprep.subr.bf16.mxu0 %v5285_v38 }
 0x137   :  { %2111 = vmatpush1.bf16.msra.mxu0 %v5283_v40 }
 0x138   :  { %2112 = vmatprep.subr.bf16.mxu0 %v5288_v4 }
 0x13a   :  { %4820 = vmatmul.mubr.bf16.gmra.mrb[12].mxu0 %v5259_v59  ;;  %v6137_v59 = vld [vmem:[%s6596_s4 + $0x34] ss:$8 sps:$4 sm:$0xff]  }
 0x13b   :  { %4823 = vmatprep.mubr.bf16.mxu0 %v5260_v60  ;;  %2113 = vmatpush1.bf16.msra.mxu0 %v5286_v5 }
 0x13c   :  { %2114 = vmatprep.subr.bf16.mxu0 %v5291_v6 }
 0x13f   :  { %2115 = vmatpush1.bf16.msra.mxu0 %v5289_v7 }
 0x142   :  { %4824 = vmatmul.mubr.bf16.gmra.mrb[16].mxu0 %v5261_v61 }
 0x143   :  { %4827 = vmatprep.mubr.bf16.mxu0 %v5262_v62 }
 0x14a   :  { %4828 = vmatmul.mubr.bf16.gmra.mrb[20].mxu0 %v5263_v63 }
 0x14b   :  { %4831 = vmatprep.mubr.bf16.mxu0 %v5264_v0 }
 0x152   :  { %4832 = vmatmul.mubr.bf16.gmra.mrb[24].mxu0 %v5265_v1 }
 0x153   :  { %4835 = vmatprep.mubr.bf16.mxu0 %v5266_v2  ;;  %v6147_v2 = vld [vmem:[%s6596_s4 + $0x30] ss:$8 sps:$4 sm:$0xff]  }
 0x15a   :  { %4836 = vmatmul.mubr.bf16.gmra.mrb[28].mxu0 %v5267_v3 }
 0x15b   :  { %2132 = vmatprep.mubr.bf16.mxu0 %v5576_v8 }
 0x1f5   :  { %v4809_v11 = vpop.f32.mrb[0].mxu0 }
 0x1f6   :  { %v1914_v12 = vadd.f32 %v4809_v11, %v6088_v10  ;;  %v1746_v13 = vpop.f32.mrb[1].mxu0 }
 0x1f7   :  { %v1912_v14 = vadd.f32 %v6088_v10, %v1746_v13  ;;  %v4810_v15 = vpop.f32.mrb[2].mxu0 }
 0x1f8   :  { %v1915_v16 = vadd.f32 %v4810_v15, %v6088_v10  ;;  %v1749_v17 = vpop.f32.mrb[3].mxu0  ;;  %v1946_v19 = vmax.f32 %v1914_v12, 0.0 }
 0x1f9   :  { %v1913_v18 = vadd.f32 %v6088_v10, %v1749_v17  ;;  %v1944_v21 = vmax.f32 %v1912_v14, 0.0 }
 0x1fa   :  { %v1947_v20 = vmax.f32 %v1915_v16, 0.0 }
 0x1fb   :  { %v1945_v22 = vmax.f32 %v1913_v18, 0.0 }
 0x1fc   :  { %v1977_v23 = vpack.c.bf16 %v1947_v20, %v1946_v19 }
 0x1fd   :  { %v1976_v24 = vpack.c.bf16 %v1945_v22, %v1944_v21  ;;  %v4813_v25 = vpop.f32.mrb[4].mxu0 }
 0x1fe   :  { %v1918_v26 = vadd.f32 %v4813_v25, %v6088_v10  ;;  %v1762_v27 = vpop.f32.mrb[5].mxu0 }
 0x1ff   :  { %v1916_v28 = vadd.f32 %v6088_v10, %v1762_v27  ;;  %v4814_v29 = vpop.f32.mrb[6].mxu0  ;;  %2133 = vmatmul.mubr.bf16.vlgmr.msra.gmra.mrb[32].mxu0 %v1976_v24 }
 0x200   :  { %v1919_v30 = vadd.f32 %v4814_v29, %v6088_v10  ;;  %v1765_v31 = vpop.f32.mrb[7].mxu0  ;;  %2142 = vmatprep.mubr.bf16.mxu0 %v5576_v8  ;;  %v1950_v33 = vmax.f32 %v1918_v26, 0.0 }
 0x201   :  { %v1917_v32 = vadd.f32 %v6088_v10, %v1765_v31  ;;  %v1948_v35 = vmax.f32 %v1916_v28, 0.0 }
 0x202   :  { %v1951_v34 = vmax.f32 %v1919_v30, 0.0 }
 0x203   :  { %v1949_v36 = vmax.f32 %v1917_v32, 0.0 }
 0x204   :  { %v1979_v38 = vpack.c.bf16 %v1951_v34, %v1950_v33 }
 0x205   :  { %v1978_v39 = vpack.c.bf16 %v1949_v36, %v1948_v35  ;;  %v4817_v40 = vpop.f32.mrb[8].mxu0 }
 0x206   :  { %v1922_v42 = vadd.f32 %v4817_v40, %v6088_v10  ;;  %v1778_v43 = vpop.f32.mrb[9].mxu0  ;;  %2163 = vmatmul.mubr.bf16.vlgmr.msra.gmra.mrb[0].mxu1 %v1979_v38 }
 0x207   :  { %v1920_v44 = vadd.f32 %v6088_v10, %v1778_v43  ;;  %v4818_v45 = vpop.f32.mrb[10].mxu0  ;;  %2143 = vmatmul.mubr.bf16.gmra.mrb[36].mxu0 %v1977_v23  ;;  %2422 = vmatpush1.bf16.msra.mxu1 %v6102_v37 }
 0x208   :  { %v1923_v47 = vadd.f32 %v4818_v45, %v6088_v10  ;;  %v1781_v48 = vpop.f32.mrb[11].mxu0  ;;  %2152 = vmatprep.mubr.bf16.mxu0 %v5576_v8  ;;  %2172 = vmatprep.mubr.bf16.mxu1 %v5576_v8  ;;  %v1954_v51 = vmax.f32 %v1922_v42, 0.0 }
 0x209   :  { %v1921_v50 = vadd.f32 %v6088_v10, %v1781_v48  ;;  %2423 = vmatprep.subr.bf16.mxu1 %v6107_v41  ;;  %v1952_v53 = vmax.f32 %v1920_v44, 0.0 }
 0x20a   :  { %v1955_v52 = vmax.f32 %v1923_v47, 0.0 }
 0x20b   :  { %v1953_v54 = vmax.f32 %v1921_v50, 0.0  ;;  %2424 = vmatpush1.bf16.msra.mxu1 %v6115_v46 }
 0x20c   :  { %v1981_v55 = vpack.c.bf16 %v1955_v52, %v1954_v51  ;;  %2425 = vmatprep.subr.bf16.mxu1 %v6123_v49 }
 0x20d   :  { %v1980_v57 = vpack.c.bf16 %v1953_v54, %v1952_v53  ;;  %v4821_v58 = vpop.f32.mrb[12].mxu0 }
 0x20e   :  { %v1926_v60 = vadd.f32 %v4821_v58, %v6088_v10  ;;  %v1794_v61 = vpop.f32.mrb[13].mxu0 }
 0x20f   :  { %v1924_v62 = vadd.f32 %v6088_v10, %v1794_v61  ;;  %v4822_v63 = vpop.f32.mrb[14].mxu0  ;;  %2153 = vmatmul.mubr.bf16.gmra.mrb[40].mxu0 %v1978_v39  ;;  %2173 = vmatmul.mubr.bf16.gmra.mrb[4].mxu1 %v1980_v57 }
 0x210   :  { %v1927_v0 = vadd.f32 %v4822_v63, %v6088_v10  ;;  %v1797_v1 = vpop.f32.mrb[15].mxu0  ;;  %2182 = vmatprep.mubr.bf16.mxu1 %v5576_v8  ;;  %2426 = vmatpush1.bf16.msra.mxu1 %v6132_v56  ;;  %v1958_v4 = vmax.f32 %v1926_v60, 0.0 }
 0x211   :  { %v1925_v3 = vadd.f32 %v6088_v10, %v1797_v1  ;;  %2427 = vmatprep.subr.bf16.mxu1 %v6137_v59  ;;  %v1956_v6 = vmax.f32 %v1924_v62, 0.0 }
 0x212   :  { %v1959_v5 = vmax.f32 %v1927_v0, 0.0 }
 0x213   :  { %v1957_v7 = vmax.f32 %v1925_v3, 0.0 }
 0x214   :  { %v1983_v11 = vpack.c.bf16 %v1959_v5, %v1958_v4  ;;  %2428 = vmatpush1.bf16.msra.mxu1 %v6147_v2 }
 0x215   :  { %v1982_v12 = vpack.c.bf16 %v1957_v7, %v1956_v6  ;;  %v4825_v13 = vpop.f32.mrb[16].mxu0  ;;  %2526 = vmatprep.subr.bf16.mxu1 %v6082_v9 }
 0x216   :  { %v1930_v14 = vadd.f32 %v4825_v13, %v6088_v10  ;;  %v1810_v15 = vpop.f32.mrb[17].mxu0 }
 0x217   :  { %v1928_v16 = vadd.f32 %v6088_v10, %v1810_v15  ;;  %v4826_v17 = vpop.f32.mrb[18].mxu0  ;;  %2183 = vmatmul.mubr.bf16.gmra.mrb[8].mxu1 %v1981_v55  ;;  %v2360_v15 = vld [vmem:[%s6598_s7 + $0x8] sm:$0xff] }
 0x218   :  { %v1931_v18 = vadd.f32 %v4826_v17, %v6088_v10  ;;  %v1813_v19 = vpop.f32.mrb[19].mxu0  ;;  %2192 = vmatprep.mubr.bf16.mxu1 %v5576_v8  ;;  %v1962_v21 = vmax.f32 %v1930_v14, 0.0  ;;  %v2358_v17 = vld [vmem:[%s6599_s6 + $0x8] sm:$0xff] }
 0x219   :  { %v1929_v20 = vadd.f32 %v6088_v10, %v1813_v19  ;;  %v1960_v23 = vmax.f32 %v1928_v16, 0.0  ;;  %v2357_v16 = vld [vmem:[%s6599_s6] sm:$0xff] }
 0x21a   :  { %v1963_v22 = vmax.f32 %v1931_v18, 0.0  ;;  %v2368_v18 = vpack.c.bf16 %v2358_v17, %v2357_v16 }
 0x21b   :  { %v1961_v24 = vmax.f32 %v1929_v20, 0.0 }
 0x21c   :  { %v1985_v25 = vpack.c.bf16 %v1963_v22, %v1962_v21 }
 0x21d   :  { %v1984_v26 = vpack.c.bf16 %v1961_v24, %v1960_v23  ;;  %v4829_v27 = vpop.f32.mrb[20].mxu0 }
 0x21e   :  { %v1934_v28 = vadd.f32 %v4829_v27, %v6088_v10  ;;  %v1826_v29 = vpop.f32.mrb[21].mxu0 }
 0x21f   :  { %v1932_v30 = vadd.f32 %v6088_v10, %v1826_v29  ;;  %v4830_v31 = vpop.f32.mrb[22].mxu0  ;;  %2193 = vmatmul.mubr.bf16.gmra.mrb[12].mxu1 %v1982_v12 }
 0x220   :  { %v1935_v32 = vadd.f32 %v4830_v31, %v6088_v10  ;;  %v1829_v33 = vpop.f32.mrb[23].mxu0  ;;  %2202 = vmatprep.mubr.bf16.mxu1 %v5576_v8  ;;  %v1966_v35 = vmax.f32 %v1934_v28, 0.0  ;;  %v2010_v31 = vlaneseq }
 0x221   :  { %v1933_v34 = vadd.f32 %v6088_v10, %v1829_v33  ;;  %v1964_v38 = vmax.f32 %v1932_v30, 0.0 }
 0x222   :  { %v1967_v36 = vmax.f32 %v1935_v32, 0.0  ;;  %v2011_v32 = vshrl.u32 %v2010_v31, 7 }
 0x223   :  { %v1965_v39 = vmax.f32 %v1933_v34, 0.0  ;;  %v2008_v34 = vld [vmem:[%s6600_s5] sm:$0x3] }
 0x224   :  { %v1987_v40 = vpack.c.bf16 %v1967_v36, %v1966_v35  ;;  %v2012_v33 = vsub.s32 0, %v2011_v32  ;;  %v2016_v35 = vsub.s32 1, %v2011_v32 }
 0x225   :  { %v1986_v42 = vpack.c.bf16 %v1965_v39, %v1964_v38  ;;  %v4833_v43 = vpop.f32.mrb[24].mxu0 }
 0x226   :  { %v1938_v44 = vadd.f32 %v4833_v43, %v6088_v10  ;;  %v1842_v45 = vpop.f32.mrb[25].mxu0  ;;  %v6223_v36 = vrot.slane %v2008_v34, %v2012_v33  ;;  %v6225_v38 = vrot.slane %v2008_v34, %v2016_v35 }
 0x227   :  { %v1936_v47 = vadd.f32 %v6088_v10, %v1842_v45  ;;  %v4834_v48 = vpop.f32.mrb[26].mxu0  ;;  %2203 = vmatmul.mubr.bf16.gmra.mrb[16].mxu1 %v1983_v11 }
 0x228   :  { %v1939_v50 = vadd.f32 %v4834_v48, %v6088_v10  ;;  %v1845_v51 = vpop.f32.mrb[27].mxu0  ;;  %2212 = vmatprep.mubr.bf16.mxu1 %v5576_v8  ;;  %v1970_v53 = vmax.f32 %v1938_v44, 0.0 }
 0x229   :  { %v1937_v52 = vadd.f32 %v6088_v10, %v1845_v51  ;;  %v1968_v55 = vmax.f32 %v1936_v47, 0.0 }
 0x22a   :  { %v1971_v54 = vmax.f32 %v1939_v50, 0.0 }
 0x22b   :  { %v1969_v57 = vmax.f32 %v1937_v52, 0.0 }
 0x22c   :  { %v1989_v58 = vpack.c.bf16 %v1971_v54, %v1970_v53 }
 0x22d   :  { %v1988_v60 = vpack.c.bf16 %v1969_v57, %v1968_v55  ;;  %v4837_v61 = vpop.f32.mrb[28].mxu0 }
 0x22e   :  { %v1942_v62 = vadd.f32 %v4837_v61, %v6088_v10  ;;  %v1858_v63 = vpop.f32.mrb[29].mxu0 }
 0x22f   :  { %v1940_v0 = vadd.f32 %v6088_v10, %v1858_v63  ;;  %v4838_v1 = vpop.f32.mrb[30].mxu0  ;;  %2213 = vmatmul.mubr.bf16.gmra.mrb[20].mxu1 %v1984_v26 }
 0x230   :  { %v1943_v3 = vadd.f32 %v4838_v1, %v6088_v10  ;;  %v1861_v4 = vpop.f32.mrb[31].mxu0  ;;  %2222 = vmatprep.mubr.bf16.mxu1 %v5576_v8  ;;  %v1974_v6 = vmax.f32 %v1942_v62, 0.0 }
 0x231   :  { %v1941_v5 = vadd.f32 %v6088_v10, %v1861_v4  ;;  %v1972_v11 = vmax.f32 %v1940_v0, 0.0  ;;  %v2359_v10 = vld [vmem:[%s6598_s7] sm:$0xff] }
 0x232   :  { %v1975_v7 = vmax.f32 %v1943_v3, 0.0  ;;  %2488 = vrot.lane.b32.xlu0 %v2359_v10, %s5577_s18 }
 0x233   :  { %v1973_v12 = vmax.f32 %v1941_v5, 0.0 }
 0x234   :  { %v1991_v13 = vpack.c.bf16 %v1975_v7, %v1974_v6 }
 0x235   :  { %v1990_v14 = vpack.c.bf16 %v1973_v12, %v1972_v11 }
 0x236   :  { %2490 = vrot.lane.b32.xlu0 %v2360_v15, %s5577_s18 }
 0x237   :  { %2223 = vmatmul.mubr.bf16.gmra.mrb[24].mxu1 %v1985_v25 }
 0x238   :  { %2232 = vmatprep.mubr.bf16.mxu1 %v5576_v8 }
 0x23f   :  { %2233 = vmatmul.mubr.bf16.gmra.mrb[28].mxu1 %v1986_v42 }
 0x240   :  { %2242 = vmatprep.mubr.bf16.mxu1 %v5576_v8 }
 0x247   :  { %2243 = vmatmul.mubr.bf16.gmra.mrb[32].mxu1 %v1987_v40 }
 0x248   :  { %2252 = vmatprep.mubr.bf16.mxu1 %v5576_v8 }
 0x24f   :  { %2253 = vmatmul.mubr.bf16.gmra.mrb[36].mxu1 %v1988_v60 }
 0x250   :  { %2262 = vmatprep.mubr.bf16.mxu1 %v5576_v8 }
 0x257   :  { %2263 = vmatmul.mubr.bf16.gmra.mrb[40].mxu1 %v1989_v58 }
 0x258   :  { %2272 = vmatprep.mubr.bf16.mxu1 %v5576_v8 }
 0x25f   :  { %2273 = vmatmul.mubr.bf16.gmra.mrb[44].mxu1 %v1990_v14 }
 0x260   :  { %2282 = vmatprep.mubr.bf16.mxu1 %v5576_v8 }
 0x267   :  { %2283 = vmatmul.mubr.bf16.gmra.mrb[48].mxu1 %v1991_v13 }
 0x268   :  { %2453 = vmatprep.mubr.bf16.mxu1 %v5576_v8 }
 0x26f   :  { %4450 = vmatmul.mubr.msk.bf16.vlgmr.msra.gmra.mrb[52].mxu1 %vm2417_vm0, %v2368_v18 }
 0x270   :  { %2527 = vmatpush1.bf16.msra.mxu1 %v6102_v37  ;;  %2558 = vmatprep.mubr.bf16.mxu1 %v5576_v8 }
 0x271   :  { %2528 = vmatprep.subr.bf16.mxu1 %v6107_v41 }
 0x274   :  { %2529 = vmatpush1.bf16.msra.mxu1 %v6115_v46 }
 0x275   :  { %2530 = vmatprep.subr.bf16.mxu1 %v6123_v49 }
 0x278   :  { %2531 = vmatpush1.bf16.msra.mxu1 %v6132_v56 }
 0x279   :  { %2532 = vmatprep.subr.bf16.mxu1 %v6137_v59 }
 0x27c   :  { %2533 = vmatpush1.bf16.msra.mxu1 %v6147_v2 }
 0x27d   :  { %2623 = vmatprep.subr.bf16.mxu1 %v6082_v9 }
 0x2a4   :  { %v2489_v6 = vpop.permute.xlu0 %2488 }
 0x2a8   :  { %v2491_v12 = vpop.permute.xlu0 %2490 }
 0x2d2   :  { %v2134_v19 = vpop.f32.mrb[32].mxu0 }
 0x2d3   :  { %v2136_v20 = vpop.f32.mrb[33].mxu0  ;;  %v2135_v39 = vadd.f32 %v2134_v19, %v6223_v36 }
 0x2d4   :  { %v2138_v21 = vpop.f32.mrb[34].mxu0  ;;  %v2137_v40 = vadd.f32 %v2136_v20, %v6225_v38 }
 0x2d5   :  { %v2140_v22 = vpop.f32.mrb[35].mxu0  ;;  %v2139_v43 = vadd.f32 %v2138_v21, %v6223_v36 }
 0x2d6   :  { %v2141_v47 = vadd.f32 %v2140_v22, %v6225_v38 }
 0x2da   :  { %v6204_v23 = vpop.f32.mrb[36].mxu0 }
 0x2db   :  { %v6206_v24 = vpop.f32.mrb[37].mxu0 }
 0x2dc   :  { %v6208_v25 = vpop.f32.mrb[38].mxu0 }
 0x2dd   :  { %v6210_v26 = vpop.f32.mrb[39].mxu0 }
 0x2e2   :  { %v6212_v27 = vpop.f32.mrb[40].mxu0 }
 0x2e3   :  { %v6214_v28 = vpop.f32.mrb[41].mxu0 }
 0x2e4   :  { %v6216_v29 = vpop.f32.mrb[42].mxu0 }
 0x2e5   :  { %v6218_v30 = vpop.f32.mrb[43].mxu0 }
 0x342   :  { %v2455_v42 = vpop.f32.mrb[52].mxu1 }
 0x343   :  { %v2464_v44 = vadd.f32 %v2455_v42, %v2135_v39  ;;  %v2457_v45 = vpop.f32.mrb[53].mxu1  ;;  %v2147_v42 = vadd.f32 %v6206_v24, %v6225_v38 }
 0x344   :  { %v2465_v48 = vadd.f32 %v2457_v45, %v2137_v40  ;;  %v2459_v50 = vpop.f32.mrb[54].mxu1  ;;  %v2145_v40 = vadd.f32 %v6204_v23, %v6223_v36 }
 0x345   :  { %v2468_v51 = vmul.f32 0.5, %v2464_v44  ;;  %v2466_v52 = vadd.f32 %v2459_v50, %v2139_v43  ;;  %v2461_v53 = vpop.f32.mrb[55].mxu1  ;;  %v2149_v44 = vadd.f32 %v6208_v25, %v6223_v36 }
 0x346   :  { %v2467_v54 = vadd.f32 %v2461_v53, %v2141_v47  ;;  %v2478_v5 = vmul.f32 0.5, %v2465_v48 }
 0x347   :  { %5304 = vtanh.f32 %v2468_v51  ;;  %v2469_v55 = vmul.f32 0.5, %v2466_v52 }
 0x348   :  { %v2479_v7 = vmul.f32 0.5, %v2467_v54 }
 0x349   :  { %5306 = vtanh.f32 %v2469_v55 }
 0x34a   :  { %5308 = vtanh.f32 %v2465_v48  ;;  %v2151_v48 = vadd.f32 %v6210_v26, %v6225_v38 }
 0x34b   :  { %5310 = vtanh.f32 %v2467_v54 }
 0x34c   :  { %5312 = vtanh.f32 %v2478_v5 }
 0x34d   :  { %5314 = vtanh.f32 %v2479_v7 }
 0x351   :  { %v5305_v57 = vpop.eup %5304 }
 0x352   :  { %v2472_v58 = vadd.f32 1.0, %v5305_v57 }
 0x353   :  { %v5307_v60 = vpop.eup %5306 }
 0x354   :  { %v2474_v61 = vmul.f32 0.5, %v2472_v58  ;;  %v2473_v62 = vadd.f32 1.0, %v5307_v60  ;;  %v5309_v63 = vpop.eup %5308 }
 0x355   :  { %v5311_v3 = vpop.eup %5310 }
 0x356   :  { %v2475_v0 = vmul.f32 0.5, %v2473_v62  ;;  %v2496_v1 = vmul.f32 %v5309_v63, %v2474_v61  ;;  %v2494_v11 = vmul.f32 %v2489_v6, %v2474_v61  ;;  %v5313_v17 = vpop.eup %5312 }
 0x357   :  { %v5315_v18 = vpop.eup %5314  ;;  %v2482_v19 = vadd.f32 1.0, %v5313_v17 }
 0x358   :  { %2500 = vrot.lane.b32.xlu1 %v2496_v1, %s5577_s18  ;;  %v2497_v4 = vmul.f32 %v5311_v3, %v2475_v0  ;;  %v2495_v10 = vmul.f32 %v2491_v12, %v2475_v0  ;;  %v2483_v20 = vadd.f32 1.0, %v5315_v18 }
 0x359   :  { %v2484_v22 = vmul.f32 0.5, %v2482_v19 }
 0x35a   :  { %v2485_v31 = vmul.f32 0.5, %v2483_v20 }
 0x35c   :  { %2502 = vrot.lane.b32.xlu1 %v2497_v4, %s5577_s18 }
 0x3ca   :  { %v2501_v13 = vpop.permute.xlu1 %2500 }
 0x3cb   :  { %v6233_v14 = vadd.f32 %v2501_v13, %v2494_v11 }
 0x3cd   :  { %5316 = vtanh.f32 %v6233_v14 }
 0x3ce   :  { %v2503_v15 = vpop.permute.xlu1 %2502 }
 0x3cf   :  { %v2507_v16 = vadd.f32 %v2503_v15, %v2495_v10 }
 0x3d1   :  { %5318 = vtanh.f32 %v2507_v16 }
 0x3d7   :  { %v5317_v21 = vpop.eup %5316 }
 0x3d8   :  { %v2510_v33 = vmul.f32 %v5317_v21, %v2484_v22 }
 0x3db   :  { %v5319_v32 = vpop.eup %5318 }
 0x3dc   :  { %v2511_v34 = vmul.f32 %v5319_v32, %v2485_v31 }
 0x3de   :  { %v2519_v35 = vpack.c.bf16 %v2511_v34, %v2510_v33  ;;  %v2157_v33 = vadd.f32 %v6214_v28, %v6225_v38 }
 0x3e0   :  { %2521 = vrot.lane.b32.xlu0 %v2519_v35, %s5577_s18  ;;  %v2159_v35 = vadd.f32 %v6216_v29, %v6223_v36 }
 0x452   :  { %v2522_v39 = vpop.permute.xlu0 %2521 }
 0x453   :  { %4451 = vmatmul.mubr.msk.bf16.vlgmr.msra.gmra.mrb[56].mxu1 %vm2417_vm0, %v2522_v39 }
 0x454   :  { %2624 = vmatpush1.bf16.msra.mxu1 %v6102_v37  ;;  %2655 = vmatprep.mubr.bf16.mxu1 %v5576_v8 }
 0x455   :  { %2625 = vmatprep.subr.bf16.mxu1 %v6107_v41 }
 0x458   :  { %2626 = vmatpush1.bf16.msra.mxu1 %v6115_v46 }
 0x459   :  { %2627 = vmatprep.subr.bf16.mxu1 %v6123_v49 }
 0x45c   :  { %2628 = vmatpush1.bf16.msra.mxu1 %v6132_v56 }
 0x45d   :  { %2629 = vmatprep.subr.bf16.mxu1 %v6137_v59 }
 0x460   :  { %2630 = vmatpush1.bf16.msra.mxu1 %v6147_v2 }
 0x461   :  { %2720 = vmatprep.subr.bf16.mxu1 %v6082_v9 }
 0x526   :  { %v2560_v43 = vpop.f32.mrb[56].mxu1 }
 0x527   :  { %v2569_v45 = vadd.f32 %v2560_v43, %v2145_v40  ;;  %v2562_v47 = vpop.f32.mrb[57].mxu1 }
 0x528   :  { %v2570_v50 = vadd.f32 %v2562_v47, %v2147_v42  ;;  %v2564_v51 = vpop.f32.mrb[58].mxu1  ;;  %v2161_v42 = vadd.f32 %v6218_v30, %v6225_v38 }
 0x529   :  { %v2573_v52 = vmul.f32 0.5, %v2569_v45  ;;  %v2571_v53 = vadd.f32 %v2564_v51, %v2149_v44  ;;  %v2566_v54 = vpop.f32.mrb[59].mxu1 }
 0x52a   :  { %v2572_v55 = vadd.f32 %v2566_v54, %v2151_v48  ;;  %v2583_v1 = vmul.f32 0.5, %v2570_v50 }
 0x52b   :  { %5320 = vtanh.f32 %v2573_v52  ;;  %v2574_v23 = vmul.f32 0.5, %v2571_v53 }
 0x52c   :  { %v2584_v3 = vmul.f32 0.5, %v2572_v55 }
 0x52d   :  { %5322 = vtanh.f32 %v2574_v23 }
 0x52e   :  { %5324 = vtanh.f32 %v2570_v50 }
 0x52f   :  { %5326 = vtanh.f32 %v2572_v55 }
 0x530   :  { %5328 = vtanh.f32 %v2583_v1 }
 0x531   :  { %5330 = vtanh.f32 %v2584_v3 }
 0x535   :  { %v5321_v24 = vpop.eup %5320 }
 0x536   :  { %v2577_v57 = vadd.f32 1.0, %v5321_v24 }
 0x537   :  { %v5323_v58 = vpop.eup %5322 }
 0x538   :  { %v2579_v25 = vmul.f32 0.5, %v2577_v57  ;;  %v2578_v60 = vadd.f32 1.0, %v5323_v58  ;;  %v5325_v61 = vpop.eup %5324 }
 0x539   :  { %v5327_v26 = vpop.eup %5326 }
 0x53a   :  { %v2580_v62 = vmul.f32 0.5, %v2578_v60  ;;  %v2593_v63 = vmul.f32 %v5325_v61, %v2579_v25  ;;  %v2591_v4 = vmul.f32 %v2579_v25, %v6233_v14  ;;  %v5329_v13 = vpop.eup %5328 }
 0x53b   :  { %v5331_v10 = vpop.eup %5330  ;;  %v2587_v15 = vadd.f32 1.0, %v5329_v13 }
 0x53c   :  { %2597 = vrot.lane.b32.xlu1 %v2593_v63, %s5577_s18  ;;  %v2594_v0 = vmul.f32 %v5327_v26, %v2580_v62  ;;  %v2592_v7 = vmul.f32 %v2580_v62, %v2507_v16  ;;  %v2588_v17 = vadd.f32 1.0, %v5331_v10  ;;  %v2155_v16 = vadd.f32 %v6212_v27, %v6223_v36 }
 0x53d   :  { %v2589_v19 = vmul.f32 0.5, %v2587_v15 }
 0x53e   :  { %2599 = vrot.lane.b32.xlu0 %v2594_v0, %s5577_s18  ;;  %v2590_v20 = vmul.f32 0.5, %v2588_v17 }
 0x5ae   :  { %v2598_v5 = vpop.permute.xlu1 %2597 }
 0x5af   :  { %v6258_v6 = vadd.f32 %v2598_v5, %v2591_v4 }
 0x5b0   :  { %v2600_v11 = vpop.permute.xlu0 %2599 }
 0x5b1   :  { %5332 = vtanh.f32 %v6258_v6  ;;  %v2604_v12 = vadd.f32 %v2600_v11, %v2592_v7 }
 0x5b3   :  { %5334 = vtanh.f32 %v2604_v12 }
 0x5bb   :  { %v5333_v18 = vpop.eup %5332 }
 0x5bc   :  { %v2607_v22 = vmul.f32 %v5333_v18, %v2589_v19 }
 0x5bd   :  { %v5335_v21 = vpop.eup %5334 }
 0x5be   :  { %v2608_v31 = vmul.f32 %v5335_v21, %v2590_v20 }
 0x5c0   :  { %v2616_v14 = vpack.c.bf16 %v2608_v31, %v2607_v22 }
 0x5c2   :  { %2618 = vrot.lane.b32.xlu1 %v2616_v14, %s5577_s18 }
 0x634   :  { %v2619_v32 = vpop.permute.xlu1 %2618 }
 0x635   :  { %4452 = vmatmul.mubr.msk.bf16.vlgmr.msra.gmra.mrb[60].mxu1 %vm2417_vm0, %v2619_v32 }
 0x636   :  { %2721 = vmatpush1.bf16.msra.mxu1 %v6102_v37  ;;  %2752 = vmatprep.mubr.bf16.mxu1 %v5576_v8 }
 0x637   :  { %2722 = vmatprep.subr.bf16.mxu1 %v6107_v41 }
 0x63a   :  { %2723 = vmatpush1.bf16.msra.mxu1 %v6115_v46 }
 0x63b   :  { %2724 = vmatprep.subr.bf16.mxu1 %v6123_v49 }
 0x63e   :  { %2725 = vmatpush1.bf16.msra.mxu1 %v6132_v56 }
 0x63f   :  { %2726 = vmatprep.subr.bf16.mxu1 %v6137_v59 }
 0x642   :  { %2727 = vmatpush1.bf16.msra.mxu1 %v6147_v2 }
 0x643   :  { %2817 = vmatprep.subr.bf16.mxu1 %v6082_v9 }
 0x708   :  { %v2657_v34 = vpop.f32.mrb[60].mxu1 }
 0x709   :  { %v2666_v39 = vadd.f32 %v2657_v34, %v2155_v16  ;;  %v2659_v40 = vpop.f32.mrb[61].mxu1 }
 0x70a   :  { %v2667_v43 = vadd.f32 %v2659_v40, %v2157_v33  ;;  %v2661_v44 = vpop.f32.mrb[62].mxu1 }
 0x70b   :  { %v2670_v45 = vmul.f32 0.5, %v2666_v39  ;;  %v2668_v47 = vadd.f32 %v2661_v44, %v2159_v35  ;;  %v2663_v48 = vpop.f32.mrb[63].mxu1 }
 0x70c   :  { %v2669_v50 = vadd.f32 %v2663_v48, %v2161_v42  ;;  %v2680_v57 = vmul.f32 0.5, %v2667_v43 }
 0x70d   :  { %5336 = vtanh.f32 %v2670_v45  ;;  %v2671_v27 = vmul.f32 0.5, %v2668_v47 }
 0x70e   :  { %v2681_v58 = vmul.f32 0.5, %v2669_v50 }
 0x70f   :  { %5338 = vtanh.f32 %v2671_v27 }
 0x710   :  { %5340 = vtanh.f32 %v2667_v43 }
 0x711   :  { %5342 = vtanh.f32 %v2669_v50 }
 0x712   :  { %5344 = vtanh.f32 %v2680_v57 }
 0x713   :  { %5346 = vtanh.f32 %v2681_v58 }
 0x717   :  { %v5337_v28 = vpop.eup %5336 }
 0x718   :  { %v2674_v51 = vadd.f32 1.0, %v5337_v28 }
 0x719   :  { %v5339_v52 = vpop.eup %5338 }
 0x71a   :  { %v2676_v29 = vmul.f32 0.5, %v2674_v51  ;;  %v2675_v53 = vadd.f32 1.0, %v5339_v52  ;;  %v5341_v54 = vpop.eup %5340 }
 0x71b   :  { %v5343_v30 = vpop.eup %5342 }
 0x71c   :  { %v2677_v55 = vmul.f32 0.5, %v2675_v53  ;;  %v2690_v23 = vmul.f32 %v5341_v54, %v2676_v29  ;;  %v2688_v25 = vmul.f32 %v2676_v29, %v6258_v6  ;;  %v5345_v0 = vpop.eup %5344 }
 0x71d   :  { %v5347_v1 = vpop.eup %5346  ;;  %v2684_v3 = vadd.f32 1.0, %v5345_v0 }
 0x71e   :  { %2694 = vrot.lane.b32.xlu0 %v2690_v23, %s5577_s18  ;;  %v2691_v24 = vmul.f32 %v5343_v30, %v2677_v55  ;;  %v2689_v62 = vmul.f32 %v2677_v55, %v2604_v12  ;;  %v2685_v4 = vadd.f32 1.0, %v5347_v1 }
 0x71f   :  { %v2686_v7 = vmul.f32 0.5, %v2684_v3 }
 0x720   :  { %2696 = vrot.lane.b32.xlu1 %v2691_v24, %s5577_s18  ;;  %v2687_v11 = vmul.f32 0.5, %v2685_v4 }
 0x790   :  { %v2695_v60 = vpop.permute.xlu0 %2694 }
 0x791   :  { %v2700_v61 = vadd.f32 %v2695_v60, %v2688_v25 }
 0x792   :  { %v2697_v63 = vpop.permute.xlu1 %2696 }
 0x793   :  { %5348 = vtanh.f32 %v2700_v61  ;;  %v2701_v26 = vadd.f32 %v2697_v63, %v2689_v62 }
 0x795   :  { %5350 = vtanh.f32 %v2701_v26 }
 0x79d   :  { %v5349_v5 = vpop.eup %5348 }
 0x79e   :  { %v2704_v10 = vmul.f32 %v5349_v5, %v2686_v7 }
 0x79f   :  { %v5351_v13 = vpop.eup %5350 }
 0x7a0   :  { %v2705_v15 = vmul.f32 %v5351_v13, %v2687_v11 }
 0x7a2   :  { %v2713_v17 = vpack.c.bf16 %v2705_v15, %v2704_v10 }
 0x7a4   :  { %2715 = vrot.lane.b32.xlu0 %v2713_v17, %s5577_s18 }
 0x816   :  { %v2716_v6 = vpop.permute.xlu0 %2715 }
 0x817   :  { %4453 = vmatmul.mubr.msk.bf16.vlgmr.msra.gmra.mrb[0].mxu1 %vm2417_vm0, %v2716_v6 }
 0x818   :  { %2818 = vmatpush1.bf16.msra.mxu1 %v6102_v37  ;;  %2849 = vmatprep.mubr.bf16.mxu1 %v5576_v8 }
 0x819   :  { %2819 = vmatprep.subr.bf16.mxu1 %v6107_v41 }
 0x81c   :  { %2820 = vmatpush1.bf16.msra.mxu1 %v6115_v46 }
 0x81d   :  { %2821 = vmatprep.subr.bf16.mxu1 %v6123_v49 }
 0x820   :  { %2822 = vmatpush1.bf16.msra.mxu1 %v6132_v56 }
 0x821   :  { %2823 = vmatprep.subr.bf16.mxu1 %v6137_v59 }
 0x824   :  { %2824 = vmatpush1.bf16.msra.mxu1 %v6147_v2 }
 0x825   :  { %2914 = vmatprep.subr.bf16.mxu1 %v6082_v9 }
 0x8ea   :  { %v2754_v12 = vpop.f32.mrb[0].mxu1 }
 0x8eb   :  { %v4914_v18 = vadd.f32 %v2754_v12, %v6223_v36  ;;  %v2756_v19 = vpop.f32.mrb[1].mxu1 }
 0x8ec   :  { %v2758_v20 = vpop.f32.mrb[2].mxu1  ;;  %v4915_v14 = vadd.f32 %v2756_v19, %v6225_v38 }
 0x8ed   :  { %v2767_v21 = vmul.f32 0.5, %v4914_v18  ;;  %v4916_v22 = vadd.f32 %v2758_v20, %v6223_v36  ;;  %v2760_v31 = vpop.f32.mrb[3].mxu1 }
 0x8ee   :  { %v4917_v16 = vadd.f32 %v2760_v31, %v6225_v38  ;;  %v2777_v48 = vmul.f32 0.5, %v4915_v14 }
 0x8ef   :  { %5352 = vtanh.f32 %v2767_v21  ;;  %v2768_v32 = vmul.f32 0.5, %v4916_v22 }
 0x8f0   :  { %v2778_v50 = vmul.f32 0.5, %v4917_v16 }
 0x8f1   :  { %5354 = vtanh.f32 %v2768_v32 }
 0x8f2   :  { %5356 = vtanh.f32 %v4915_v14 }
 0x8f3   :  { %5358 = vtanh.f32 %v4917_v16 }
 0x8f4   :  { %5360 = vtanh.f32 %v2777_v48 }
 0x8f5   :  { %5362 = vtanh.f32 %v2778_v50 }
 0x8f9   :  { %v5353_v33 = vpop.eup %5352 }
 0x8fa   :  { %v2771_v34 = vadd.f32 1.0, %v5353_v33 }
 0x8fb   :  { %v5355_v35 = vpop.eup %5354 }
 0x8fc   :  { %v2773_v39 = vmul.f32 0.5, %v2771_v34  ;;  %v2772_v40 = vadd.f32 1.0, %v5355_v35  ;;  %v5357_v42 = vpop.eup %5356 }
 0x8fd   :  { %v5359_v45 = vpop.eup %5358 }
 0x8fe   :  { %v2774_v43 = vmul.f32 0.5, %v2772_v40  ;;  %v2787_v44 = vmul.f32 %v5357_v42, %v2773_v39  ;;  %v2785_v27 = vmul.f32 %v2773_v39, %v2700_v61  ;;  %v5361_v54 = vpop.eup %5360 }
 0x8ff   :  { %v5363_v55 = vpop.eup %5362  ;;  %v2781_v23 = vadd.f32 1.0, %v5361_v54 }
 0x900   :  { %2791 = vrot.lane.b32.xlu1 %v2787_v44, %s5577_s18  ;;  %v2788_v47 = vmul.f32 %v5359_v45, %v2774_v43  ;;  %v2786_v52 = vmul.f32 %v2774_v43, %v2701_v26  ;;  %v2782_v30 = vadd.f32 1.0, %v5363_v55 }
 0x901   :  { %v2783_v57 = vmul.f32 0.5, %v2781_v23 }
 0x902   :  { %2793 = vrot.lane.b32.xlu0 %v2788_v47, %s5577_s18  ;;  %v2784_v58 = vmul.f32 0.5, %v2782_v30 }
 0x972   :  { %v2792_v28 = vpop.permute.xlu1 %2791 }
 0x973   :  { %v2797_v51 = vadd.f32 %v2792_v28, %v2785_v27 }
 0x974   :  { %v2794_v29 = vpop.permute.xlu0 %2793 }
 0x975   :  { %5364 = vtanh.f32 %v2797_v51  ;;  %v2798_v53 = vadd.f32 %v2794_v29, %v2786_v52  ;;  %v6330_v29 = vld [vmem:[%s6596_s4 + $0x4] ss:$8 sps:$4 sm:$0xff]  }
 0x977   :  { %5366 = vtanh.f32 %v2798_v53 }
 0x97f   :  { %v5365_v24 = vpop.eup %5364 }
 0x980   :  { %v2801_v60 = vmul.f32 %v5365_v24, %v2783_v57 }
 0x981   :  { %v5367_v25 = vpop.eup %5366 }
 0x982   :  { %v2802_v62 = vmul.f32 %v5367_v25, %v2784_v58 }
 0x984   :  { %v2810_v63 = vpack.c.bf16 %v2802_v62, %v2801_v60 }
 0x986   :  { %2812 = vrot.lane.b32.xlu1 %v2810_v63, %s5577_s18 }
 0x9f8   :  { %v2813_v61 = vpop.permute.xlu1 %2812 }
 0x9f9   :  { %4454 = vmatmul.mubr.msk.bf16.vlgmr.msra.gmra.mrb[4].mxu1 %vm2417_vm0, %v2813_v61 }
 0x9fa   :  { %2915 = vmatpush1.bf16.msra.mxu1 %v6102_v37  ;;  %2946 = vmatprep.mubr.bf16.mxu1 %v5576_v8 }
 0x9fb   :  { %2916 = vmatprep.subr.bf16.mxu1 %v6107_v41 }
 0x9fe   :  { %2917 = vmatpush1.bf16.msra.mxu1 %v6115_v46 }
 0x9ff   :  { %2918 = vmatprep.subr.bf16.mxu1 %v6123_v49 }
 0xa02   :  { %2919 = vmatpush1.bf16.msra.mxu1 %v6132_v56 }
 0xa03   :  { %2920 = vmatprep.subr.bf16.mxu1 %v6137_v59 }
 0xa06   :  { %2921 = vmatpush1.bf16.msra.mxu1 %v6147_v2 }
 0xa07   :  { %3011 = vmatprep.subr.bf16.mxu1 %v6082_v9 }
 0xacc   :  { %v2851_v26 = vpop.f32.mrb[4].mxu1 }
 0xacd   :  { %v4918_v0 = vadd.f32 %v2851_v26, %v6223_v36  ;;  %v2853_v1 = vpop.f32.mrb[5].mxu1 }
 0xace   :  { %v2855_v3 = vpop.f32.mrb[6].mxu1  ;;  %v4919_v11 = vadd.f32 %v2853_v1, %v6225_v38 }
 0xacf   :  { %v2864_v4 = vmul.f32 0.5, %v4918_v0  ;;  %v4920_v5 = vadd.f32 %v2855_v3, %v6223_v36  ;;  %v2857_v7 = vpop.f32.mrb[7].mxu1 }
 0xad0   :  { %v4921_v10 = vadd.f32 %v2857_v7, %v6225_v38  ;;  %v2874_v31 = vmul.f32 0.5, %v4919_v11 }
 0xad1   :  { %5368 = vtanh.f32 %v2864_v4  ;;  %v2865_v13 = vmul.f32 0.5, %v4920_v5 }
 0xad2   :  { %v2875_v14 = vmul.f32 0.5, %v4921_v10 }
 0xad3   :  { %5370 = vtanh.f32 %v2865_v13 }
 0xad4   :  { %5372 = vtanh.f32 %v4919_v11 }
 0xad5   :  { %5374 = vtanh.f32 %v4921_v10 }
 0xad6   :  { %5376 = vtanh.f32 %v2874_v31 }
 0xad7   :  { %5378 = vtanh.f32 %v2875_v14  ;;  %v6350_v14 = vld [vmem:[%s6596_s4] ss:$8 sps:$4 sm:$0xff]  }
 0xadb   :  { %v5369_v15 = vpop.eup %5368 }
 0xadc   :  { %v2868_v9 = vadd.f32 1.0, %v5369_v15 }
 0xadd   :  { %v5371_v17 = vpop.eup %5370 }
 0xade   :  { %v2870_v6 = vmul.f32 0.5, %v2868_v9  ;;  %v2869_v12 = vadd.f32 1.0, %v5371_v17  ;;  %v5373_v18 = vpop.eup %5372 }
 0xadf   :  { %v5375_v21 = vpop.eup %5374 }
 0xae0   :  { %v2871_v19 = vmul.f32 0.5, %v2869_v12  ;;  %v2884_v20 = vmul.f32 %v5373_v18, %v2870_v6  ;;  %v2882_v32 = vmul.f32 %v2870_v6, %v2797_v51  ;;  %v5377_v40 = vpop.eup %5376 }
 0xae1   :  { %v5379_v42 = vpop.eup %5378  ;;  %v2878_v43 = vadd.f32 1.0, %v5377_v40 }
 0xae2   :  { %2888 = vrot.lane.b32.xlu0 %v2884_v20, %s5577_s18  ;;  %v2885_v22 = vmul.f32 %v5375_v21, %v2871_v19  ;;  %v2883_v34 = vmul.f32 %v2871_v19, %v2798_v53  ;;  %v2879_v44 = vadd.f32 1.0, %v5379_v42 }
 0xae3   :  { %v2880_v47 = vmul.f32 0.5, %v2878_v43 }
 0xae4   :  { %2890 = vrot.lane.b32.xlu1 %v2885_v22, %s5577_s18  ;;  %v2881_v48 = vmul.f32 0.5, %v2879_v44 }
 0xb54   :  { %v2889_v16 = vpop.permute.xlu0 %2888 }
 0xb55   :  { %v2894_v33 = vadd.f32 %v2889_v16, %v2882_v32  ;;  %v6357_v32 = vld [vmem:[%s6596_s4 + $0x14] ss:$8 sps:$4 sm:$0xff]   ;;  %v6363_v16 = vld [vmem:[%s6596_s4 + $0x10] ss:$8 sps:$4 sm:$0xff]  }
 0xb56   :  { %v2891_v35 = vpop.permute.xlu1 %2890 }
 0xb57   :  { %5380 = vtanh.f32 %v2894_v33  ;;  %v2895_v39 = vadd.f32 %v2891_v35, %v2883_v34  ;;  %v6375_v34 = vld [vmem:[%s6596_s4 + $0x20] ss:$8 sps:$4 sm:$0xff]   ;;  %v6381_v35 = vld [vmem:[%s6596_s4 + $0x34] ss:$8 sps:$4 sm:$0xff]  }
 0xb59   :  { %5382 = vtanh.f32 %v2895_v39 }
 0xb61   :  { %v5381_v45 = vpop.eup %5380 }
 0xb62   :  { %v2898_v27 = vmul.f32 %v5381_v45, %v2880_v47 }
 0xb63   :  { %v5383_v50 = vpop.eup %5382 }
 0xb64   :  { %v2899_v28 = vmul.f32 %v5383_v50, %v2881_v48 }
 0xb66   :  { %v2907_v52 = vpack.c.bf16 %v2899_v28, %v2898_v27 }
 0xb68   :  { %2909 = vrot.lane.b32.xlu0 %v2907_v52, %s5577_s18 }
 0xbda   :  { %v2910_v51 = vpop.permute.xlu0 %2909 }
 0xbdb   :  { %4455 = vmatmul.mubr.msk.bf16.vlgmr.msra.gmra.mrb[8].mxu1 %vm2417_vm0, %v2910_v51 }
 0xbdc   :  { %3012 = vmatpush1.bf16.msra.mxu1 %v6102_v37  ;;  %3043 = vmatprep.mubr.bf16.mxu1 %v5576_v8 }
 0xbdd   :  { %3013 = vmatprep.subr.bf16.mxu1 %v6107_v41 }
 0xbe0   :  { %3014 = vmatpush1.bf16.msra.mxu1 %v6115_v46 }
 0xbe1   :  { %3015 = vmatprep.subr.bf16.mxu1 %v6123_v49 }
 0xbe4   :  { %3016 = vmatpush1.bf16.msra.mxu1 %v6132_v56 }
 0xbe5   :  { %3017 = vmatprep.subr.bf16.mxu1 %v6137_v59 }
 0xbe8   :  { %3018 = vmatpush1.bf16.msra.mxu1 %v6147_v2 }
 0xbe9   :  { %3108 = vmatprep.subr.bf16.mxu1 %v6330_v29 }
 0xcae   :  { %v2948_v37 = vpop.f32.mrb[8].mxu1 }
 0xcaf   :  { %v4922_v41 = vadd.f32 %v2948_v37, %v6223_v36  ;;  %v2950_v53 = vpop.f32.mrb[9].mxu1 }
 0xcb0   :  { %v2952_v46 = vpop.f32.mrb[10].mxu1  ;;  %v4923_v59 = vadd.f32 %v2950_v53, %v6225_v38 }
 0xcb1   :  { %v2961_v54 = vmul.f32 0.5, %v4922_v41  ;;  %v4924_v49 = vadd.f32 %v2952_v46, %v6223_v36  ;;  %v2954_v56 = vpop.f32.mrb[11].mxu1 }
 0xcb2   :  { %v4925_v23 = vadd.f32 %v2954_v56, %v6225_v38  ;;  %v2971_v0 = vmul.f32 0.5, %v4923_v59 }
 0xcb3   :  { %5384 = vtanh.f32 %v2961_v54  ;;  %v2962_v55 = vmul.f32 0.5, %v4924_v49 }
 0xcb4   :  { %v2972_v1 = vmul.f32 0.5, %v4925_v23 }
 0xcb5   :  { %5386 = vtanh.f32 %v2962_v55 }
 0xcb6   :  { %5388 = vtanh.f32 %v4923_v59 }
 0xcb7   :  { %5390 = vtanh.f32 %v4925_v23 }
 0xcb8   :  { %5392 = vtanh.f32 %v2971_v0 }
 0xcb9   :  { %5394 = vtanh.f32 %v2972_v1 }
 0xcbd   :  { %v5385_v30 = vpop.eup %5384 }
 0xcbe   :  { %v2965_v24 = vadd.f32 1.0, %v5385_v30 }
 0xcbf   :  { %v5387_v57 = vpop.eup %5386 }
 0xcc0   :  { %v2967_v58 = vmul.f32 0.5, %v2965_v24  ;;  %v2966_v25 = vadd.f32 1.0, %v5387_v57  ;;  %v5389_v60 = vpop.eup %5388 }
 0xcc1   :  { %v5391_v61 = vpop.eup %5390 }
 0xcc2   :  { %v2968_v62 = vmul.f32 0.5, %v2966_v25  ;;  %v2981_v63 = vmul.f32 %v5389_v60, %v2967_v58  ;;  %v2979_v3 = vmul.f32 %v2967_v58, %v2894_v33  ;;  %v5393_v10 = vpop.eup %5392  ;;  %v6369_v33 = vld [vmem:[%s6596_s4 + $0x24] ss:$8 sps:$4 sm:$0xff]  }
 0xcc3   :  { %v5395_v15 = vpop.eup %5394  ;;  %v2975_v9 = vadd.f32 1.0, %v5393_v10 }
 0xcc4   :  { %2985 = vrot.lane.b32.xlu1 %v2981_v63, %s5577_s18  ;;  %v2982_v26 = vmul.f32 %v5391_v61, %v2968_v62  ;;  %v2980_v7 = vmul.f32 %v2968_v62, %v2895_v39  ;;  %v2976_v17 = vadd.f32 1.0, %v5395_v15 }
 0xcc5   :  { %v2977_v12 = vmul.f32 0.5, %v2975_v9 }
 0xcc6   :  { %2987 = vrot.lane.b32.xlu0 %v2982_v26, %s5577_s18  ;;  %v2978_v18 = vmul.f32 0.5, %v2976_v17 }
 0xd36   :  { %v2986_v4 = vpop.permute.xlu1 %2985 }
 0xd37   :  { %v6339_v5 = vadd.f32 %v2986_v4, %v2979_v3 }
 0xd38   :  { %v2988_v11 = vpop.permute.xlu0 %2987 }
 0xd39   :  { %5396 = vtanh.f32 %v6339_v5  ;;  %v6342_v13 = vadd.f32 %v2988_v11, %v2980_v7  ;;  %v6406_v11 = vld [vmem:[%s6596_s4 + $0x30] ss:$8 sps:$4 sm:$0xff]  }
 0xd3b   :  { %5398 = vtanh.f32 %v6342_v13 }
 0xd43   :  { %v5397_v6 = vpop.eup %5396 }
 0xd44   :  { %v2995_v20 = vmul.f32 %v5397_v6, %v2977_v12 }
 0xd45   :  { %v5399_v19 = vpop.eup %5398 }
 0xd46   :  { %v2996_v21 = vmul.f32 %v5399_v19, %v2978_v18 }
 0xd48   :  { %v3004_v22 = vpack.c.bf16 %v2996_v21, %v2995_v20 }
 0xd4a   :  { %3006 = vrot.lane.b32.xlu1 %v3004_v22, %s5577_s18 }
 0xdbc   :  { %v3007_v31 = vpop.permute.xlu1 %3006 }
 0xdbd   :  { %4456 = vmatmul.mubr.msk.bf16.vlgmr.msra.gmra.mrb[12].mxu1 %vm2417_vm0, %v3007_v31 }
 0xdbe   :  { %3109 = vmatpush1.bf16.msra.mxu1 %v6350_v14  ;;  %3140 = vmatprep.mubr.bf16.mxu1 %v5576_v8 }
 0xdbf   :  { %3110 = vmatprep.subr.bf16.mxu1 %v6357_v32 }
 0xdc2   :  { %3111 = vmatpush1.bf16.msra.mxu1 %v6363_v16 }
 0xdc3   :  { %3112 = vmatprep.subr.bf16.mxu1 %v6369_v33 }
 0xdc6   :  { %3113 = vmatpush1.bf16.msra.mxu1 %v6375_v34 }
 0xdc7   :  { %3114 = vmatprep.subr.bf16.mxu1 %v6381_v35 }
 0xdca   :  { %3115 = vmatpush1.bf16.msra.mxu1 %v6147_v2 }
 0xdcb   :  { %3205 = vmatprep.subr.bf16.mxu1 %v6330_v29 }
 0xe90   :  { %v3045_v39 = vpop.f32.mrb[12].mxu1 }
 0xe91   :  { %v4926_v40 = vadd.f32 %v3045_v39, %v6223_v36  ;;  %v3047_v42 = vpop.f32.mrb[13].mxu1 }
 0xe92   :  { %v3049_v43 = vpop.f32.mrb[14].mxu1  ;;  %v4927_v48 = vadd.f32 %v3047_v42, %v6225_v38 }
 0xe93   :  { %v3058_v44 = vmul.f32 0.5, %v4926_v40  ;;  %v4928_v45 = vadd.f32 %v3049_v43, %v6223_v36  ;;  %v3051_v47 = vpop.f32.mrb[15].mxu1 }
 0xe94   :  { %v4929_v27 = vadd.f32 %v3051_v47, %v6225_v38  ;;  %v3068_v56 = vmul.f32 0.5, %v4927_v48 }
 0xe95   :  { %5400 = vtanh.f32 %v3058_v44  ;;  %v3059_v50 = vmul.f32 0.5, %v4928_v45 }
 0xe96   :  { %v3069_v59 = vmul.f32 0.5, %v4929_v27 }
 0xe97   :  { %5402 = vtanh.f32 %v3059_v50 }
 0xe98   :  { %5404 = vtanh.f32 %v4927_v48 }
 0xe99   :  { %5406 = vtanh.f32 %v4929_v27 }
 0xe9a   :  { %5408 = vtanh.f32 %v3068_v56 }
 0xe9b   :  { %5410 = vtanh.f32 %v3069_v59 }
 0xe9f   :  { %v5401_v2 = vpop.eup %5400 }
 0xea0   :  { %v3062_v28 = vadd.f32 1.0, %v5401_v2 }
 0xea1   :  { %v5403_v52 = vpop.eup %5402 }
 0xea2   :  { %v3064_v51 = vmul.f32 0.5, %v3062_v28  ;;  %v3063_v37 = vadd.f32 1.0, %v5403_v52  ;;  %v5405_v41 = vpop.eup %5404 }
 0xea3   :  { %v5407_v54 = vpop.eup %5406 }
 0xea4   :  { %v3065_v53 = vmul.f32 0.5, %v3063_v37  ;;  %v3078_v46 = vmul.f32 %v5405_v41, %v3064_v51  ;;  %v3076_v55 = vmul.f32 %v3064_v51, %v6339_v5  ;;  %v5409_v25 = vpop.eup %5408 }
 0xea5   :  { %v5411_v60 = vpop.eup %5410  ;;  %v3072_v62 = vadd.f32 1.0, %v5409_v25 }
 0xea6   :  { %3082 = vrot.lane.b32.xlu0 %v3078_v46, %s5577_s18  ;;  %v3079_v49 = vmul.f32 %v5407_v54, %v3065_v53  ;;  %v3077_v24 = vmul.f32 %v3065_v53, %v6342_v13  ;;  %v3073_v63 = vadd.f32 1.0, %v5411_v60 }
 0xea7   :  { %v3074_v26 = vmul.f32 0.5, %v3072_v62 }
 0xea8   :  { %3084 = vrot.lane.b32.xlu1 %v3079_v49, %s5577_s18  ;;  %v3075_v0 = vmul.f32 0.5, %v3073_v63 }
 0xf18   :  { %v3083_v23 = vpop.permute.xlu0 %3082 }
 0xf19   :  { %v3088_v30 = vadd.f32 %v3083_v23, %v3076_v55 }
 0xf1a   :  { %v3085_v57 = vpop.permute.xlu1 %3084 }
 0xf1b   :  { %5412 = vtanh.f32 %v3088_v30  ;;  %v3089_v58 = vadd.f32 %v3085_v57, %v3077_v24 }
 0xf1d   :  { %5414 = vtanh.f32 %v3089_v58 }
 0xf25   :  { %v5413_v61 = vpop.eup %5412 }
 0xf26   :  { %v3092_v3 = vmul.f32 %v5413_v61, %v3074_v26 }
 0xf27   :  { %v5415_v1 = vpop.eup %5414 }
 0xf28   :  { %v3093_v4 = vmul.f32 %v5415_v1, %v3075_v0 }
 0xf2a   :  { %v3101_v7 = vpack.c.bf16 %v3093_v4, %v3092_v3 }
 0xf2c   :  { %3103 = vrot.lane.b32.xlu0 %v3101_v7, %s5577_s18 }
 0xf9e   :  { %v3104_v5 = vpop.permute.xlu0 %3103 }
 0xf9f   :  { %4457 = vmatmul.mubr.msk.bf16.vlgmr.msra.gmra.mrb[16].mxu1 %vm2417_vm0, %v3104_v5 }
 0xfa0   :  { %3206 = vmatpush1.bf16.msra.mxu1 %v6350_v14  ;;  %3237 = vmatprep.mubr.bf16.mxu1 %v5576_v8 }
 0xfa1   :  { %3207 = vmatprep.subr.bf16.mxu1 %v6357_v32 }
 0xfa4   :  { %3208 = vmatpush1.bf16.msra.mxu1 %v6363_v16 }
 0xfa5   :  { %3209 = vmatprep.subr.bf16.mxu1 %v6369_v33 }
 0xfa8   :  { %3210 = vmatpush1.bf16.msra.mxu1 %v6375_v34 }
 0xfa9   :  { %3211 = vmatprep.subr.bf16.mxu1 %v6381_v35 }
 0xfac   :  { %3212 = vmatpush1.bf16.msra.mxu1 %v6406_v11 }
 0xfad   :  { %3302 = vmatprep.subr.bf16.mxu1 %v6330_v29 }
0x1072   :  { %v3142_v13 = vpop.f32.mrb[16].mxu1 }
0x1073   :  { %v4930_v10 = vadd.f32 %v3142_v13, %v6223_v36  ;;  %v3144_v15 = vpop.f32.mrb[17].mxu1 }
0x1074   :  { %v3146_v9 = vpop.f32.mrb[18].mxu1  ;;  %v4931_v18 = vadd.f32 %v3144_v15, %v6225_v38 }
0x1075   :  { %v3155_v17 = vmul.f32 0.5, %v4930_v10  ;;  %v4932_v6 = vadd.f32 %v3146_v9, %v6223_v36  ;;  %v3148_v12 = vpop.f32.mrb[19].mxu1 }
0x1076   :  { %v4933_v20 = vadd.f32 %v3148_v12, %v6225_v38  ;;  %v3165_v48 = vmul.f32 0.5, %v4931_v18 }
0x1077   :  { %5416 = vtanh.f32 %v3155_v17  ;;  %v3156_v19 = vmul.f32 0.5, %v4932_v6 }
0x1078   :  { %v3166_v50 = vmul.f32 0.5, %v4933_v20 }
0x1079   :  { %5418 = vtanh.f32 %v3156_v19 }
0x107a   :  { %5420 = vtanh.f32 %v4931_v18 }
0x107b   :  { %5422 = vtanh.f32 %v4933_v20 }
0x107c   :  { %5424 = vtanh.f32 %v3165_v48 }
0x107d   :  { %5426 = vtanh.f32 %v3166_v50 }
0x1081   :  { %v5417_v21 = vpop.eup %5416 }
0x1082   :  { %v3159_v22 = vadd.f32 1.0, %v5417_v21 }
0x1083   :  { %v5419_v31 = vpop.eup %5418 }
0x1084   :  { %v3161_v39 = vmul.f32 0.5, %v3159_v22  ;;  %v3160_v40 = vadd.f32 1.0, %v5419_v31  ;;  %v5421_v42 = vpop.eup %5420 }
0x1085   :  { %v5423_v45 = vpop.eup %5422 }
0x1086   :  { %v3162_v43 = vmul.f32 0.5, %v3160_v40  ;;  %v3175_v44 = vmul.f32 %v5421_v42, %v3161_v39  ;;  %v3173_v27 = vmul.f32 %v3161_v39, %v3088_v30  ;;  %v5425_v41 = vpop.eup %5424 }
0x1087   :  { %v5427_v53 = vpop.eup %5426  ;;  %v3169_v46 = vadd.f32 1.0, %v5425_v41 }
0x1088   :  { %3179 = vrot.lane.b32.xlu1 %v3175_v44, %s5577_s18  ;;  %v3176_v47 = vmul.f32 %v5423_v45, %v3162_v43  ;;  %v3174_v52 = vmul.f32 %v3162_v43, %v3089_v58  ;;  %v3170_v54 = vadd.f32 1.0, %v5427_v53 }
0x1089   :  { %v3171_v56 = vmul.f32 0.5, %v3169_v46 }
0x108a   :  { %3181 = vrot.lane.b32.xlu0 %v3176_v47, %s5577_s18  ;;  %v3172_v59 = vmul.f32 0.5, %v3170_v54 }
0x10fa   :  { %v3180_v2 = vpop.permute.xlu1 %3179 }
0x10fb   :  { %v3185_v28 = vadd.f32 %v3180_v2, %v3173_v27 }
0x10fc   :  { %v3182_v51 = vpop.permute.xlu0 %3181 }
0x10fd   :  { %5428 = vtanh.f32 %v3185_v28  ;;  %v3186_v37 = vadd.f32 %v3182_v51, %v3174_v52 }
0x10ff   :  { %5430 = vtanh.f32 %v3186_v37 }
0x1107   :  { %v5429_v49 = vpop.eup %5428 }
0x1108   :  { %v3189_v23 = vmul.f32 %v5429_v49, %v3171_v56 }
0x1109   :  { %v5431_v55 = vpop.eup %5430 }
0x110a   :  { %v3190_v24 = vmul.f32 %v5431_v55, %v3172_v59 }
0x110c   :  { %v3198_v57 = vpack.c.bf16 %v3190_v24, %v3189_v23 }
0x110e   :  { %3200 = vrot.lane.b32.xlu1 %v3198_v57, %s5577_s18 }
0x1180   :  { %v3201_v30 = vpop.permute.xlu1 %3200 }
0x1181   :  { %4458 = vmatmul.mubr.msk.bf16.vlgmr.msra.gmra.mrb[20].mxu1 %vm2417_vm0, %v3201_v30 }
0x1182   :  { %3303 = vmatpush1.bf16.msra.mxu1 %v6350_v14  ;;  %3334 = vmatprep.mubr.bf16.mxu1 %v5576_v8 }
0x1183   :  { %3304 = vmatprep.subr.bf16.mxu1 %v6357_v32 }
0x1186   :  { %3305 = vmatpush1.bf16.msra.mxu1 %v6363_v16 }
0x1187   :  { %3306 = vmatprep.subr.bf16.mxu1 %v6369_v33 }
0x118a   :  { %3307 = vmatpush1.bf16.msra.mxu1 %v6375_v34 }
0x118b   :  { %3308 = vmatprep.subr.bf16.mxu1 %v6381_v35 }
0x118e   :  { %3309 = vmatpush1.bf16.msra.mxu1 %v6406_v11 }
0x118f   :  { %3399 = vmatprep.subr.bf16.mxu1 %v6330_v29 }
0x1254   :  { %v3239_v58 = vpop.f32.mrb[20].mxu1 }
0x1255   :  { %v4934_v25 = vadd.f32 %v3239_v58, %v6223_v36  ;;  %v3241_v60 = vpop.f32.mrb[21].mxu1 }
0x1256   :  { %v3243_v62 = vpop.f32.mrb[22].mxu1  ;;  %v4935_v0 = vadd.f32 %v3241_v60, %v6225_v38 }
0x1257   :  { %v3252_v63 = vmul.f32 0.5, %v4934_v25  ;;  %v4936_v61 = vadd.f32 %v3243_v62, %v6223_v36  ;;  %v3245_v26 = vpop.f32.mrb[23].mxu1 }
0x1258   :  { %v4937_v3 = vadd.f32 %v3245_v26, %v6225_v38  ;;  %v3262_v18 = vmul.f32 0.5, %v4935_v0 }
0x1259   :  { %5432 = vtanh.f32 %v3252_v63  ;;  %v3253_v1 = vmul.f32 0.5, %v4936_v61 }
0x125a   :  { %v3263_v19 = vmul.f32 0.5, %v4937_v3 }
0x125b   :  { %5434 = vtanh.f32 %v3253_v1 }
0x125c   :  { %5436 = vtanh.f32 %v4935_v0 }
0x125d   :  { %5438 = vtanh.f32 %v4937_v3 }
0x125e   :  { %5440 = vtanh.f32 %v3262_v18 }
0x125f   :  { %5442 = vtanh.f32 %v3263_v19 }
0x1263   :  { %v5433_v4 = vpop.eup %5432 }
0x1264   :  { %v3256_v7 = vadd.f32 1.0, %v5433_v4 }
0x1265   :  { %v5435_v5 = vpop.eup %5434 }
0x1266   :  { %v3258_v13 = vmul.f32 0.5, %v3256_v7  ;;  %v3257_v10 = vadd.f32 1.0, %v5435_v5  ;;  %v5437_v15 = vpop.eup %5436 }
0x1267   :  { %v5439_v6 = vpop.eup %5438 }
0x1268   :  { %v3259_v9 = vmul.f32 0.5, %v3257_v10  ;;  %v3272_v17 = vmul.f32 %v5437_v15, %v3258_v13  ;;  %v3270_v20 = vmul.f32 %v3258_v13, %v3185_v28  ;;  %v5441_v42 = vpop.eup %5440 }
0x1269   :  { %v5443_v43 = vpop.eup %5442  ;;  %v3266_v44 = vadd.f32 1.0, %v5441_v42 }
0x126a   :  { %3276 = vrot.lane.b32.xlu0 %v3272_v17, %s5577_s18  ;;  %v3273_v12 = vmul.f32 %v5439_v6, %v3259_v9  ;;  %v3271_v31 = vmul.f32 %v3259_v9, %v3186_v37  ;;  %v3267_v45 = vadd.f32 1.0, %v5443_v43 }
0x126b   :  { %v3268_v48 = vmul.f32 0.5, %v3266_v44 }
0x126c   :  { %3278 = vrot.lane.b32.xlu1 %v3273_v12, %s5577_s18  ;;  %v3269_v50 = vmul.f32 0.5, %v3267_v45 }
0x12dc   :  { %v3277_v21 = vpop.permute.xlu0 %3276 }
0x12dd   :  { %v3282_v22 = vadd.f32 %v3277_v21, %v3270_v20 }
0x12de   :  { %v3279_v39 = vpop.permute.xlu1 %3278 }
0x12df   :  { %5444 = vtanh.f32 %v3282_v22  ;;  %v3283_v40 = vadd.f32 %v3279_v39, %v3271_v31 }
0x12e1   :  { %5446 = vtanh.f32 %v3283_v40 }
0x12e9   :  { %v5445_v47 = vpop.eup %5444 }
0x12ea   :  { %v3286_v2 = vmul.f32 %v5445_v47, %v3268_v48 }
0x12eb   :  { %v5447_v27 = vpop.eup %5446 }
0x12ec   :  { %v3287_v52 = vmul.f32 %v5447_v27, %v3269_v50 }
0x12ee   :  { %v3295_v51 = vpack.c.bf16 %v3287_v52, %v3286_v2 }
0x12f0   :  { %3297 = vrot.lane.b32.xlu0 %v3295_v51, %s5577_s18 }
0x1362   :  { %v3298_v28 = vpop.permute.xlu0 %3297 }
0x1363   :  { %4459 = vmatmul.mubr.msk.bf16.vlgmr.msra.gmra.mrb[24].mxu1 %vm2417_vm0, %v3298_v28 }
0x1364   :  { %3400 = vmatpush1.bf16.msra.mxu1 %v6350_v14  ;;  %3431 = vmatprep.mubr.bf16.mxu1 %v5576_v8 }
0x1365   :  { %3401 = vmatprep.subr.bf16.mxu1 %v6357_v32 }
0x1368   :  { %3402 = vmatpush1.bf16.msra.mxu1 %v6363_v16 }
0x1369   :  { %3403 = vmatprep.subr.bf16.mxu1 %v6369_v33 }
0x136c   :  { %3404 = vmatpush1.bf16.msra.mxu1 %v6375_v34 }
0x136d   :  { %3405 = vmatprep.subr.bf16.mxu1 %v6381_v35 }
0x1370   :  { %3406 = vmatpush1.bf16.msra.mxu1 %v6406_v11 }
0x1371   :  { %3496 = vmatprep.subr.bf16.mxu1 %v6330_v29 }
0x1436   :  { %v3336_v37 = vpop.f32.mrb[24].mxu1 }
0x1437   :  { %v4938_v41 = vadd.f32 %v3336_v37, %v6223_v36  ;;  %v3338_v53 = vpop.f32.mrb[25].mxu1 }
0x1438   :  { %v3340_v46 = vpop.f32.mrb[26].mxu1  ;;  %v4939_v59 = vadd.f32 %v3338_v53, %v6225_v38 }
0x1439   :  { %v3349_v54 = vmul.f32 0.5, %v4938_v41  ;;  %v4940_v49 = vadd.f32 %v3340_v46, %v6223_v36  ;;  %v3342_v56 = vpop.f32.mrb[27].mxu1 }
0x143a   :  { %v4941_v23 = vadd.f32 %v3342_v56, %v6225_v38  ;;  %v3359_v0 = vmul.f32 0.5, %v4939_v59 }
0x143b   :  { %5448 = vtanh.f32 %v3349_v54  ;;  %v3350_v55 = vmul.f32 0.5, %v4940_v49 }
0x143c   :  { %v3360_v1 = vmul.f32 0.5, %v4941_v23 }
0x143d   :  { %5450 = vtanh.f32 %v3350_v55 }
0x143e   :  { %5452 = vtanh.f32 %v4939_v59 }
0x143f   :  { %5454 = vtanh.f32 %v4941_v23 }
0x1440   :  { %5456 = vtanh.f32 %v3359_v0 }
0x1441   :  { %5458 = vtanh.f32 %v3360_v1 }
0x1445   :  { %v5449_v24 = vpop.eup %5448 }
0x1446   :  { %v3353_v57 = vadd.f32 1.0, %v5449_v24 }
0x1447   :  { %v5451_v30 = vpop.eup %5450 }
0x1448   :  { %v3355_v58 = vmul.f32 0.5, %v3353_v57  ;;  %v3354_v25 = vadd.f32 1.0, %v5451_v30  ;;  %v5453_v60 = vpop.eup %5452 }
0x1449   :  { %v5455_v61 = vpop.eup %5454 }
0x144a   :  { %v3356_v62 = vmul.f32 0.5, %v3354_v25  ;;  %v3369_v63 = vmul.f32 %v5453_v60, %v3355_v58  ;;  %v3367_v3 = vmul.f32 %v3355_v58, %v3282_v22  ;;  %v5457_v15 = vpop.eup %5456 }
0x144b   :  { %v5459_v9 = vpop.eup %5458  ;;  %v3363_v17 = vadd.f32 1.0, %v5457_v15 }
0x144c   :  { %3373 = vrot.lane.b32.xlu1 %v3369_v63, %s5577_s18  ;;  %v3370_v26 = vmul.f32 %v5455_v61, %v3356_v62  ;;  %v3368_v5 = vmul.f32 %v3356_v62, %v3283_v40  ;;  %v3364_v6 = vadd.f32 1.0, %v5459_v9 }
0x144d   :  { %v3365_v18 = vmul.f32 0.5, %v3363_v17 }
0x144e   :  { %3375 = vrot.lane.b32.xlu0 %v3370_v26, %s5577_s18  ;;  %v3366_v19 = vmul.f32 0.5, %v3364_v6 }
0x14be   :  { %v3374_v4 = vpop.permute.xlu1 %3373 }
0x14bf   :  { %v3379_v7 = vadd.f32 %v3374_v4, %v3367_v3 }
0x14c0   :  { %v3376_v13 = vpop.permute.xlu0 %3375 }
0x14c1   :  { %5460 = vtanh.f32 %v3379_v7  ;;  %v3380_v10 = vadd.f32 %v3376_v13, %v3368_v5 }
0x14c3   :  { %5462 = vtanh.f32 %v3380_v10 }
0x14cb   :  { %v5461_v12 = vpop.eup %5460 }
0x14cc   :  { %v3383_v21 = vmul.f32 %v5461_v12, %v3365_v18 }
0x14cd   :  { %v5463_v20 = vpop.eup %5462 }
0x14ce   :  { %v3384_v31 = vmul.f32 %v5463_v20, %v3366_v19 }
0x14d0   :  { %v3392_v39 = vpack.c.bf16 %v3384_v31, %v3383_v21 }
0x14d2   :  { %3394 = vrot.lane.b32.xlu1 %v3392_v39, %s5577_s18 }
0x1544   :  { %v3395_v22 = vpop.permute.xlu1 %3394 }
0x1545   :  { %4460 = vmatmul.mubr.msk.bf16.vlgmr.msra.gmra.mrb[28].mxu1 %vm2417_vm0, %v3395_v22 }
0x1546   :  { %3497 = vmatpush1.bf16.msra.mxu1 %v6350_v14  ;;  %3528 = vmatprep.mubr.bf16.mxu1 %v5576_v8 }
0x1547   :  { %3498 = vmatprep.subr.bf16.mxu1 %v6357_v32 }
0x154a   :  { %3499 = vmatpush1.bf16.msra.mxu1 %v6363_v16 }
0x154b   :  { %3500 = vmatprep.subr.bf16.mxu1 %v6369_v33 }
0x154e   :  { %3501 = vmatpush1.bf16.msra.mxu1 %v6375_v34 }
0x154f   :  { %3502 = vmatprep.subr.bf16.mxu1 %v6381_v35 }
0x1552   :  { %3503 = vmatpush1.bf16.msra.mxu1 %v6406_v11 }
0x1553   :  { %3593 = vmatprep.subr.bf16.mxu1 %v6330_v29 }
0x1618   :  { %v3433_v40 = vpop.f32.mrb[28].mxu1 }
0x1619   :  { %v4942_v42 = vadd.f32 %v3433_v40, %v6223_v36  ;;  %v3435_v43 = vpop.f32.mrb[29].mxu1 }
0x161a   :  { %v3437_v44 = vpop.f32.mrb[30].mxu1  ;;  %v4943_v50 = vadd.f32 %v3435_v43, %v6225_v38 }
0x161b   :  { %v3446_v45 = vmul.f32 0.5, %v4942_v42  ;;  %v4944_v47 = vadd.f32 %v3437_v44, %v6223_v36  ;;  %v3439_v48 = vpop.f32.mrb[31].mxu1 }
0x161c   :  { %v4945_v2 = vadd.f32 %v3439_v48, %v6225_v38  ;;  %v3456_v59 = vmul.f32 0.5, %v4943_v50 }
0x161d   :  { %5464 = vtanh.f32 %v3446_v45  ;;  %v3447_v27 = vmul.f32 0.5, %v4944_v47 }
0x161e   :  { %v3457_v55 = vmul.f32 0.5, %v4945_v2 }
0x161f   :  { %5466 = vtanh.f32 %v3447_v27 }
0x1620   :  { %5468 = vtanh.f32 %v4943_v50 }
0x1621   :  { %5470 = vtanh.f32 %v4945_v2 }
0x1622   :  { %5472 = vtanh.f32 %v3456_v59 }
0x1623   :  { %5474 = vtanh.f32 %v3457_v55 }
0x1627   :  { %v5465_v52 = vpop.eup %5464 }
0x1628   :  { %v3450_v51 = vadd.f32 1.0, %v5465_v52 }
0x1629   :  { %v5467_v28 = vpop.eup %5466 }
0x162a   :  { %v3452_v37 = vmul.f32 0.5, %v3450_v51  ;;  %v3451_v41 = vadd.f32 1.0, %v5467_v28  ;;  %v5469_v53 = vpop.eup %5468 }
0x162b   :  { %v5471_v49 = vpop.eup %5470 }
0x162c   :  { %v3453_v46 = vmul.f32 0.5, %v3451_v41  ;;  %v3466_v54 = vmul.f32 %v5469_v53, %v3452_v37  ;;  %v3464_v23 = vmul.f32 %v3452_v37, %v3379_v7  ;;  %v5473_v60 = vpop.eup %5472 }
0x162d   :  { %v5475_v62 = vpop.eup %5474  ;;  %v3460_v63 = vadd.f32 1.0, %v5473_v60 }
0x162e   :  { %3470 = vrot.lane.b32.xlu0 %v3466_v54, %s5577_s18  ;;  %v3467_v56 = vmul.f32 %v5471_v49, %v3453_v46  ;;  %v3465_v30 = vmul.f32 %v3453_v46, %v3380_v10  ;;  %v3461_v61 = vadd.f32 1.0, %v5475_v62 }
0x162f   :  { %v3462_v0 = vmul.f32 0.5, %v3460_v63 }
0x1630   :  { %3472 = vrot.lane.b32.xlu1 %v3467_v56, %s5577_s18  ;;  %v3463_v1 = vmul.f32 0.5, %v3461_v61 }
0x16a0   :  { %v3471_v24 = vpop.permute.xlu0 %3470 }
0x16a1   :  { %v3476_v57 = vadd.f32 %v3471_v24, %v3464_v23 }
0x16a2   :  { %v3473_v58 = vpop.permute.xlu1 %3472 }
0x16a3   :  { %5476 = vtanh.f32 %v3476_v57  ;;  %v3477_v25 = vadd.f32 %v3473_v58, %v3465_v30 }
0x16a5   :  { %5478 = vtanh.f32 %v3477_v25 }
0x16ad   :  { %v5477_v26 = vpop.eup %5476 }
0x16ae   :  { %v3480_v4 = vmul.f32 %v5477_v26, %v3462_v0 }
0x16af   :  { %v5479_v3 = vpop.eup %5478 }
0x16b0   :  { %v3481_v5 = vmul.f32 %v5479_v3, %v3463_v1 }
0x16b2   :  { %v3489_v13 = vpack.c.bf16 %v3481_v5, %v3480_v4 }
0x16b4   :  { %3491 = vrot.lane.b32.xlu0 %v3489_v13, %s5577_s18 }
0x1726   :  { %v3492_v7 = vpop.permute.xlu0 %3491 }
0x1727   :  { %4461 = vmatmul.mubr.msk.bf16.vlgmr.msra.gmra.mrb[32].mxu1 %vm2417_vm0, %v3492_v7 }
0x1728   :  { %3594 = vmatpush1.bf16.msra.mxu1 %v6350_v14  ;;  %3625 = vmatprep.mubr.bf16.mxu1 %v5576_v8 }
0x1729   :  { %3595 = vmatprep.subr.bf16.mxu1 %v6357_v32 }
0x172c   :  { %3596 = vmatpush1.bf16.msra.mxu1 %v6363_v16 }
0x172d   :  { %3597 = vmatprep.subr.bf16.mxu1 %v6369_v33 }
0x1730   :  { %3598 = vmatpush1.bf16.msra.mxu1 %v6375_v34 }
0x1731   :  { %3599 = vmatprep.subr.bf16.mxu1 %v6381_v35 }
0x1734   :  { %3600 = vmatpush1.bf16.msra.mxu1 %v6406_v11 }
0x1735   :  { %3690 = vmatprep.subr.bf16.mxu1 %v6330_v29 }
0x17fa   :  { %v3530_v10 = vpop.f32.mrb[32].mxu1 }
0x17fb   :  { %v4946_v15 = vadd.f32 %v3530_v10, %v6223_v36  ;;  %v3532_v9 = vpop.f32.mrb[33].mxu1 }
0x17fc   :  { %v3534_v17 = vpop.f32.mrb[34].mxu1  ;;  %v4947_v19 = vadd.f32 %v3532_v9, %v6225_v38 }
0x17fd   :  { %v3543_v6 = vmul.f32 0.5, %v4946_v15  ;;  %v4948_v12 = vadd.f32 %v3534_v17, %v6223_v36  ;;  %v3536_v18 = vpop.f32.mrb[35].mxu1 }
0x17fe   :  { %v4949_v21 = vadd.f32 %v3536_v18, %v6225_v38  ;;  %v3553_v50 = vmul.f32 0.5, %v4947_v19 }
0x17ff   :  { %5480 = vtanh.f32 %v3543_v6  ;;  %v3544_v20 = vmul.f32 0.5, %v4948_v12 }
0x1800   :  { %v3554_v27 = vmul.f32 0.5, %v4949_v21 }
0x1801   :  { %5482 = vtanh.f32 %v3544_v20 }
0x1802   :  { %5484 = vtanh.f32 %v4947_v19 }
0x1803   :  { %5486 = vtanh.f32 %v4949_v21 }
0x1804   :  { %5488 = vtanh.f32 %v3553_v50 }
0x1805   :  { %5490 = vtanh.f32 %v3554_v27 }
0x1809   :  { %v5481_v31 = vpop.eup %5480 }
0x180a   :  { %v3547_v39 = vadd.f32 1.0, %v5481_v31 }
0x180b   :  { %v5483_v22 = vpop.eup %5482 }
0x180c   :  { %v3549_v40 = vmul.f32 0.5, %v3547_v39  ;;  %v3548_v42 = vadd.f32 1.0, %v5483_v22  ;;  %v5485_v43 = vpop.eup %5484 }
0x180d   :  { %v5487_v47 = vpop.eup %5486 }
0x180e   :  { %v3550_v44 = vmul.f32 0.5, %v3548_v42  ;;  %v3563_v45 = vmul.f32 %v5485_v43, %v3549_v40  ;;  %v3561_v2 = vmul.f32 %v3549_v40, %v3476_v57  ;;  %v5489_v53 = vpop.eup %5488 }
0x180f   :  { %v5491_v46 = vpop.eup %5490  ;;  %v3557_v54 = vadd.f32 1.0, %v5489_v53 }
0x1810   :  { %3567 = vrot.lane.b32.xlu1 %v3563_v45, %s5577_s18  ;;  %v3564_v48 = vmul.f32 %v5487_v47, %v3550_v44  ;;  %v3562_v28 = vmul.f32 %v3550_v44, %v3477_v25  ;;  %v3558_v49 = vadd.f32 1.0, %v5491_v46 }
0x1811   :  { %v3559_v59 = vmul.f32 0.5, %v3557_v54 }
0x1812   :  { %3569 = vrot.lane.b32.xlu0 %v3564_v48, %s5577_s18  ;;  %v3560_v55 = vmul.f32 0.5, %v3558_v49 }
0x1882   :  { %v3568_v52 = vpop.permute.xlu1 %3567 }
0x1883   :  { %v3573_v51 = vadd.f32 %v3568_v52, %v3561_v2 }
0x1884   :  { %v3570_v37 = vpop.permute.xlu0 %3569 }
0x1885   :  { %5492 = vtanh.f32 %v3573_v51  ;;  %v3574_v41 = vadd.f32 %v3570_v37, %v3562_v28 }
0x1887   :  { %5494 = vtanh.f32 %v3574_v41 }
0x188f   :  { %v5493_v56 = vpop.eup %5492 }
0x1890   :  { %v3577_v24 = vmul.f32 %v5493_v56, %v3559_v59 }
0x1891   :  { %v5495_v23 = vpop.eup %5494 }
0x1892   :  { %v3578_v30 = vmul.f32 %v5495_v23, %v3560_v55 }
0x1894   :  { %v3586_v58 = vpack.c.bf16 %v3578_v30, %v3577_v24 }
0x1896   :  { %3588 = vrot.lane.b32.xlu1 %v3586_v58, %s5577_s18 }
0x1908   :  { %v3589_v57 = vpop.permute.xlu1 %3588 }
0x1909   :  { %4462 = vmatmul.mubr.msk.bf16.vlgmr.msra.gmra.mrb[36].mxu1 %vm2417_vm0, %v3589_v57 }
0x190a   :  { %3691 = vmatpush1.bf16.msra.mxu1 %v6350_v14  ;;  %3722 = vmatprep.mubr.bf16.mxu1 %v5576_v8 }
0x190b   :  { %3692 = vmatprep.subr.bf16.mxu1 %v6357_v32 }
0x190e   :  { %3693 = vmatpush1.bf16.msra.mxu1 %v6363_v16 }
0x190f   :  { %3694 = vmatprep.subr.bf16.mxu1 %v6369_v33 }
0x1912   :  { %3695 = vmatpush1.bf16.msra.mxu1 %v6375_v34 }
0x1913   :  { %3696 = vmatprep.subr.bf16.mxu1 %v6381_v35 }
0x1916   :  { %3697 = vmatpush1.bf16.msra.mxu1 %v6406_v11 }
0x1917   :  { %3787 = vmatprep.subr.bf16.mxu1 %v6330_v29 }
0x19dc   :  { %v3627_v25 = vpop.f32.mrb[36].mxu1 }
0x19dd   :  { %v4950_v60 = vadd.f32 %v3627_v25, %v6223_v36  ;;  %v3629_v62 = vpop.f32.mrb[37].mxu1 }
0x19de   :  { %v3631_v63 = vpop.f32.mrb[38].mxu1  ;;  %v4951_v1 = vadd.f32 %v3629_v62, %v6225_v38 }
0x19df   :  { %v3640_v61 = vmul.f32 0.5, %v4950_v60  ;;  %v4952_v26 = vadd.f32 %v3631_v63, %v6223_v36  ;;  %v3633_v0 = vpop.f32.mrb[39].mxu1 }
0x19e0   :  { %v4953_v4 = vadd.f32 %v3633_v0, %v6225_v38  ;;  %v3650_v19 = vmul.f32 0.5, %v4951_v1 }
0x19e1   :  { %5496 = vtanh.f32 %v3640_v61  ;;  %v3641_v3 = vmul.f32 0.5, %v4952_v26 }
0x19e2   :  { %v3651_v20 = vmul.f32 0.5, %v4953_v4 }
0x19e3   :  { %5498 = vtanh.f32 %v3641_v3 }
0x19e4   :  { %5500 = vtanh.f32 %v4951_v1 }
0x19e5   :  { %5502 = vtanh.f32 %v4953_v4 }
0x19e6   :  { %5504 = vtanh.f32 %v3650_v19 }
0x19e7   :  { %5506 = vtanh.f32 %v3651_v20 }
0x19eb   :  { %v5497_v5 = vpop.eup %5496 }
0x19ec   :  { %v3644_v13 = vadd.f32 1.0, %v5497_v5 }
0x19ed   :  { %v5499_v7 = vpop.eup %5498 }
0x19ee   :  { %v3646_v10 = vmul.f32 0.5, %v3644_v13  ;;  %v3645_v15 = vadd.f32 1.0, %v5499_v7  ;;  %v5501_v9 = vpop.eup %5500 }
0x19ef   :  { %v5503_v12 = vpop.eup %5502 }
0x19f0   :  { %v3647_v17 = vmul.f32 0.5, %v3645_v15  ;;  %v3660_v6 = vmul.f32 %v5501_v9, %v3646_v10  ;;  %v3658_v21 = vmul.f32 %v3646_v10, %v3573_v51  ;;  %v5505_v43 = vpop.eup %5504 }
0x19f1   :  { %v5507_v44 = vpop.eup %5506  ;;  %v3654_v45 = vadd.f32 1.0, %v5505_v43 }
0x19f2   :  { %3664 = vrot.lane.b32.xlu0 %v3660_v6, %s5577_s18  ;;  %v3661_v18 = vmul.f32 %v5503_v12, %v3647_v17  ;;  %v3659_v22 = vmul.f32 %v3647_v17, %v3574_v41  ;;  %v3655_v47 = vadd.f32 1.0, %v5507_v44 }
0x19f3   :  { %v3656_v50 = vmul.f32 0.5, %v3654_v45 }
0x19f4   :  { %3666 = vrot.lane.b32.xlu1 %v3661_v18, %s5577_s18  ;;  %v3657_v27 = vmul.f32 0.5, %v3655_v47 }
0x1a64   :  { %v3665_v31 = vpop.permute.xlu0 %3664 }
0x1a65   :  { %v3670_v39 = vadd.f32 %v3665_v31, %v3658_v21 }
0x1a66   :  { %v3667_v40 = vpop.permute.xlu1 %3666 }
0x1a67   :  { %5508 = vtanh.f32 %v3670_v39  ;;  %v3671_v42 = vadd.f32 %v3667_v40, %v3659_v22 }
0x1a69   :  { %5510 = vtanh.f32 %v3671_v42 }
0x1a71   :  { %v5509_v48 = vpop.eup %5508 }
0x1a72   :  { %v3674_v52 = vmul.f32 %v5509_v48, %v3656_v50 }
0x1a73   :  { %v5511_v2 = vpop.eup %5510 }
0x1a74   :  { %v3675_v28 = vmul.f32 %v5511_v2, %v3657_v27 }
0x1a76   :  { %v3683_v37 = vpack.c.bf16 %v3675_v28, %v3674_v52 }
0x1a78   :  { %3685 = vrot.lane.b32.xlu0 %v3683_v37, %s5577_s18 }
0x1aea   :  { %v3686_v51 = vpop.permute.xlu0 %3685 }
0x1aeb   :  { %4463 = vmatmul.mubr.msk.bf16.vlgmr.msra.gmra.mrb[40].mxu1 %vm2417_vm0, %v3686_v51 }
0x1aec   :  { %3788 = vmatpush1.bf16.msra.mxu1 %v6350_v14  ;;  %3819 = vmatprep.mubr.bf16.mxu1 %v5576_v8 }
0x1aed   :  { %3789 = vmatprep.subr.bf16.mxu1 %v6357_v32 }
0x1af0   :  { %3790 = vmatpush1.bf16.msra.mxu1 %v6363_v16 }
0x1af1   :  { %3791 = vmatprep.subr.bf16.mxu1 %v6369_v33 }
0x1af4   :  { %3792 = vmatpush1.bf16.msra.mxu1 %v6375_v34 }
0x1af5   :  { %3793 = vmatprep.subr.bf16.mxu1 %v6381_v35 }
0x1af8   :  { %3794 = vmatpush1.bf16.msra.mxu1 %v6406_v11 }
0x1af9   :  { %3884 = vmatprep.subr.bf16.mxu1 %v6330_v29 }
0x1bbe   :  { %v3724_v41 = vpop.f32.mrb[40].mxu1 }
0x1bbf   :  { %v4954_v53 = vadd.f32 %v3724_v41, %v6223_v36  ;;  %v3726_v46 = vpop.f32.mrb[41].mxu1 }
0x1bc0   :  { %v3728_v54 = vpop.f32.mrb[42].mxu1  ;;  %v4955_v55 = vadd.f32 %v3726_v46, %v6225_v38 }
0x1bc1   :  { %v3737_v49 = vmul.f32 0.5, %v4954_v53  ;;  %v4956_v56 = vadd.f32 %v3728_v54, %v6223_v36  ;;  %v3730_v59 = vpop.f32.mrb[43].mxu1 }
0x1bc2   :  { %v4957_v24 = vadd.f32 %v3730_v59, %v6225_v38  ;;  %v3747_v0 = vmul.f32 0.5, %v4955_v55 }
0x1bc3   :  { %5512 = vtanh.f32 %v3737_v49  ;;  %v3738_v23 = vmul.f32 0.5, %v4956_v56 }
0x1bc4   :  { %v3748_v1 = vmul.f32 0.5, %v4957_v24 }
0x1bc5   :  { %5514 = vtanh.f32 %v3738_v23 }
0x1bc6   :  { %5516 = vtanh.f32 %v4955_v55 }
0x1bc7   :  { %5518 = vtanh.f32 %v4957_v24 }
0x1bc8   :  { %5520 = vtanh.f32 %v3747_v0 }
0x1bc9   :  { %5522 = vtanh.f32 %v3748_v1 }
0x1bcd   :  { %v5513_v30 = vpop.eup %5512 }
0x1bce   :  { %v3741_v29 = vadd.f32 1.0, %v5513_v30 }
0x1bcf   :  { %v5515_v58 = vpop.eup %5514 }
0x1bd0   :  { %v3743_v57 = vmul.f32 0.5, %v3741_v29  ;;  %v3742_v25 = vadd.f32 1.0, %v5515_v58  ;;  %v5517_v60 = vpop.eup %5516 }
0x1bd1   :  { %v5519_v61 = vpop.eup %5518 }
0x1bd2   :  { %v3744_v62 = vmul.f32 0.5, %v3742_v25  ;;  %v3757_v63 = vmul.f32 %v5517_v60, %v3743_v57  ;;  %v3755_v3 = vmul.f32 %v3743_v57, %v3670_v39  ;;  %v5521_v15 = vpop.eup %5520 }
0x1bd3   :  { %v5523_v9 = vpop.eup %5522  ;;  %v3751_v17 = vadd.f32 1.0, %v5521_v15 }
0x1bd4   :  { %3761 = vrot.lane.b32.xlu1 %v3757_v63, %s5577_s18  ;;  %v3758_v26 = vmul.f32 %v5519_v61, %v3744_v62  ;;  %v3756_v13 = vmul.f32 %v3744_v62, %v3671_v42  ;;  %v3752_v6 = vadd.f32 1.0, %v5523_v9 }
0x1bd5   :  { %v3753_v18 = vmul.f32 0.5, %v3751_v17 }
0x1bd6   :  { %3763 = vrot.lane.b32.xlu0 %v3758_v26, %s5577_s18  ;;  %v3754_v19 = vmul.f32 0.5, %v3752_v6 }
0x1c46   :  { %v3762_v4 = vpop.permute.xlu1 %3761 }
0x1c47   :  { %v3767_v5 = vadd.f32 %v3762_v4, %v3755_v3 }
0x1c48   :  { %v3764_v7 = vpop.permute.xlu0 %3763 }
0x1c49   :  { %5524 = vtanh.f32 %v3767_v5  ;;  %v3768_v10 = vadd.f32 %v3764_v7, %v3756_v13 }
0x1c4b   :  { %5526 = vtanh.f32 %v3768_v10 }
0x1c53   :  { %v5525_v12 = vpop.eup %5524 }
0x1c54   :  { %v3771_v21 = vmul.f32 %v5525_v12, %v3753_v18 }
0x1c55   :  { %v5527_v20 = vpop.eup %5526 }
0x1c56   :  { %v3772_v31 = vmul.f32 %v5527_v20, %v3754_v19 }
0x1c58   :  { %v3780_v22 = vpack.c.bf16 %v3772_v31, %v3771_v21  ;;  %v3968_v31 = vld [vmem:[%s6601_s8 + $0x8] sm:$0xff] }
0x1c5a   :  { %3782 = vrot.lane.b32.xlu1 %v3780_v22, %s5577_s18  ;;  %v3969_v22 = vld [vmem:[%s6601_s8 + $0x10] sm:$0xff] }
0x1ccc   :  { %v3783_v39 = vpop.permute.xlu1 %3782 }
0x1ccd   :  { %4464 = vmatmul.mubr.msk.bf16.vlgmr.msra.gmra.mrb[44].mxu1 %vm2417_vm0, %v3783_v39 }
0x1cce   :  { %3885 = vmatpush1.bf16.msra.mxu1 %v6350_v14  ;;  %3916 = vmatprep.mubr.bf16.mxu1 %v5576_v8 }
0x1ccf   :  { %3886 = vmatprep.subr.bf16.mxu1 %v6357_v32 }
0x1cd2   :  { %3887 = vmatpush1.bf16.msra.mxu1 %v6363_v16 }
0x1cd3   :  { %3888 = vmatprep.subr.bf16.mxu1 %v6369_v33 }
0x1cd6   :  { %3889 = vmatpush1.bf16.msra.mxu1 %v6375_v34 }
0x1cd7   :  { %3890 = vmatprep.subr.bf16.mxu1 %v6381_v35 }
0x1cda   :  { %3891 = vmatpush1.bf16.msra.mxu1 %v6406_v11 }
0x1da0   :  { %v3821_v40 = vpop.f32.mrb[44].mxu1 }
0x1da1   :  { %v4958_v42 = vadd.f32 %v3821_v40, %v6223_v36  ;;  %v3823_v43 = vpop.f32.mrb[45].mxu1  ;;  %v3970_v40 = vld [vmem:[%s6601_s8 + $0x18] sm:$0xff] }
0x1da2   :  { %v3825_v44 = vpop.f32.mrb[46].mxu1  ;;  %v4959_v32 = vadd.f32 %v3823_v43, %v6225_v38  ;;  %v3971_v43 = vld [vmem:[%s6601_s8 + $0x20] sm:$0xff] }
0x1da3   :  { %v3834_v14 = vmul.f32 0.5, %v4958_v42  ;;  %v4960_v8 = vadd.f32 %v3825_v44, %v6223_v36  ;;  %v3827_v45 = vpop.f32.mrb[47].mxu1  ;;  %v4862_v42 = vpack.c.bf16 %v3970_v40, %v3969_v22  ;;  %v3972_v44 = vld [vmem:[%s6601_s8 + $0x28] sm:$0xff] }
0x1da4   :  { %v4961_v33 = vadd.f32 %v3827_v45, %v6225_v38  ;;  %v3844_v37 = vmul.f32 0.5, %v4959_v32  ;;  %v3974_v45 = vld [vmem:[%s6601_s8 + $0x38] sm:$0xff] }
0x1da5   :  { %5528 = vtanh.f32 %v3834_v14  ;;  %v3835_v16 = vmul.f32 0.5, %v4960_v8  ;;  %v4866_v14 = vpack.c.bf16 %v3972_v44, %v3971_v43  ;;  %v3973_v8 = vld [vmem:[%s6601_s8 + $0x30] sm:$0xff] }
0x1da6   :  { %v3845_v51 = vmul.f32 0.5, %v4961_v33 }
0x1da7   :  { %5530 = vtanh.f32 %v3835_v16 }
0x1da8   :  { %5532 = vtanh.f32 %v4959_v32  ;;  %v4870_v32 = vpack.c.bf16 %v3974_v45, %v3973_v8 }
0x1da9   :  { %5534 = vtanh.f32 %v4961_v33 }
0x1daa   :  { %5536 = vtanh.f32 %v3844_v37 }
0x1dab   :  { %5538 = vtanh.f32 %v3845_v51 }
0x1daf   :  { %v5529_v34 = vpop.eup %5528 }
0x1db0   :  { %v3838_v35 = vadd.f32 1.0, %v5529_v34 }
0x1db1   :  { %v5531_v11 = vpop.eup %5530 }
0x1db2   :  { %v3840_v47 = vmul.f32 0.5, %v3838_v35  ;;  %v3839_v48 = vadd.f32 1.0, %v5531_v11  ;;  %v5533_v50 = vpop.eup %5532 }
0x1db3   :  { %v5535_v52 = vpop.eup %5534 }
0x1db4   :  { %v3841_v27 = vmul.f32 0.5, %v3839_v48  ;;  %v3854_v2 = vmul.f32 %v5533_v50, %v3840_v47  ;;  %v3852_v41 = vmul.f32 %v3840_v47, %v3767_v5  ;;  %v5537_v59 = vpop.eup %5536 }
0x1db5   :  { %v5539_v55 = vpop.eup %5538  ;;  %v3848_v23 = vadd.f32 1.0, %v5537_v59  ;;  %v4466_v59 = vld [vmem:[%s6602_s9] ss:$0 sm:$0xff] }
0x1db6   :  { %3858 = vrot.lane.b32.xlu0 %v3854_v2, %s5577_s18  ;;  %v3855_v28 = vmul.f32 %v5535_v52, %v3841_v27  ;;  %v3853_v54 = vmul.f32 %v3841_v27, %v3768_v10  ;;  %v3849_v24 = vadd.f32 1.0, %v5539_v55 }
0x1db7   :  { %v3850_v29 = vmul.f32 0.5, %v3848_v23 }
0x1db8   :  { %3860 = vrot.lane.b32.xlu1 %v3855_v28, %s5577_s18  ;;  %v3851_v58 = vmul.f32 0.5, %v3849_v24 }
0x1e28   :  { %v3859_v53 = vpop.permute.xlu0 %3858 }
0x1e29   :  { %v6534_v46 = vadd.f32 %v3859_v53, %v3852_v41 }
0x1e2a   :  { %v3861_v49 = vpop.permute.xlu1 %3860 }
0x1e2b   :  { %5540 = vtanh.f32 %v6534_v46  ;;  %v6537_v56 = vadd.f32 %v3861_v49, %v3853_v54 }
0x1e2d   :  { %5542 = vtanh.f32 %v6537_v56 }
0x1e35   :  { %v5541_v30 = vpop.eup %5540 }
0x1e36   :  { %v3868_v25 = vmul.f32 %v5541_v30, %v3850_v29 }
0x1e37   :  { %v5543_v57 = vpop.eup %5542 }
0x1e38   :  { %v3869_v60 = vmul.f32 %v5543_v57, %v3851_v58 }
0x1e3a   :  { %v3877_v62 = vpack.c.bf16 %v3869_v60, %v3868_v25 }
0x1e3c   :  { %3879 = vrot.lane.b32.xlu0 %v3877_v62, %s5577_s18 }
0x1eae   :  { %v3880_v63 = vpop.permute.xlu0 %3879 }
0x1eaf   :  { %4465 = vmatmul.mubr.msk.bf16.vlgmr.msra.gmra.mrb[48].mxu1 %vm2417_vm0, %v3880_v63 }
0x1f82   :  { %v3918_v61 = vpop.f32.mrb[48].mxu1 }
0x1f83   :  { %v4962_v26 = vadd.f32 %v3918_v61, %v6223_v36  ;;  %v3920_v0 = vpop.f32.mrb[49].mxu1 }
0x1f84   :  { %v3922_v1 = vpop.f32.mrb[50].mxu1  ;;  %v4963_v13 = vadd.f32 %v3920_v0, %v6225_v38 }
0x1f85   :  { %v3931_v3 = vmul.f32 0.5, %v4962_v26  ;;  %v4964_v4 = vadd.f32 %v3922_v1, %v6223_v36  ;;  %v3924_v5 = vpop.f32.mrb[51].mxu1 }
0x1f86   :  { %v4965_v10 = vadd.f32 %v3924_v5, %v6225_v38  ;;  %v3967_v38 = vld [vmem:[%s6601_s8] sm:$0xff]  ;;  %v3941_v16 = vmul.f32 0.5, %v4963_v13 }
0x1f87   :  { %5544 = vtanh.f32 %v3931_v3  ;;  %v3932_v7 = vmul.f32 0.5, %v4964_v4  ;;  %v4858_v39 = vpack.c.bf16 %v3968_v31, %v3967_v38 }
0x1f88   :  { %v3942_v33 = vmul.f32 0.5, %v4965_v10 }
0x1f89   :  { %5546 = vtanh.f32 %v3932_v7  ;;  %4859 = vmatprep.subr.bf16.mxu0 %v4858_v39 }
0x1f8a   :  { %5548 = vtanh.f32 %v4963_v13  ;;  %4861 = vmatpush3.bf16.msra.mxu0 %v4858_v39 }
0x1f8b   :  { %5550 = vtanh.f32 %v4965_v10  ;;  %4863 = vmatprep.subr.bf16.mxu0 %v4862_v42 }
0x1f8c   :  { %5552 = vtanh.f32 %v3941_v16 }
0x1f8d   :  { %5554 = vtanh.f32 %v3942_v33 }
0x1f8e   :  { %4865 = vmatpush3.bf16.msra.mxu0 %v4862_v42 }
0x1f8f   :  { %4867 = vmatprep.subr.bf16.mxu0 %v4866_v14 }
0x1f91   :  { %v5545_v15 = vpop.eup %5544 }
0x1f92   :  { %v3935_v9 = vadd.f32 1.0, %v5545_v15  ;;  %4869 = vmatpush3.bf16.msra.mxu0 %v4866_v14 }
0x1f93   :  { %v5547_v17 = vpop.eup %5546  ;;  %4871 = vmatprep.subr.bf16.mxu0 %v4870_v32 }
0x1f94   :  { %v3937_v6 = vmul.f32 0.5, %v3935_v9  ;;  %v3936_v12 = vadd.f32 1.0, %v5547_v17  ;;  %v5549_v18 = vpop.eup %5548 }
0x1f95   :  { %v5551_v21 = vpop.eup %5550 }
0x1f96   :  { %v3938_v19 = vmul.f32 0.5, %v3936_v12  ;;  %v3951_v20 = vmul.f32 %v5549_v18, %v3937_v6  ;;  %4873 = vmatpush3.bf16.msra.mxu0 %v4870_v32  ;;  %v3949_v34 = vmul.f32 %v3937_v6, %v6534_v46  ;;  %v5553_v27 = vpop.eup %5552 }
0x1f97   :  { %v5555_v2 = vpop.eup %5554  ;;  %v3945_v52 = vadd.f32 1.0, %v5553_v27 }
0x1f98   :  { %3955 = vrot.lane.b32.xlu1 %v3951_v20, %s5577_s18  ;;  %v3952_v36 = vmul.f32 %v5551_v21, %v3938_v19  ;;  %v3950_v47 = vmul.f32 %v3938_v19, %v6537_v56  ;;  %v3946_v28 = vadd.f32 1.0, %v5555_v2 }
0x1f99   :  { %v3947_v37 = vmul.f32 0.5, %v3945_v52 }
0x1f9a   :  { %3957 = vrot.lane.b32.xlu0 %v3952_v36, %s5577_s18  ;;  %v3948_v53 = vmul.f32 0.5, %v3946_v28 }
0x200a   :  { %v3956_v35 = vpop.permute.xlu1 %3955 }
0x200b   :  { %v3961_v11 = vadd.f32 %v3956_v35, %v3949_v34 }
0x200c   :  { %v3958_v48 = vpop.permute.xlu0 %3957 }
0x200d   :  { %5556 = vtanh.f32 %v3961_v11  ;;  %v3962_v50 = vadd.f32 %v3958_v48, %v3950_v47 }
0x200f   :  { %5558 = vtanh.f32 %v3962_v50 }
0x2017   :  { %v5557_v51 = vpop.eup %5556 }
0x2018   :  { %v3965_v41 = vmul.f32 %v5557_v51, %v3947_v37 }
0x2019   :  { %v5559_v54 = vpop.eup %5558 }
0x201a   :  { %3984 = vrot.lane.b32.xlu1 %v3965_v41, %s5577_s18  ;;  %v3966_v46 = vmul.f32 %v5559_v54, %v3948_v53 }
0x201c   :  { %3986 = vrot.lane.b32.xlu0 %v3966_v46, %s5577_s18 }
0x208c   :  { %v3985_v49 = vpop.permute.xlu1 %3984 }
0x208d   :  { %4855 = vmatprep.mubr.msk.f32.mxu0 %vm2417_vm0, %v3985_v49 }
0x208e   :  { %v3987_v56 = vpop.permute.xlu0 %3986 }
0x208f   :  { %4856 = vmatmul.mubr.msk.f32.vlgmr.msra.gmra.mrb[44].mxu0 %vm2417_vm0, %v3987_v56 }
0x2162   :  { %v4857_v55 = vpop.f32.mrb[44].mxu0 }
0x2163   :  { %v4064_v23 = vadd.f32 %v4857_v55, %v4466_v59  ;;  %v4058_v24 = vpop.f32.mrb[45].mxu0 }
0x2164   :  { %v4059_v30 = vadd.f32 %v4466_v59, %v4058_v24 }
0x2165   :  { %v4071_v29 = vsel %vm4067_vm1, %v4064_v23, -inf }
0x2166   :  { %4072 = vmax.xlane.f32.xlu0 %v4071_v29  ;;  %v4068_v58 = vsel %vm4067_vm1, %v4059_v30, -inf }
0x2167   :  { %4069 = vmax.xlane.f32.xlu1 %v4068_v58 }
0x21f3   :  { %v4073_v57 = vpop.xlane.xlu0 %4072 }
0x21f4   :  { %v4075_v25 = vsub.f32 %v4064_v23, %v4073_v57  ;;  %v4070_v60 = vpop.xlane.xlu1 %4069 }
0x21f5   :  { %v4074_v62 = vsub.f32 %v4059_v30, %v4070_v60 }
0x21f6   :  { %v4078_v63 = vmul.f32 1.442695, %v4075_v25 }
0x21f7   :  { %v4076_v61 = vmul.f32 1.442695, %v4074_v62 }
0x21f8   :  { %5560 = vpow2.f32 %v4078_v63 }
0x21f9   :  { %5562 = vpow2.f32 %v4076_v61 }
0x2202   :  { %v5561_v26 = vpop.eup %5560 }
0x2203   :  { %v5563_v0 = vpop.eup %5562  ;;  %v4083_v1 = vsel %vm4067_vm1, %v5561_v26, 0.0 }
0x2204   :  { %4084 = vadd.xlane.f32.xlu1 %v4083_v1  ;;  %v4080_v3 = vsel %vm4067_vm1, %v5563_v0, 0.0 }
0x2205   :  { %4081 = vadd.xlane.f32.xlu0 %v4080_v3 }
0x2291   :  { %v4085_v4 = vpop.xlane.xlu1 %4084 }
0x2292   :  { %5564 = vlog2.f32 %v4085_v4  ;;  %v4082_v5 = vpop.xlane.xlu0 %4081 }
0x2293   :  { %5566 = vlog2.f32 %v4082_v5 }
0x229c   :  { %v5565_v13 = vpop.eup %5564 }
0x229d   :  { %v5567_v7 = vpop.eup %5566  ;;  %v4089_v10 = vmul.f32 0.6931472, %v5565_v13 }
0x229e   :  { %v4087_v15 = vmul.f32 0.6931472, %v5567_v7 }
0x229f   :  { %v4091_v9 = vsub.f32 %v4075_v25, %v4089_v10 }
0x22a0   :  { %v4090_v17 = vsub.f32 %v4074_v62, %v4087_v15 }
0x22a1   :  { %4093 = vst.msk [vmem:[%s6603_s10 + $0x8] sm:$0xff] %vm4067_vm1, %v4091_v9 }
0x22a2   :  { %4092 = vst.msk [vmem:[%s6603_s10] sm:$0xff] %vm4067_vm1, %v4090_v17 }

</bundles_post_ra>
